<compile_context>
chip_gen: v5e
topology: v5e:2x2
jax: 0.10.0
libtpu: 0.0.40
codegen_flags: <defaults>
</compile_context>

<pallas_src>
import jax
import jax.numpy as jnp
from jax.experimental import pallas as pl
from jax.experimental.pallas import tpu as pltpu

HIDDEN = 1024  # fixed by the module definition


def _round_up(x, m):
    return ((x + m - 1) // m) * m


def _ae_kernel(x_ref, w1_ref, b1_ref, w2_ref, b2_ref,
               w3_ref, b3_ref, w4_ref, b4_ref, o_ref):
    bf16 = jnp.bfloat16
    f32 = jnp.float32

    # encoder: Linear(D,1024) -> ReLU -> (Dropout=identity) -> Linear(1024,E)
    x = x_ref[...].astype(bf16)
    h1 = jnp.dot(x, w1_ref[...], preferred_element_type=f32)          # MXU bf16, f32 acc
    h1 = jnp.maximum(h1 + b1_ref[...], 0.0)                           # f32 epilogue (VPU)
    z = jnp.dot(h1.astype(bf16), w2_ref[...], preferred_element_type=f32) + b2_ref[...]

    # decoder: Linear(E,1024) -> ReLU -> Linear(1024,D) -> Sigmoid
    h2 = jnp.dot(z.astype(bf16), w3_ref[...], preferred_element_type=f32)
    h2 = jnp.maximum(h2 + b3_ref[...], 0.0)
    y = jnp.dot(h2.astype(bf16), w4_ref[...], preferred_element_type=f32) + b4_ref[...]

    # sigmoid = 1 / (1 + exp(-y)); exp and approx reciprocal both issue on EUP.
    o_ref[...] = pl.reciprocal(1.0 + jnp.exp(-y), approx=True).astype(o_ref.dtype)


def autoencoder_forward(x, params, *, tile_b=256):
    """Fused forward of the Autoencoder. x: (B, D) float32, returns (B, D) float32."""
    w1, b1, w2, b2, w3, b3, w4, b4 = params
    B, D = x.shape
    E = w2.shape[1]

    # ---- pick an effective batch tile ----------------------------------
    # Large tiles feed the MXU with many result rows; but ensure >=2 grid
    # steps when the batch allows it so v7x can shard across both cores.
    tile_b = max(8, _round_up(tile_b, 8))
    tile_b = min(tile_b, max(8, _round_up(pl.cdiv(B, 2), 8)))
    grid_b = pl.cdiv(B, tile_b)
    B_pad = grid_b * tile_b
    if B_pad != B:
        x = jnp.pad(x, ((0, B_pad - B), (0, 0)))

    # ---- bf16 weights for the MXU (biases stay f32 for the epilogue) ---
    bf16 = jnp.bfloat16
    w1b, w2b, w3b, w4b = (w.astype(bf16) for w in (w1, w2, w3, w4))

    # ---- VMEM budget (actual need, clamped to fit v7x's 64 MiB) --------
    weight_bytes = 2 * (D * HIDDEN + HIDDEN * E + E * HIDDEN + HIDDEN * D)  # bf16, 1-buf
    bias_bytes = 4 * (HIDDEN + E + HIDDEN + D)
    io_bytes = 2 * 2 * tile_b * D * 4            # x + out tiles, double-buffered, f32
    interm_bytes = 8 * tile_b * HIDDEN * 4       # h1/h2/z temporaries (generous)
    need = weight_bytes + bias_bytes + io_bytes + interm_bytes
    vmem_limit = min(max(3 * need, 32 << 20), 48 << 20)

    # ---- BlockSpecs ------------------------------------------------------
    # Grid-invariant weights/biases: single-buffered (fetched once, resident).
    def full(shape):
        return pl.BlockSpec(shape, lambda i: (0,) * len(shape),
                            pipeline_mode=pl.Buffered(1))

    out = pl.pallas_call(
        _ae_kernel,
        out_shape=jax.ShapeDtypeStruct((B_pad, D), jnp.float32),
        grid_spec=pltpu.PrefetchScalarGridSpec(
            num_scalar_prefetch=0,
            grid=(grid_b,),
            in_specs=[
                pl.BlockSpec((tile_b, D), lambda i: (i, 0)),   # x tile (double-buffered)
                full((D, HIDDEN)), full((1, HIDDEN)),          # enc linear1
                full((HIDDEN, E)), full((1, E)),               # enc linear2
                full((E, HIDDEN)), full((1, HIDDEN)),          # dec linear1
                full((HIDDEN, D)), full((1, D)),               # dec linear2
            ],
            out_specs=pl.BlockSpec((tile_b, D), lambda i: (i, 0)),
        ),
        compiler_params=pltpu.CompilerParams(
            dimension_semantics=("parallel",),
            vmem_limit_bytes=int(vmem_limit),
        ),
    )(x, w1b, b1, w2b, b2, w3b, b3, w4b, b4)

    return out[:B]


def init_params(key, input_dim, embedding_dim):
    """Deterministic PyTorch-Linear-style init (uniform +/- 1/sqrt(fan_in)).
    Weights stored transposed: (in_features, out_features), f32."""
    ks = jax.random.split(key, 8)

    def linear(kw, kb, fan_in, fan_out):
        bound = 1.0 / jnp.sqrt(fan_in)
        w = jax.random.uniform(kw, (fan_in, fan_out), jnp.float32, -bound, bound)
        b = jax.random.uniform(kb, (1, fan_out), jnp.float32, -bound, bound)
        return w, b

    w1, b1 = linear(ks[0], ks[1], input_dim, HIDDEN)
    w2, b2 = linear(ks[2], ks[3], HIDDEN, embedding_dim)
    w3, b3 = linear(ks[4], ks[5], embedding_dim, HIDDEN)
    w4, b4 = linear(ks[6], ks[7], HIDDEN, input_dim)
    return (w1, b1, w2, b2, w3, b3, w4, b4)


def reference_forward(x, params):
    """Plain-JAX f32 reference for correctness checking."""
    w1, b1, w2, b2, w3, b3, w4, b4 = params
    h = jnp.maximum(x @ w1 + b1, 0.0)
    z = h @ w2 + b2
    h2 = jnp.maximum(z @ w3 + b3, 0.0)
    return jax.nn.sigmoid(h2 @ w4 + b4)


if __name__ == "__main__":
    key = jax.random.PRNGKey(0)
    k_param, k_x = jax.random.split(key)

    # Small but MXU-friendly demo shapes: B=256 -> 2 grid steps of 128 rows.
    B, input_dim, embedding_dim = 256, 256, 64
    params = init_params(k_param, input_dim, embedding_dim)
    x = jax.random.uniform(k_x, (B, input_dim), jnp.float32)  # data in [0,1)

    out = jax.block_until_ready(autoencoder_forward(x, params))

    ref = reference_forward(x, params)
    assert out.shape == (B, input_dim)
    max_err = float(jnp.max(jnp.abs(out - ref)))
    # bf16 matmul operands (f32 accumulate) + approx reciprocal => relaxed tol.
    assert max_err < 2e-2, f"mismatch vs reference: max abs err = {max_err}"

    print("KERNEL_OK")
</pallas_src>

<mosaic_0001>
module attributes {stable_mosaic.version = 11 : i64} {
  func.func @_ae_kernel(%arg0: i32, %arg1: memref<128x256xf32, #tpu.memory_space<vmem>>, %arg2: memref<256x1024xbf16, #tpu.memory_space<vmem>>, %arg3: memref<1x1024xf32, #tpu.memory_space<vmem>>, %arg4: memref<1024x64xbf16, #tpu.memory_space<vmem>>, %arg5: memref<1x64xf32, #tpu.memory_space<vmem>>, %arg6: memref<64x1024xbf16, #tpu.memory_space<vmem>>, %arg7: memref<1x1024xf32, #tpu.memory_space<vmem>>, %arg8: memref<1024x256xbf16, #tpu.memory_space<vmem>>, %arg9: memref<1x256xf32, #tpu.memory_space<vmem>>, %arg10: memref<128x256xf32, #tpu.memory_space<vmem>>) attributes {dimension_semantics = [#tpu.dimension_semantics<parallel>], iteration_bounds = array<i64: 2>, scalar_prefetch = 0 : i64, scratch_operands = 0 : i64, tpu.core_type = #tpu.core_type<tc>, window_params = [{transform_indices = @transform_0, window_bounds = array<i64: 128, 256>}, {pipeline_mode = #tpu.pipeline_mode<synchronous>, transform_indices = @transform_1, window_bounds = array<i64: 256, 1024>}, {pipeline_mode = #tpu.pipeline_mode<synchronous>, transform_indices = @transform_2, window_bounds = array<i64: 1, 1024>}, {pipeline_mode = #tpu.pipeline_mode<synchronous>, transform_indices = @transform_3, window_bounds = array<i64: 1024, 64>}, {pipeline_mode = #tpu.pipeline_mode<synchronous>, transform_indices = @transform_4, window_bounds = array<i64: 1, 64>}, {pipeline_mode = #tpu.pipeline_mode<synchronous>, transform_indices = @transform_5, window_bounds = array<i64: 64, 1024>}, {pipeline_mode = #tpu.pipeline_mode<synchronous>, transform_indices = @transform_6, window_bounds = array<i64: 1, 1024>}, {pipeline_mode = #tpu.pipeline_mode<synchronous>, transform_indices = @transform_7, window_bounds = array<i64: 1024, 256>}, {pipeline_mode = #tpu.pipeline_mode<synchronous>, transform_indices = @transform_8, window_bounds = array<i64: 1, 256>}, {transform_indices = @transform_9, window_bounds = array<i64: 128, 256>}]} {
    %c0 = arith.constant 0 : index
    %c0_0 = arith.constant 0 : index
    %0 = vector.load %arg1[%c0, %c0_0] : memref<128x256xf32, #tpu.memory_space<vmem>>, vector<128x256xf32>
    %1 = arith.truncf %0 : vector<128x256xf32> to vector<128x256xbf16>
    %c0_1 = arith.constant 0 : index
    %c0_2 = arith.constant 0 : index
    %2 = vector.load %arg2[%c0_1, %c0_2] : memref<256x1024xbf16, #tpu.memory_space<vmem>>, vector<256x1024xbf16>
    %cst = arith.constant dense<0.000000e+00> : vector<128x1024xf32>
    %3 = tpu.matmul %1, %2, %cst {dimension_numbers = #tpu.dot_dimension_numbers<[1], [0], [0], [1], [0, 0, 1, 1], [], []>} : vector<128x256xbf16>, vector<256x1024xbf16>, vector<128x1024xf32> -> vector<128x1024xf32>
    %c0_3 = arith.constant 0 : index
    %c0_4 = arith.constant 0 : index
    %4 = vector.load %arg3[%c0_3, %c0_4] : memref<1x1024xf32, #tpu.memory_space<vmem>>, vector<1x1024xf32>
    %5 = vector.broadcast %4 : vector<1x1024xf32> to vector<128x1024xf32>
    %6 = arith.addf %3, %5 : vector<128x1024xf32>
    %cst_5 = arith.constant 0.000000e+00 : f32
    %7 = vector.broadcast %cst_5 : f32 to vector<128x1024xf32>
    %8 = arith.maximumf %6, %7 : vector<128x1024xf32>
    %9 = arith.truncf %8 : vector<128x1024xf32> to vector<128x1024xbf16>
    %c0_6 = arith.constant 0 : index
    %c0_7 = arith.constant 0 : index
    %10 = vector.load %arg4[%c0_6, %c0_7] : memref<1024x64xbf16, #tpu.memory_space<vmem>>, vector<1024x64xbf16>
    %cst_8 = arith.constant dense<0.000000e+00> : vector<128x64xf32>
    %11 = tpu.matmul %9, %10, %cst_8 {dimension_numbers = #tpu.dot_dimension_numbers<[1], [0], [0], [1], [0, 0, 1, 1], [], []>} : vector<128x1024xbf16>, vector<1024x64xbf16>, vector<128x64xf32> -> vector<128x64xf32>
    %c0_9 = arith.constant 0 : index
    %c0_10 = arith.constant 0 : index
    %12 = vector.load %arg5[%c0_9, %c0_10] : memref<1x64xf32, #tpu.memory_space<vmem>>, vector<1x64xf32>
    %13 = vector.broadcast %12 : vector<1x64xf32> to vector<128x64xf32>
    %14 = arith.addf %11, %13 : vector<128x64xf32>
    %15 = arith.truncf %14 : vector<128x64xf32> to vector<128x64xbf16>
    %c0_11 = arith.constant 0 : index
    %c0_12 = arith.constant 0 : index
    %16 = vector.load %arg6[%c0_11, %c0_12] : memref<64x1024xbf16, #tpu.memory_space<vmem>>, vector<64x1024xbf16>
    %cst_13 = arith.constant dense<0.000000e+00> : vector<128x1024xf32>
    %17 = tpu.matmul %15, %16, %cst_13 {dimension_numbers = #tpu.dot_dimension_numbers<[1], [0], [0], [1], [0, 0, 1, 1], [], []>} : vector<128x64xbf16>, vector<64x1024xbf16>, vector<128x1024xf32> -> vector<128x1024xf32>
    %c0_14 = arith.constant 0 : index
    %c0_15 = arith.constant 0 : index
    %18 = vector.load %arg7[%c0_14, %c0_15] : memref<1x1024xf32, #tpu.memory_space<vmem>>, vector<1x1024xf32>
    %19 = vector.broadcast %18 : vector<1x1024xf32> to vector<128x1024xf32>
    %20 = arith.addf %17, %19 : vector<128x1024xf32>
    %cst_16 = arith.constant 0.000000e+00 : f32
    %21 = vector.broadcast %cst_16 : f32 to vector<128x1024xf32>
    %22 = arith.maximumf %20, %21 : vector<128x1024xf32>
    %23 = arith.truncf %22 : vector<128x1024xf32> to vector<128x1024xbf16>
    %c0_17 = arith.constant 0 : index
    %c0_18 = arith.constant 0 : index
    %24 = vector.load %arg8[%c0_17, %c0_18] : memref<1024x256xbf16, #tpu.memory_space<vmem>>, vector<1024x256xbf16>
    %cst_19 = arith.constant dense<0.000000e+00> : vector<128x256xf32>
    %25 = tpu.matmul %23, %24, %cst_19 {dimension_numbers = #tpu.dot_dimension_numbers<[1], [0], [0], [1], [0, 0, 1, 1], [], []>} : vector<128x1024xbf16>, vector<1024x256xbf16>, vector<128x256xf32> -> vector<128x256xf32>
    %c0_20 = arith.constant 0 : index
    %c0_21 = arith.constant 0 : index
    %26 = vector.load %arg9[%c0_20, %c0_21] : memref<1x256xf32, #tpu.memory_space<vmem>>, vector<1x256xf32>
    %27 = vector.broadcast %26 : vector<1x256xf32> to vector<128x256xf32>
    %28 = arith.addf %25, %27 : vector<128x256xf32>
    %cst_22 = arith.constant 0.000000e+00 : f32
    %29 = vector.broadcast %cst_22 : f32 to vector<128x256xf32>
    %30 = arith.subf %29, %28 : vector<128x256xf32>
    %31 = math.exp %30 : vector<128x256xf32>
    %cst_23 = arith.constant 1.000000e+00 : f32
    %32 = vector.broadcast %cst_23 : f32 to vector<128x256xf32>
    %33 = arith.addf %32, %31 : vector<128x256xf32>
    %34 = tpu.reciprocal %33 {approx = true} : vector<128x256xf32> -> vector<128x256xf32>
    %c0_24 = arith.constant 0 : index
    %c0_25 = arith.constant 0 : index
    %35 = vector.load %arg10[%c0_24, %c0_25] : memref<128x256xf32, #tpu.memory_space<vmem>>, vector<128x256xf32>
    tpu.vector_store %arg10[%c0_24, %c0_25], %34 {strides = array<i32>} : memref<128x256xf32, #tpu.memory_space<vmem>>, vector<128x256xf32>,
    return
  }
  func.func @transform_0(%arg0: i32) -> (i32, i32) {
    %c0_i32 = arith.constant 0 : i32
    %c0_i32_0 = arith.constant 0 : i32
    return %arg0, %c0_i32 : i32, i32
  }
  func.func @transform_1(%arg0: i32) -> (i32, i32) {
    %c0_i32 = arith.constant 0 : i32
    %c0_i32_0 = arith.constant 0 : i32
    %c0_i32_1 = arith.constant 0 : i32
    return %c0_i32, %c0_i32_0 : i32, i32
  }
  func.func @transform_2(%arg0: i32) -> (i32, i32) {
    %c0_i32 = arith.constant 0 : i32
    %c0_i32_0 = arith.constant 0 : i32
    %c0_i32_1 = arith.constant 0 : i32
    return %c0_i32, %c0_i32_0 : i32, i32
  }
  func.func @transform_3(%arg0: i32) -> (i32, i32) {
    %c0_i32 = arith.constant 0 : i32
    %c0_i32_0 = arith.constant 0 : i32
    %c0_i32_1 = arith.constant 0 : i32
    return %c0_i32, %c0_i32_0 : i32, i32
  }
  func.func @transform_4(%arg0: i32) -> (i32, i32) {
    %c0_i32 = arith.constant 0 : i32
    %c0_i32_0 = arith.constant 0 : i32
    %c0_i32_1 = arith.constant 0 : i32
    return %c0_i32, %c0_i32_0 : i32, i32
  }
  func.func @transform_5(%arg0: i32) -> (i32, i32) {
    %c0_i32 = arith.constant 0 : i32
    %c0_i32_0 = arith.constant 0 : i32
    %c0_i32_1 = arith.constant 0 : i32
    return %c0_i32, %c0_i32_0 : i32, i32
  }
  func.func @transform_6(%arg0: i32) -> (i32, i32) {
    %c0_i32 = arith.constant 0 : i32
    %c0_i32_0 = arith.constant 0 : i32
    %c0_i32_1 = arith.constant 0 : i32
    return %c0_i32, %c0_i32_0 : i32, i32
  }
  func.func @transform_7(%arg0: i32) -> (i32, i32) {
    %c0_i32 = arith.constant 0 : i32
    %c0_i32_0 = arith.constant 0 : i32
    %c0_i32_1 = arith.constant 0 : i32
    return %c0_i32, %c0_i32_0 : i32, i32
  }
  func.func @transform_8(%arg0: i32) -> (i32, i32) {
    %c0_i32 = arith.constant 0 : i32
    %c0_i32_0 = arith.constant 0 : i32
    %c0_i32_1 = arith.constant 0 : i32
    return %c0_i32, %c0_i32_0 : i32, i32
  }
  func.func @transform_9(%arg0: i32) -> (i32, i32) {
    %c0_i32 = arith.constant 0 : i32
    %c0_i32_0 = arith.constant 0 : i32
    return %arg0, %c0_i32 : i32, i32
  }
}

</mosaic_0001>

<bundles_post_ra>
// kernel: tpu_custom_call.1
= control target key start
LH: loop header
LB: loop body
LE: loop exit
PB: predicated region body
PF: predicated region fallthrough
CT: control target
= control target key end

     0   :  { %s10187_s0 = inlined_call_operand.vmem [shape: f32[256,256], index: 0, kind: input, shape index: {}]   ;;  %s10188_s1 = inlined_call_operand.hbm [shape: bf16[256,1024], index: 1, kind: input, shape index: {}]   ;;  %s10189_s2 = inlined_call_operand.hbm [shape: f32[1,1024], index: 2, kind: input, shape index: {}]   ;;  %s10190_s3 = inlined_call_operand.vmem [shape: bf16[1024,64], index: 3, kind: input, shape index: {}]   ;;  %s10191_s4 = inlined_call_operand.hbm [shape: f32[1,64], index: 4, kind: input, shape index: {}]   ;;  %s10192_s5 = inlined_call_operand.vmem [shape: bf16[64,1024], index: 5, kind: input, shape index: {}]   ;;  %s10193_s6 = inlined_call_operand.hbm [shape: f32[1,1024], index: 6, kind: input, shape index: {}]   ;;  %s10194_s7 = inlined_call_operand.hbm [shape: bf16[1024,256], index: 7, kind: input, shape index: {}]   ;;  %s10195_s8 = inlined_call_operand.hbm [shape: f32[1,256], index: 8, kind: input, shape index: {}]   ;;  %s10196_s9 = inlined_call_operand.hbm [shape: f32[256,256], index: 9, kind: output, shape index: {}]  }
   0x1   :  { %10232 = sst [smem:[#allocation55_spill]] %s10188_s1 }
   0x2   :  { %10233 = sst [smem:[#allocation56_spill]] %s10189_s2 }
   0x3   :  { %10234 = sst [smem:[#allocation57_spill]] %s10193_s6 }
   0x4   :  { %14 = vsyncpa [#allocation3], 0 }
   0x5   :  { %15 = vsyncpa [#allocation6], 0 }
   0x6   :  { %16 = vsyncpa [#allocation9], 0 }
   0x7   :  { %17 = vsyncpa [#allocation12], 0 }
   0x8   :  { %18 = vsyncpa [#allocation4], 0 }
   0x9   :  { %20 = vsyncpa [#allocation4 + $0x1], 0  ;;  %s8276_s30 = smov 0   ;;  %s8278_s10 = smov 0  }
   0xa   :  { %s8280_s11 = smov 0   ;;  %s8282_s12 = smov 0  }
   0xb LB: > { %10235 = sst [smem:[#allocation19_spill]] %s8208_s11  ;;  %s8297_s13 = sadd.s32 4294967295, %s8212_s12   ;;  %s8212_s12 = sphi %s8282_s12, %s10323_s12   ;;  %s8208_s11 = sphi %s8280_s11, %s10320_s11   ;;  %s8204_s10 = sphi %s8278_s10, %s10322_s10   ;;  %s8200_s30 = sphi %s8276_s30, %s10321_s30  }
   0xc   : > { %s5864_s14 = sadd.s32 4294967294, %s8212_s12   ;;  %s8301_s15 = sadd.s32 1, %s8212_s12  }
   0xd   : > { %s227_s16 = sadd.s32 1, %s8208_s11  ;;  %s224_s17 = ssub.s32 %s8212_s12, %s8301_s15 }
   0xe   : > { %p237_p0 = scmp.ne.s32.totalorder %s8208_s11, %s8204_s10  ;;  %p225_p1 = scmp.eq.s32.totalorder %s224_s17, 0 }
   0xf   : > { %p238_p2 = scmp.eq.s32.totalorder %s8297_s13, 1  ;;  %p243_p3 = scmp.ne.s32.totalorder %s8204_s10, %s8200_s30 }
  0x10   : > { %p244_p4 = scmp.eq.s32.totalorder %s5864_s14, 1  ;;  %p5865_p7 = scmp.ge.s32.totalorder %s8212_s12, 1 }
  0x11   : > { %s8312_s18 = scalar_select %p225_p1, %s8208_s11, %s227_s16  }
  0x12   : > { %p8314_p5 = por %p238_p2, %p237_p0  ;;  %p8318_p6 = por %p244_p4, %p243_p3 }
  0x13   : > { %10236 = sst [smem:[#allocation20_spill]] %s8312_s18  ;;  %p251_p8 = scmp.lt.s32.totalorder %s8212_s12, 3 }
  0x14   : > { %p7766_p9 = scmp.eq.s32.totalorder %s8297_s13, 0  ;;  %s10240_s2 = sld [smem:[#allocation56_spill]] }
  0x15   : > { %p8325_p10 = pnand %p5865_p7, %p251_p8  ;;  %s8214_s25 = smov [#allocation5]  }
  0x16   : > { %s279_s26 = sshll.u32 %s8214_s25, 4  ;;  %s10241_s6 = sld [smem:[#allocation57_spill]]  ;;  %s280_s26 = int_to_ptr.vmem [resolvable:$true] %s279_s26 }
  0x17   : > { %p7743_p11 = pneg %p8325_p10  ;;  %s10243_s1 = sld [smem:[#allocation55_spill]] }
  0x18   : > { %s8215_s23 = smov [#allocation8]   ;;  %s8216_s27 = smov [#allocation2]  }
  0x19   : > { %p8339_p12 = pnand %p7766_p9, %p7743_p11  ;;  %s309_s25 = sshll.u32 %s8215_s23, 4  ;;  %s310_s25 = int_to_ptr.vmem [resolvable:$true] %s309_s25 }
  0x1a   : > { %s277_s24 = sshll.u32 %s10240_s2, 4  ;;  %s264_s28 = sshll.u32 %s8216_s27, 4  ;;  %s278_s24 = int_to_ptr.hbm [resolvable:$true] %s277_s24  ;;  %s265_s28 = int_to_ptr.vmem [resolvable:$true] %s264_s28 }
  0x1b   : > { %7749 = dma.hbm_to_vmem [thread:$0]  (!%p8339_p12), %s278_s24, 128, %s280_s26, [#allocation6]  }
  0x1c   : > { %s307_s29 = sshll.u32 %s10241_s6, 4  ;;  %s292_s18 = sshll.u32 %s10191_s4, 4  ;;  %s308_s29 = int_to_ptr.hbm [resolvable:$true] %s307_s29  ;;  %s293_s18 = int_to_ptr.hbm [resolvable:$true] %s292_s18 }
  0x1d   : > { %s262_s22 = sshll.u32 %s10243_s1, 4  ;;  %s8217_s11 = smov 512   ;;  %s263_s22 = int_to_ptr.hbm [resolvable:$true] %s262_s22 }
  0x1e   : > { %7755 = dma.hbm_to_vmem [thread:$0]  (!%p8339_p12), %s308_s29, 128, %s310_s25, [#allocation9]  }
  0x1f   : > { %s8218_s16 = smov 32   ;;  %s8219_s17 = smov [#allocation7]  }
  0x20   : > { %7746 = dma.hbm_to_vmem [thread:$0]  (!%p8339_p12), %s263_s22, 16384, %s265_s28, [#allocation3], %s8217_s11, %s8217_s11, %s8218_s16  }
  0x21   : > { %s294_s24 = sshll.u32 %s8219_s17, 4  ;;  %s318_s29 = sshll.u32 %s10194_s7, 4  ;;  %s295_s24 = int_to_ptr.vmem [resolvable:$true] %s294_s24  ;;  %s319_s29 = int_to_ptr.hbm [resolvable:$true] %s318_s29 }
  0x22   : > { %7752 = dma.hbm_to_vmem [thread:$0]  (!%p8339_p12), %s293_s18, 16, %s295_s24, [#allocation6]  }
  0x23   : > { %s8220_s25 = smov [#allocation10]   ;;  %s333_s1 = sshll.u32 %s10195_s8, 4  ;;  %s334_s1 = int_to_ptr.hbm [resolvable:$true] %s333_s1 }
  0x24   : > { %s320_s2 = sshll.u32 %s8220_s25, 4  ;;  %s8221_s11 = smov 128   ;;  %s321_s2 = int_to_ptr.vmem [resolvable:$true] %s320_s2 }
  0x25   : > { %s8222_s22 = smov 8   ;;  %s8223_s28 = smov [#allocation11]  }
  0x26   : > { %7758 = dma.hbm_to_vmem [thread:$0]  (!%p8339_p12), %s319_s29, 16384, %s321_s2, [#allocation9], %s8221_s11, %s8221_s11, %s8222_s22  }
  0x27   : > { %s335_s16 = sshll.u32 %s8223_s28, 4  ;;  %358 = sbr.rel (%p8325_p10) target bundleno = 1794 (0x702), region = 56  ;;  %s336_s16 = int_to_ptr.vmem [resolvable:$true] %s335_s16 }
  0x28   : > { %7761 = dma.hbm_to_vmem [thread:$0]  (!%p8339_p12), %s334_s1, 32, %s336_s16, [#allocation12]  }
  0x2c   : > { %8179 = dma.done.wait (%p7766_p9), [#allocation3], 16384  }
  0x2d   : > { %8181 = vsyncadd (%p7766_p9), [#allocation3], 4294950912 }
  0x2e   : > { %8183 = dma.done.wait (%p7766_p9), [#allocation6], 144  }
  0x2f   : > { %8185 = vsyncadd (%p7766_p9), [#allocation6], 4294967152 }
  0x30   : > { %8187 = dma.done.wait (%p7766_p9), [#allocation9], 16512  }
  0x31   : > { %8189 = vsyncadd (%p7766_p9), [#allocation9], 4294950784 }
  0x32   : > { %8191 = dma.done.wait (%p7766_p9), [#allocation12], 32  }
  0x33   : > { %8193 = vsyncadd (%p7766_p9), [#allocation12], 4294967264  ;;  %s5881_s1 = sshll.u32 %s8297_s13, 4  ;;  %v6110_v0 = vld [vmem:[#allocation2 + $0x1c0] sm:$0xf]  ;;  %vm3366_vm0 = vcmask 523264  }
  0x34   : > { %v7423_v1 = vld [vmem:[#allocation2 + $0x1dc] sm:$0xf0]  ;;  %v7419_v5 = vld [vmem:[#allocation2 + $0x1c4] sm:$0xf]  ;;  %p8388_p13 = scmp.lt.s32.totalorder %s5881_s1, 31  ;;  %s418_s23 = sand.u32 1, %s8204_s10  }
  0x35   : > { %v6366_v2 = vld [vmem:[#allocation2 + $0x3c0] sm:$0xf]  ;;  %v6111_v3 = vor.u32 %v7423_v1, %v6110_v0  ;;  %v6112_v6 = vld [vmem:[#allocation2 + $0x1e0] sm:$0xf0]  ;;  %s5880_s29 = sshll.u32 %s418_s23, 8  ;;  %s7716_s2 = sshll.u32 %s8297_s13, 8 }
  0x36   : > { %v7487_v4 = vld [vmem:[#allocation2 + $0x3dc] sm:$0xf0]  ;;  %v6115_v8 = vor.u32 %v7419_v5, %v6112_v6  ;;  %v7483_v9 = vld [vmem:[#allocation2 + $0x3c4] sm:$0xf]  ;;  %s10325_s1 = smov (!%p8388_p13, %s5881_s1), 31  ;;  %s9985_s25 = scalar_lea.vmem [#allocation13], %s5880_s29 }
  0x37   : > { %v6367_v7 = vor.u32 %v7487_v4, %v6366_v2  ;;  %v6368_v10 = vld [vmem:[#allocation2 + $0x3e0] sm:$0xf0]  ;;  %v6078_v11 = vld [vmem:[#allocation2 + $0x180] sm:$0xf]  ;;  %1264 = vmatpush.bf16.msra.mxu0 %v6111_v3  ;;  %s7362_s21 = sshll.u32 %s10325_s1, 4  ;;  %s5738_s11 = scalar_lea.hbm %s10196_s9, %s7716_s2 }
  0x38   : > { %v6371_v12 = vor.u32 %v7483_v9, %v6368_v10  ;;  %v7415_v13 = vld [vmem:[#allocation2 + $0x19c] sm:$0xf0]  ;;  %1362 = vmatpush.bf16.msra.mxu2 %v6115_v8  ;;  %v7411_v18 = vld [vmem:[#allocation2 + $0x184] sm:$0xf]  ;;  %s8402_s24 = scalar_lea.vmem %s10187_s0, %s7362_s21  ;;  %s5739_s22 = sshll.u32 %s9985_s25, 4  ;;  %s5740_s22 = int_to_ptr.vmem [resolvable:$true] %s5739_s22 }
  0x39   : > { %v6334_v14 = vld [vmem:[#allocation2 + $0x380] sm:$0xf]  ;;  %1313 = vmatpush.bf16.msra.mxu1 %v6367_v7  ;;  %v6079_v16 = vor.u32 %v7415_v13, %v6078_v11  ;;  %v6080_v19 = vld [vmem:[#allocation2 + $0x1a0] sm:$0xf0]  ;;  %s5741_s28 = sshll.u32 %s5738_s11, 4  ;;  %s5726_s16 = scalar_lea.sflag [#allocation4], %s418_s23  ;;  %s5742_s28 = int_to_ptr.hbm [resolvable:$true] %s5741_s28 }
  0x3a   : > { %v7479_v15 = vld [vmem:[#allocation2 + $0x39c] sm:$0xf0]  ;;  %v7475_v20 = vld [vmem:[#allocation2 + $0x384] sm:$0xf]  ;;  %1411 = vmatpush.bf16.msra.mxu3 %v6371_v12  ;;  %v6083_v21 = vor.u32 %v7411_v18, %v6080_v19  ;;  %s8148_s1 = sshra.s32 %s5742_s28, 4  ;;  %s8154_s14 = scalar_lea.hbm %s10196_s9, 512  ;;  %s8149_s1 = int_to_ptr.hbm [resolvable:$true] %s8148_s1 }
  0x3b   : > { %v6335_v17 = vor.u32 %v7479_v15, %v6334_v14  ;;  %v6336_v22 = vld [vmem:[#allocation2 + $0x3a0] sm:$0xf0]  ;;  %v6046_v23 = vld [vmem:[#allocation2 + $0x140] sm:$0xf]  ;;  %1265 = vmatpush.bf16.msra.mxu0 %v6079_v16  ;;  %s8150_s13 = scalar_lea.hbm %s8149_s1, 256  ;;  %p8155_p3 = scmp.lt.s32.totalorder %s8149_s1, %s10196_s9 }
  0x3c   : > { %v7407_v24 = vld [vmem:[#allocation2 + $0x15c] sm:$0xf0]  ;;  %v6339_v25 = vor.u32 %v7475_v20, %v6336_v22  ;;  %v7403_v28 = vld [vmem:[#allocation2 + $0x144] sm:$0xf]  ;;  %1363 = vmatpush.bf16.msra.mxu2 %v6083_v21  ;;  %p8151_p0 = scmp.ne.s32.totalorder %s8149_s1, %s8150_s13  ;;  %p8156_p4 = scmp.lt.s32.totalorder %s8154_s14, %s8150_s13 }
  0x3d   : > { %v6302_v26 = vld [vmem:[#allocation2 + $0x340] sm:$0xf]  ;;  %v6047_v29 = vor.u32 %v7407_v24, %v6046_v23  ;;  %v6048_v30 = vld [vmem:[#allocation2 + $0x160] sm:$0xf0]  ;;  %1314 = vmatpush.bf16.msra.mxu1 %v6335_v17 }
  0x3e   : > { %v7471_v27 = vld [vmem:[#allocation2 + $0x35c] sm:$0xf0]  ;;  %v7467_v31 = vld [vmem:[#allocation2 + $0x344] sm:$0xf]  ;;  %v6051_v34 = vor.u32 %v7403_v28, %v6048_v30  ;;  %1412 = vmatpush.bf16.msra.mxu3 %v6339_v25  ;;  %v6120_v30 = vld [vmem:[#allocation2 + $0x1e8] sm:$0xf0]  ;;  %p8152_p1 = pnand %p8151_p0, %p8314_p5  ;;  %p8157_p7 = por %p8156_p4, %p8155_p3 }
  0x3f   : > { %v6304_v32 = vld [vmem:[#allocation2 + $0x360] sm:$0xf0]  ;;  %v6303_v33 = vor.u32 %v7471_v27, %v6302_v26  ;;  %v6014_v35 = vld [vmem:[#allocation2 + $0x100] sm:$0xf]  ;;  %1266 = vmatpush.bf16.msra.mxu0 %v6047_v29  ;;  %v7420_v29 = vld [vmem:[#allocation2 + $0x1cc] sm:$0xf] }
  0x40   : > { %v7399_v36 = vld [vmem:[#allocation2 + $0x11c] sm:$0xf0]  ;;  %v6307_v38 = vor.u32 %v7467_v31, %v6304_v32  ;;  %v7395_v40 = vld [vmem:[#allocation2 + $0x104] sm:$0xf]  ;;  %1364 = vmatpush.bf16.msra.mxu2 %v6051_v34  ;;  %v432_v32 = vld [vmem:[%s8402_s24 + $0x10] sm:$0xff]  ;;  %p8153_p2 = pneg %p8152_p1 }
  0x41   : > { %v6270_v37 = vld [vmem:[#allocation2 + $0x300] sm:$0xf]  ;;  %v6016_v41 = vld [vmem:[#allocation2 + $0x120] sm:$0xf0]  ;;  %v6015_v44 = vor.u32 %v7399_v36, %v6014_v35  ;;  %1315 = vmatpush.bf16.msra.mxu1 %v6303_v33  ;;  %v7484_v33 = vld [vmem:[#allocation2 + $0x3cc] sm:$0xf] }
  0x42   : > { %v7463_v39 = vld [vmem:[#allocation2 + $0x31c] sm:$0xf0]  ;;  %v7459_v42 = vld [vmem:[#allocation2 + $0x304] sm:$0xf]  ;;  %v6019_v46 = vor.u32 %v7395_v40, %v6016_v41  ;;  %1413 = vmatpush.bf16.msra.mxu3 %v6307_v38  ;;  %v6376_v34 = vld [vmem:[#allocation2 + $0x3e8] sm:$0xf0]  ;;  %v6123_v41 = vor.u32 %v7420_v29, %v6120_v30  ;;  %p8158_p8 = pnand %p8157_p7, %p8153_p2 }
  0x43   : > { %v6272_v43 = vld [vmem:[#allocation2 + $0x320] sm:$0xf0]  ;;  %v6271_v45 = vor.u32 %v7463_v39, %v6270_v37  ;;  %v5982_v47 = vld [vmem:[#allocation2 + $0xc0] sm:$0xf]  ;;  %1267 = vmatpush.bf16.msra.mxu0 %v6015_v44  ;;  %v431_v37 = vld [vmem:[%s8402_s24 + $0x8] sm:$0xff] }
  0x44   : > { %v7391_v48 = vld [vmem:[#allocation2 + $0xdc] sm:$0xf0]  ;;  %v6275_v50 = vor.u32 %v7459_v42, %v6272_v43  ;;  %v7387_v52 = vld [vmem:[#allocation2 + $0xc4] sm:$0xf]  ;;  %1365 = vmatpush.bf16.msra.mxu2 %v6019_v46  ;;  %v433_v38 = vld [vmem:[%s8402_s24 + $0x18] sm:$0xff]  ;;  %v6379_v46 = vor.u32 %v7484_v33, %v6376_v34 }
  0x45   : > { %v6238_v49 = vld [vmem:[#allocation2 + $0x2c0] sm:$0xf]  ;;  %v5984_v53 = vld [vmem:[#allocation2 + $0xe0] sm:$0xf0]  ;;  %v5983_v56 = vor.u32 %v7391_v48, %v5982_v47  ;;  %1316 = vmatpush.bf16.msra.mxu1 %v6271_v45  ;;  %v6118_v39 = vld [vmem:[#allocation2 + $0x1c8] sm:$0xf] }
  0x46   : > { %v7455_v51 = vld [vmem:[#allocation2 + $0x2dc] sm:$0xf0]  ;;  %v7451_v54 = vld [vmem:[#allocation2 + $0x2c4] sm:$0xf]  ;;  %v5987_v58 = vor.u32 %v7387_v52, %v5984_v53  ;;  %1414 = vmatpush.bf16.msra.mxu3 %v6275_v50  ;;  %v7424_v42 = vld [vmem:[#allocation2 + $0x1e4] sm:$0xf0] }
  0x47   : > { %v6240_v55 = vld [vmem:[#allocation2 + $0x2e0] sm:$0xf0]  ;;  %v6239_v57 = vor.u32 %v7455_v51, %v6238_v49  ;;  %v5950_v59 = vld [vmem:[#allocation2 + $0x80] sm:$0xf]  ;;  %1268 = vmatpush.bf16.msra.mxu0 %v5983_v56  ;;  %v6374_v43 = vld [vmem:[#allocation2 + $0x3c8] sm:$0xf]  ;;  %v8410_v49 = vpack.c.bf16 %v433_v38, %v431_v37  ;;  %v6119_v52 = vor.u32 %v7424_v42, %v6118_v39 }
  0x48   : > { %v7383_v60 = vld [vmem:[#allocation2 + $0x9c] sm:$0xf0]  ;;  %v6243_v62 = vor.u32 %v7451_v54, %v6240_v55  ;;  %v7379_v0 = vld [vmem:[#allocation2 + $0x84] sm:$0xf]  ;;  %1366 = vmatpush.bf16.msra.mxu2 %v5987_v58  ;;  %v7488_v44 = vld [vmem:[#allocation2 + $0x3e4] sm:$0xf0] }
  0x49   : > { %v6206_v61 = vld [vmem:[#allocation2 + $0x280] sm:$0xf]  ;;  %v5952_v1 = vld [vmem:[#allocation2 + $0xa0] sm:$0xf0]  ;;  %v5951_v4 = vor.u32 %v7383_v60, %v5950_v59  ;;  %1317 = vmatpush.bf16.msra.mxu1 %v6239_v57  ;;  %v7412_v47 = vld [vmem:[#allocation2 + $0x18c] sm:$0xf]  ;;  %v6375_v53 = vor.u32 %v7488_v44, %v6374_v43 }
  0x4a   : > { %v7447_v63 = vld [vmem:[#allocation2 + $0x29c] sm:$0xf0]  ;;  %v7443_v2 = vld [vmem:[#allocation2 + $0x284] sm:$0xf]  ;;  %v5955_v6 = vor.u32 %v7379_v0, %v5952_v1  ;;  %1415 = vmatpush.bf16.msra.mxu3 %v6243_v62  ;;  %v6088_v48 = vld [vmem:[#allocation2 + $0x1a8] sm:$0xf0] }
  0x4b   : > { %v6208_v3 = vld [vmem:[#allocation2 + $0x2a0] sm:$0xf0]  ;;  %v6207_v5 = vor.u32 %v7447_v63, %v6206_v61  ;;  %v5918_v7 = vld [vmem:[#allocation2 + $0x40] sm:$0xf]  ;;  %1269 = vmatpush.bf16.msra.mxu0 %v5951_v4  ;;  %v7476_v50 = vld [vmem:[#allocation2 + $0x38c] sm:$0xf]  ;;  %v6091_v54 = vor.u32 %v7412_v47, %v6088_v48 }
  0x4c   : > { %v7375_v8 = vld [vmem:[#allocation2 + $0x5c] sm:$0xf0]  ;;  %v6211_v10 = vor.u32 %v7443_v2, %v6208_v3  ;;  %v7371_v12 = vld [vmem:[#allocation2 + $0x44] sm:$0xf]  ;;  %1367 = vmatpush.bf16.msra.mxu2 %v5955_v6  ;;  %v6344_v51 = vld [vmem:[#allocation2 + $0x3a8] sm:$0xf0] }
  0x4d   : > { %v6174_v9 = vld [vmem:[#allocation2 + $0x240] sm:$0xf]  ;;  %v5920_v13 = vld [vmem:[#allocation2 + $0x60] sm:$0xf0]  ;;  %v5919_v16 = vor.u32 %v7375_v8, %v5918_v7  ;;  %1318 = vmatpush.bf16.msra.mxu1 %v6207_v5  ;;  %v6086_v55 = vld [vmem:[#allocation2 + $0x188] sm:$0xf]  ;;  %v6347_v57 = vor.u32 %v7476_v50, %v6344_v51 }
  0x4e   : > { %v7439_v11 = vld [vmem:[#allocation2 + $0x25c] sm:$0xf0]  ;;  %v7435_v14 = vld [vmem:[#allocation2 + $0x244] sm:$0xf]  ;;  %v5923_v20 = vor.u32 %v7371_v12, %v5920_v13  ;;  %1416 = vmatpush.bf16.msra.mxu3 %v6211_v10  ;;  %v7416_v56 = vld [vmem:[#allocation2 + $0x1a4] sm:$0xf0] }
  0x4f   : > { %v6176_v15 = vld [vmem:[#allocation2 + $0x260] sm:$0xf0]  ;;  %v5886_v17 = vld [vmem:[#allocation2] sm:$0xf]  ;;  %v6175_v19 = vor.u32 %v7439_v11, %v6174_v9  ;;  %1270 = vmatpush.bf16.msra.mxu0 %v5919_v16  ;;  %v6342_v58 = vld [vmem:[#allocation2 + $0x388] sm:$0xf]  ;;  %v6087_v60 = vor.u32 %v7416_v56, %v6086_v55 }
  0x50   : > { %v7367_v18 = vld [vmem:[#allocation2 + $0x1c] sm:$0xf0]  ;;  %v7363_v23 = vld [vmem:[#allocation2 + $0x4] sm:$0xf]  ;;  %v6179_v24 = vor.u32 %v7435_v14, %v6176_v15  ;;  %1368 = vmatpush.bf16.msra.mxu2 %v5923_v20  ;;  %v7480_v59 = vld [vmem:[#allocation2 + $0x3a4] sm:$0xf0] }
  0x51   : > { %v6142_v21 = vld [vmem:[#allocation2 + $0x200] sm:$0xf]  ;;  %v5888_v25 = vld [vmem:[#allocation2 + $0x20] sm:$0xf0]  ;;  %v5887_v31 = vor.u32 %v7367_v18, %v5886_v17  ;;  %1319 = vmatpush.bf16.msra.mxu1 %v6175_v19  ;;  %v7404_v61 = vld [vmem:[#allocation2 + $0x14c] sm:$0xf]  ;;  %v6343_v0 = vor.u32 %v7480_v59, %v6342_v58 }
  0x52   : > { %v7431_v22 = vld [vmem:[#allocation2 + $0x21c] sm:$0xf0]  ;;  %v7427_v26 = vld [vmem:[#allocation2 + $0x204] sm:$0xf]  ;;  %v5891_v36 = vor.u32 %v7363_v23, %v5888_v25  ;;  %1417 = vmatpush.bf16.msra.mxu3 %v6179_v24  ;;  %v6056_v62 = vld [vmem:[#allocation2 + $0x168] sm:$0xf0] }
  0x53   : > { %v6144_v27 = vld [vmem:[#allocation2 + $0x220] sm:$0xf0]  ;;  %v6143_v35 = vor.u32 %v7431_v22, %v6142_v21  ;;  %1271 = vmatpush.bf16.msra.mxu0 %v5887_v31  ;;  %v6054_v63 = vld [vmem:[#allocation2 + $0x148] sm:$0xf]  ;;  %v6059_v1 = vor.u32 %v7404_v61, %v6056_v62  ;;  %v7468_v3 = vld [vmem:[#allocation2 + $0x34c] sm:$0xf] }
  0x54   : > { %v430_v28 = vld [vmem:[%s8402_s24] sm:$0xff]  ;;  %v6147_v40 = vor.u32 %v7427_v26, %v6144_v27  ;;  %1369 = vmatpush.bf16.msra.mxu2 %v5891_v36  ;;  %v7408_v2 = vld [vmem:[#allocation2 + $0x164] sm:$0xf0]  ;;  %v6312_v4 = vld [vmem:[#allocation2 + $0x368] sm:$0xf0] }
  0x55   : > { %v8408_v45 = vpack.c.bf16 %v432_v32, %v430_v28  ;;  %1320 = vmatpush.bf16.msra.mxu1 %v6143_v35  ;;  %v6315_v5 = vor.u32 %v7468_v3, %v6312_v4  ;;  %v6310_v6 = vld [vmem:[#allocation2 + $0x348] sm:$0xf]  ;;  %v6055_v8 = vor.u32 %v7408_v2, %v6054_v63  ;;  %v434_v10 = vld [vmem:[%s8402_s24 + $0x20] sm:$0xff]  ;;  %v436_v11 = vld [vmem:[%s8402_s24 + $0x30] sm:$0xff] }
  0x56   : > { %1418 = vmatpush.bf16.msra.mxu3 %v6147_v40  ;;  %v7472_v7 = vld [vmem:[#allocation2 + $0x364] sm:$0xf0]  ;;  %v437_v13 = vld [vmem:[%s8402_s24 + $0x38] sm:$0xff]  ;;  %v8420_v14 = vpack.c.bf16 %v436_v11, %v434_v10  ;;  %v7396_v16 = vld [vmem:[#allocation2 + $0x10c] sm:$0xf] }
  0x57   : > { %1272 = vmatmul.bf16.vlgmr.msra.gmra.mxu0 %v8408_v45  ;;  %1370 = vmatmul.bf16.vlgmr.msra.gmra.mxu2 %v8408_v45  ;;  %v6311_v9 = vor.u32 %v7472_v7, %v6310_v6  ;;  %v435_v12 = vld [vmem:[%s8402_s24 + $0x28] sm:$0xff]  ;;  %v438_v28 = vld [vmem:[%s8402_s24 + $0x40] sm:$0xff]  ;;  %v440_v29 = vld [vmem:[%s8402_s24 + $0x50] sm:$0xff] }
  0x58   : > { %1558 = vmatpush.bf16.msrb.mxu2 %v6123_v41  ;;  %1321 = vmatmul.bf16.vlgmr.msra.gmra.mxu1 %v8410_v49  ;;  %v8422_v15 = vpack.c.bf16 %v437_v13, %v435_v12  ;;  %v6024_v17 = vld [vmem:[#allocation2 + $0x128] sm:$0xf0]  ;;  %v6022_v18 = vld [vmem:[#allocation2 + $0x108] sm:$0xf]  ;;  %v441_v31 = vld [vmem:[%s8402_s24 + $0x58] sm:$0xff]  ;;  %v8432_v32 = vpack.c.bf16 %v440_v29, %v438_v28 }
  0x59   : > { %1419 = vmatmul.bf16.vlgmr.msra.gmra.mxu3 %v8410_v49  ;;  %1460 = vmatpush.bf16.msrb.mxu0 %v6119_v52  ;;  %v6027_v19 = vor.u32 %v7396_v16, %v6024_v17  ;;  %v7400_v20 = vld [vmem:[#allocation2 + $0x124] sm:$0xf0]  ;;  %v7460_v21 = vld [vmem:[#allocation2 + $0x30c] sm:$0xf]  ;;  %v442_v47 = vld [vmem:[%s8402_s24 + $0x60] sm:$0xff] }
  0x5a   : > { %1607 = vmatpush.bf16.msrb.mxu3 %v6379_v46  ;;  %1509 = vmatpush.bf16.msrb.mxu1 %v6375_v53  ;;  %v6280_v22 = vld [vmem:[#allocation2 + $0x328] sm:$0xf0]  ;;  %v6023_v23 = vor.u32 %v7400_v20, %v6022_v18  ;;  %v6278_v25 = vld [vmem:[#allocation2 + $0x308] sm:$0xf]  ;;  %v444_v48 = vld [vmem:[%s8402_s24 + $0x70] sm:$0xff] }
  0x5b   : > { %v6283_v24 = vor.u32 %v7460_v21, %v6280_v22  ;;  %v7464_v26 = vld [vmem:[#allocation2 + $0x324] sm:$0xf0]  ;;  %v7388_v34 = vld [vmem:[#allocation2 + $0xcc] sm:$0xf]  ;;  %v445_v51 = vld [vmem:[%s8402_s24 + $0x78] sm:$0xff]  ;;  %v8444_v52 = vpack.c.bf16 %v444_v48, %v442_v47 }
  0x5c   : > { %1559 = vmatpush.bf16.msrb.mxu2 %v6091_v54  ;;  %v6279_v27 = vor.u32 %v7464_v26, %v6278_v25  ;;  %v439_v30 = vld [vmem:[%s8402_s24 + $0x48] sm:$0xff]  ;;  %v446_v2 = vld [vmem:[%s8402_s24 + $0x80] sm:$0xff]  ;;  %v448_v3 = vld [vmem:[%s8402_s24 + $0x90] sm:$0xff] }
  0x5d   : > { %1461 = vmatpush.bf16.msrb.mxu0 %v6087_v60  ;;  %v8434_v33 = vpack.c.bf16 %v441_v31, %v439_v30  ;;  %v5992_v35 = vld [vmem:[#allocation2 + $0xe8] sm:$0xf0]  ;;  %v5990_v36 = vld [vmem:[#allocation2 + $0xc8] sm:$0xf]  ;;  %v8456_v6 = vpack.c.bf16 %v448_v3, %v446_v2  ;;  %v450_v22 = vld [vmem:[%s8402_s24 + $0xa0] sm:$0xff] }
  0x5e   : > { %1608 = vmatpush.bf16.msrb.mxu3 %v6347_v57  ;;  %1510 = vmatpush.bf16.msrb.mxu1 %v6343_v0  ;;  %v5995_v37 = vor.u32 %v7388_v34, %v5992_v35  ;;  %v7392_v38 = vld [vmem:[#allocation2 + $0xe4] sm:$0xf0]  ;;  %v7452_v39 = vld [vmem:[#allocation2 + $0x2cc] sm:$0xf]  ;;  %v453_v25 = vld [vmem:[%s8402_s24 + $0xb8] sm:$0xff] }
  0x5f   : > { %v6248_v40 = vld [vmem:[#allocation2 + $0x2e8] sm:$0xf0]  ;;  %v5991_v41 = vor.u32 %v7392_v38, %v5990_v36  ;;  %v6246_v43 = vld [vmem:[#allocation2 + $0x2c8] sm:$0xf]  ;;  %v461_v2 = vld [vmem:[%s8402_s24 + $0xf8] sm:$0xff] }
  0x60   : > { %1560 = vmatpush.bf16.msrb.mxu2 %v6059_v1  ;;  %v6251_v42 = vor.u32 %v7452_v39, %v6248_v40  ;;  %v7456_v44 = vld [vmem:[#allocation2 + $0x2e4] sm:$0xf0]  ;;  %v7380_v54 = vld [vmem:[#allocation2 + $0x8c] sm:$0xf] }
  0x61   : > { %1462 = vmatpush.bf16.msrb.mxu0 %v6055_v8  ;;  %v6247_v46 = vor.u32 %v7456_v44, %v6246_v43  ;;  %v443_v50 = vld [vmem:[%s8402_s24 + $0x68] sm:$0xff]  ;;  %v456_v43 = vld [vmem:[%s8402_s24 + $0xd0] sm:$0xff] }
  0x62   : > { %1609 = vmatpush.bf16.msrb.mxu3 %v6315_v5  ;;  %1511 = vmatpush.bf16.msrb.mxu1 %v6311_v9  ;;  %v8446_v53 = vpack.c.bf16 %v445_v51, %v443_v50  ;;  %v5960_v55 = vld [vmem:[#allocation2 + $0xa8] sm:$0xf0]  ;;  %v5958_v56 = vld [vmem:[#allocation2 + $0x88] sm:$0xf]  ;;  %v449_v5 = vld [vmem:[%s8402_s24 + $0x98] sm:$0xff] }
  0x63   : > { %v5963_v57 = vor.u32 %v7380_v54, %v5960_v55  ;;  %v7384_v58 = vld [vmem:[#allocation2 + $0xa4] sm:$0xf0]  ;;  %v7444_v59 = vld [vmem:[#allocation2 + $0x28c] sm:$0xf]  ;;  %v7421_v50 = vld [vmem:[#allocation2 + $0x1d4] sm:$0xf] }
  0x64   : > { %1561 = vmatpush.bf16.msrb.mxu2 %v6027_v19  ;;  %v6216_v60 = vld [vmem:[#allocation2 + $0x2a8] sm:$0xf0]  ;;  %v5959_v61 = vor.u32 %v7384_v58, %v5958_v56  ;;  %v6214_v63 = vld [vmem:[#allocation2 + $0x288] sm:$0xf]  ;;  %v6128_v51 = vld [vmem:[#allocation2 + $0x1f0] sm:$0xf0] }
  0x65   : > { %1463 = vmatpush.bf16.msrb.mxu0 %v6023_v23  ;;  %v6219_v62 = vor.u32 %v7444_v59, %v6216_v60  ;;  %v7448_v0 = vld [vmem:[#allocation2 + $0x2a4] sm:$0xf0]  ;;  %v7372_v8 = vld [vmem:[#allocation2 + $0x4c] sm:$0xf]  ;;  %v452_v23 = vld [vmem:[%s8402_s24 + $0xb0] sm:$0xff]  ;;  %v6131_v55 = vor.u32 %v7421_v50, %v6128_v51 }
  0x66   : > { %1610 = vmatpush.bf16.msrb.mxu3 %v6283_v24  ;;  %1512 = vmatpush.bf16.msrb.mxu1 %v6279_v27  ;;  %v6215_v1 = vor.u32 %v7448_v0, %v6214_v63  ;;  %v447_v4 = vld [vmem:[%s8402_s24 + $0x88] sm:$0xff]  ;;  %v8468_v26 = vpack.c.bf16 %v452_v23, %v450_v22  ;;  %v6126_v54 = vld [vmem:[#allocation2 + $0x1d0] sm:$0xf]  ;;  %v6384_v58 = vld [vmem:[#allocation2 + $0x3f0] sm:$0xf0] }
  0x67   : > { %1277 = vmatmul.bf16.gmra.mxu0 %v8420_v14  ;;  %1375 = vmatmul.bf16.gmra.mxu2 %v8420_v14  ;;  %v8458_v7 = vpack.c.bf16 %v449_v5, %v447_v4  ;;  %v5928_v9 = vld [vmem:[#allocation2 + $0x68] sm:$0xf0]  ;;  %v5926_v10 = vld [vmem:[#allocation2 + $0x48] sm:$0xf]  ;;  %v7425_v56 = vld [vmem:[#allocation2 + $0x1ec] sm:$0xf0] }
  0x68   : > { %1326 = vmatmul.bf16.gmra.mxu1 %v8422_v15  ;;  %1562 = vmatpush.bf16.msrb.mxu2 %v5995_v37  ;;  %v5931_v11 = vor.u32 %v7372_v8, %v5928_v9  ;;  %v7376_v12 = vld [vmem:[#allocation2 + $0x64] sm:$0xf0]  ;;  %v7436_v13 = vld [vmem:[#allocation2 + $0x24c] sm:$0xf]  ;;  %v6127_v59 = vor.u32 %v7425_v56, %v6126_v54  ;;  %v6382_v63 = vld [vmem:[#allocation2 + $0x3d0] sm:$0xf] }
  0x69   : > { %1424 = vmatmul.bf16.gmra.mxu3 %v8422_v15  ;;  %1464 = vmatpush.bf16.msrb.mxu0 %v5991_v41  ;;  %v6184_v16 = vld [vmem:[#allocation2 + $0x268] sm:$0xf0]  ;;  %v5927_v17 = vor.u32 %v7376_v12, %v5926_v10  ;;  %v6182_v19 = vld [vmem:[#allocation2 + $0x248] sm:$0xf]  ;;  %v7489_v0 = vld [vmem:[#allocation2 + $0x3ec] sm:$0xf0] }
  0x6a   : > { %1611 = vmatpush.bf16.msrb.mxu3 %v6251_v42  ;;  %1513 = vmatpush.bf16.msrb.mxu1 %v6247_v46  ;;  %v6187_v18 = vor.u32 %v7436_v13, %v6184_v16  ;;  %v7440_v20 = vld [vmem:[#allocation2 + $0x264] sm:$0xf0]  ;;  %v7364_v28 = vld [vmem:[#allocation2 + $0xc] sm:$0xf]  ;;  %v454_v42 = vld [vmem:[%s8402_s24 + $0xc0] sm:$0xff]  ;;  %v6383_v3 = vor.u32 %v7489_v0, %v6382_v63 }
  0x6b   : > { %v6183_v21 = vor.u32 %v7440_v20, %v6182_v19  ;;  %v451_v24 = vld [vmem:[%s8402_s24 + $0xa8] sm:$0xff]  ;;  %v457_v46 = vld [vmem:[%s8402_s24 + $0xd8] sm:$0xff]  ;;  %v8480_v47 = vpack.c.bf16 %v456_v43, %v454_v42  ;;  %v7413_v8 = vld [vmem:[#allocation2 + $0x194] sm:$0xf] }
  0x6c   : > { %1563 = vmatpush.bf16.msrb.mxu2 %v5963_v57  ;;  %v8470_v27 = vpack.c.bf16 %v453_v25, %v451_v24  ;;  %v5896_v29 = vld [vmem:[#allocation2 + $0x28] sm:$0xf0]  ;;  %v5894_v30 = vld [vmem:[#allocation2 + $0x8] sm:$0xf]  ;;  %v7485_v57 = vld [vmem:[#allocation2 + $0x3d4] sm:$0xf] }
  0x6d   : > { %1465 = vmatpush.bf16.msrb.mxu0 %v5959_v61  ;;  %v5899_v31 = vor.u32 %v7364_v28, %v5896_v29  ;;  %v7368_v34 = vld [vmem:[#allocation2 + $0x24] sm:$0xf0]  ;;  %v7428_v35 = vld [vmem:[#allocation2 + $0x20c] sm:$0xf]  ;;  %v6387_v60 = vor.u32 %v7485_v57, %v6384_v58  ;;  %v458_v61 = vld [vmem:[%s8402_s24 + $0xe0] sm:$0xff] }
  0x6e   : > { %1612 = vmatpush.bf16.msrb.mxu3 %v6219_v62  ;;  %1514 = vmatpush.bf16.msrb.mxu1 %v6215_v1  ;;  %v6152_v36 = vld [vmem:[#allocation2 + $0x228] sm:$0xf0]  ;;  %v5895_v37 = vor.u32 %v7368_v34, %v5894_v30  ;;  %v6150_v39 = vld [vmem:[#allocation2 + $0x208] sm:$0xf]  ;;  %v460_v62 = vld [vmem:[%s8402_s24 + $0xf0] sm:$0xff] }
  0x6f   : > { %v6155_v38 = vor.u32 %v7428_v35, %v6152_v36  ;;  %v7432_v40 = vld [vmem:[#allocation2 + $0x224] sm:$0xf0]  ;;  %v8492_v4 = vpack.c.bf16 %v460_v62, %v458_v61  ;;  %v6096_v9 = vld [vmem:[#allocation2 + $0x1b0] sm:$0xf0]  ;;  %v6094_v10 = vld [vmem:[#allocation2 + $0x190] sm:$0xf] }
  0x70   : > { %1564 = vmatpush.bf16.msrb.mxu2 %v5931_v11  ;;  %v6151_v41 = vor.u32 %v7432_v40, %v6150_v39  ;;  %v455_v44 = vld [vmem:[%s8402_s24 + $0xc8] sm:$0xff]  ;;  %v6099_v11 = vor.u32 %v7413_v8, %v6096_v9  ;;  %v7417_v12 = vld [vmem:[#allocation2 + $0x1ac] sm:$0xf0]  ;;  %v7477_v13 = vld [vmem:[#allocation2 + $0x394] sm:$0xf] }
  0x71   : > { %1466 = vmatpush.bf16.msrb.mxu0 %v5927_v17  ;;  %v8482_v48 = vpack.c.bf16 %v457_v46, %v455_v44  ;;  %v459_v1 = vld [vmem:[%s8402_s24 + $0xe8] sm:$0xff]  ;;  %v6352_v16 = vld [vmem:[#allocation2 + $0x3b0] sm:$0xf0]  ;;  %v6095_v17 = vor.u32 %v7417_v12, %v6094_v10  ;;  %v8500_v19 = vld [vmem:[#allocation5] sm:$0xff] }
  0x72   : > { %1613 = vmatpush.bf16.msrb.mxu3 %v6187_v18  ;;  %1515 = vmatpush.bf16.msrb.mxu1 %v6183_v21  ;;  %v8494_v5 = vpack.c.bf16 %v461_v2, %v459_v1  ;;  %v6355_v18 = vor.u32 %v7477_v13, %v6352_v16  ;;  %v6350_v20 = vld [vmem:[#allocation2 + $0x390] sm:$0xf]  ;;  %v8503_v22 = vperm.slane %v8500_v19, 0  ;;  %v8510_v30 = vperm.slane %v8500_v19, 1  ;;  %v6064_v34 = vld [vmem:[#allocation2 + $0x170] sm:$0xf0] }
  0x73   : > { %v7481_v21 = vld [vmem:[#allocation2 + $0x3ac] sm:$0xf0]  ;;  %v7397_v12 = vld [vmem:[#allocation2 + $0x114] sm:$0xf] }
  0x74   : > { %1565 = vmatpush.bf16.msrb.mxu2 %v5899_v31  ;;  %v6351_v23 = vor.u32 %v7481_v21, %v6350_v20  ;;  %v7405_v31 = vld [vmem:[#allocation2 + $0x154] sm:$0xf]  ;;  %v6062_v36 = vld [vmem:[#allocation2 + $0x150] sm:$0xf] }
  0x75   : > { %1467 = vmatpush.bf16.msrb.mxu0 %v5895_v37  ;;  %v6067_v35 = vor.u32 %v7405_v31, %v6064_v34  ;;  %v7409_v37 = vld [vmem:[#allocation2 + $0x16c] sm:$0xf0]  ;;  %v6032_v13 = vld [vmem:[#allocation2 + $0x130] sm:$0xf0] }
  0x76   : > { %1614 = vmatpush.bf16.msrb.mxu3 %v6155_v38  ;;  %1516 = vmatpush.bf16.msrb.mxu1 %v6151_v41  ;;  %v7469_v38 = vld [vmem:[#allocation2 + $0x354] sm:$0xf]  ;;  %v6063_v40 = vor.u32 %v7409_v37, %v6062_v36  ;;  %v6318_v56 = vld [vmem:[#allocation2 + $0x350] sm:$0xf] }
  0x77   : > { %1282 = vmatmul.bf16.gmra.mxu0 %v8432_v32  ;;  %1380 = vmatmul.bf16.gmra.mxu2 %v8432_v32  ;;  %v6320_v41 = vld [vmem:[#allocation2 + $0x370] sm:$0xf0]  ;;  %v7473_v57 = vld [vmem:[#allocation2 + $0x36c] sm:$0xf0] }
  0x78   : > { %1331 = vmatmul.bf16.gmra.mxu1 %v8434_v33  ;;  %1754 = vmatpush.bf16.msra.mxu2 %v6131_v55  ;;  %v6323_v46 = vor.u32 %v7469_v38, %v6320_v41  ;;  %v7401_v20 = vld [vmem:[#allocation2 + $0x12c] sm:$0xf0]  ;;  %v7461_v21 = vld [vmem:[#allocation2 + $0x314] sm:$0xf] }
  0x79   : > { %1429 = vmatmul.bf16.gmra.mxu3 %v8434_v33  ;;  %1656 = vmatpush.bf16.msra.mxu0 %v6127_v59 }
  0x7a   : > { %1803 = vmatpush.bf16.msra.mxu3 %v6387_v60  ;;  %1705 = vmatpush.bf16.msra.mxu1 %v6383_v3  ;;  %v6319_v60 = vor.u32 %v7473_v57, %v6318_v56 }
  0x7c   : > { %1755 = vmatpush.bf16.msra.mxu2 %v6099_v11 }
  0x7d   : > { %1657 = vmatpush.bf16.msra.mxu0 %v6095_v17  ;;  %v6035_v17 = vor.u32 %v7397_v12, %v6032_v13 }
  0x7e   : > { %1804 = vmatpush.bf16.msra.mxu3 %v6355_v18  ;;  %1706 = vmatpush.bf16.msra.mxu1 %v6351_v23  ;;  %v6030_v18 = vld [vmem:[#allocation2 + $0x110] sm:$0xf] }
  0x80   : > { %1756 = vmatpush.bf16.msra.mxu2 %v6067_v35 }
  0x81   : > { %1658 = vmatpush.bf16.msra.mxu0 %v6063_v40  ;;  %v7465_v40 = vld [vmem:[#allocation2 + $0x32c] sm:$0xf0] }
  0x82   : > { %1805 = vmatpush.bf16.msra.mxu3 %v6323_v46  ;;  %1707 = vmatpush.bf16.msra.mxu1 %v6319_v60 }
  0x84   : > { %1757 = vmatpush.bf16.msra.mxu2 %v6035_v17 }
  0x87   : > { %1287 = vmatmul.bf16.gmra.mxu0 %v8444_v52  ;;  %1385 = vmatmul.bf16.gmra.mxu2 %v8444_v52 }
  0x88   : > { %1336 = vmatmul.bf16.gmra.mxu1 %v8446_v53 }
  0x89   : > { %1434 = vmatmul.bf16.gmra.mxu3 %v8446_v53 }
  0x97   : > { %1292 = vmatmul.bf16.gmra.mxu0 %v8456_v6  ;;  %1390 = vmatmul.bf16.gmra.mxu2 %v8456_v6 }
  0x98   : > { %1341 = vmatmul.bf16.gmra.mxu1 %v8458_v7 }
  0x99   : > { %1439 = vmatmul.bf16.gmra.mxu3 %v8458_v7 }
  0xa7   : > { %1297 = vmatmul.bf16.gmra.mxu0 %v8468_v26  ;;  %1395 = vmatmul.bf16.gmra.mxu2 %v8468_v26 }
  0xa8   : > { %1346 = vmatmul.bf16.gmra.mxu1 %v8470_v27 }
  0xa9   : > { %1444 = vmatmul.bf16.gmra.mxu3 %v8470_v27 }
  0xb7   : > { %1302 = vmatmul.bf16.gmra.mxu0 %v8480_v47  ;;  %1400 = vmatmul.bf16.gmra.mxu2 %v8480_v47 }
  0xb8   : > { %1351 = vmatmul.bf16.gmra.mxu1 %v8482_v48 }
  0xb9   : > { %1449 = vmatmul.bf16.gmra.mxu3 %v8482_v48 }
  0xc7   : > { %1307 = vmatmul.bf16.gmra.mxu0 %v8492_v4  ;;  %1405 = vmatmul.bf16.gmra.mxu2 %v8492_v4 }
  0xc8   : > { %1356 = vmatmul.bf16.gmra.mxu1 %v8494_v5 }
  0xc9   : > { %1454 = vmatmul.bf16.gmra.mxu3 %v8494_v5 }
  0xd4   : > { %v1273_v24 = vpop.f32.mrf.mxu0 }
  0xd5   : > { %v1274_v25 = vadd.f32 %v1273_v24, %v8503_v22  ;;  %v1322_v28 = vpop.f32.mrf.mxu1  ;;  %v6031_v24 = vor.u32 %v7401_v20, %v6030_v18 }
  0xd7   : > { %v1323_v29 = vadd.f32 %v1322_v28, %v1274_v25  ;;  %1468 = vmatmul.bf16.vlgmr.msrb.gmra.mxu0 %v8408_v45  ;;  %1566 = vmatmul.bf16.vlgmr.msrb.gmra.mxu2 %v8408_v45  ;;  %v6288_v25 = vld [vmem:[#allocation2 + $0x330] sm:$0xf0] }
  0xd8   : > { %1517 = vmatmul.bf16.vlgmr.msrb.gmra.mxu1 %v8410_v49  ;;  %v6291_v34 = vor.u32 %v7461_v21, %v6288_v25  ;;  %1659 = vmatpush.bf16.msra.mxu0 %v6031_v24  ;;  %v6254_v25 = vld [vmem:[#allocation2 + $0x2d0] sm:$0xf] }
  0xd9   : > { %1615 = vmatmul.bf16.vlgmr.msrb.gmra.mxu3 %v8410_v49  ;;  %v2048_v58 = vmax.f32 %v1323_v29, 0.0 }
  0xda   : > { %v1371_v39 = vpop.f32.mrf.mxu2  ;;  %1806 = vmatpush.bf16.msra.mxu3 %v6291_v34 }
  0xdb   : > { %v1372_v42 = vadd.f32 %v1371_v39, %v8510_v30  ;;  %v6286_v39 = vld [vmem:[#allocation2 + $0x310] sm:$0xf] }
  0xdc   : > { %v1420_v43 = vpop.f32.mrf.mxu3  ;;  %v1275_v44 = vpop.f32.mrf.mxu0 }
  0xdd   : > { %v1276_v50 = vadd.f32 %v1275_v44, %v8503_v22  ;;  %v1324_v51 = vpop.f32.mrf.mxu1  ;;  %v1421_v54 = vadd.f32 %v1420_v43, %v1372_v42  ;;  %v6287_v43 = vor.u32 %v7465_v40, %v6286_v39 }
  0xdf   : > { %v1325_v55 = vadd.f32 %v1324_v51, %v1276_v50  ;;  %v2049_v10 = vmax.f32 %v1421_v54, 0.0  ;;  %1708 = vmatpush.bf16.msra.mxu1 %v6287_v43 }
  0xe1   : > { %v2056_v59 = vmax.f32 %v1325_v55, 0.0 }
  0xe2   : > { %v1373_v62 = vpop.f32.mrf.mxu2 }
  0xe3   : > { %v8515_v61 = vpack.c.bf16 %v2056_v59, %v2048_v58  ;;  %v1374_v63 = vadd.f32 %v1373_v62, %v8510_v30  ;;  %v7389_v62 = vld [vmem:[#allocation2 + $0xd4] sm:$0xf] }
  0xe4   : > { %v1422_v0 = vpop.f32.mrf.mxu3  ;;  %v1278_v1 = vpop.f32.mrf.mxu0 }
  0xe5   : > { %v1279_v2 = vadd.f32 %v1278_v1, %v8503_v22  ;;  %v1327_v3 = vpop.f32.mrf.mxu1  ;;  %v1423_v8 = vadd.f32 %v1422_v0, %v1374_v63  ;;  %v6000_v63 = vld [vmem:[#allocation2 + $0xf0] sm:$0xf0]  ;;  %v5998_v1 = vld [vmem:[#allocation2 + $0xd0] sm:$0xf] }
  0xe6   : > { %v6003_v0 = vor.u32 %v7389_v62, %v6000_v63  ;;  %v6224_v63 = vld [vmem:[#allocation2 + $0x2b0] sm:$0xf0] }
  0xe7   : > { %v1328_v9 = vadd.f32 %v1327_v3, %v1279_v2  ;;  %1473 = vmatmul.bf16.gmra.mxu0 %v8420_v14  ;;  %v2057_v11 = vmax.f32 %v1423_v8, 0.0  ;;  %1571 = vmatmul.bf16.gmra.mxu2 %v8420_v14  ;;  %v7393_v2 = vld [vmem:[#allocation2 + $0xec] sm:$0xf0]  ;;  %v7453_v3 = vld [vmem:[#allocation2 + $0x2d4] sm:$0xf] }
  0xe8   : > { %1522 = vmatmul.bf16.gmra.mxu1 %v8422_v15  ;;  %1758 = vmatpush.bf16.msra.mxu2 %v6003_v0 }
  0xe9   : > { %1620 = vmatmul.bf16.gmra.mxu3 %v8422_v15  ;;  %v8523_v16 = vpack.c.bf16 %v2057_v11, %v2049_v10  ;;  %v2064_v41 = vmax.f32 %v1328_v9, 0.0  ;;  %v5999_v10 = vor.u32 %v7393_v2, %v5998_v1  ;;  %v6256_v11 = vld [vmem:[#allocation2 + $0x2f0] sm:$0xf0] }
  0xea   : > { %v1376_v23 = vpop.f32.mrf.mxu2  ;;  %v6259_v18 = vor.u32 %v7453_v3, %v6256_v11 }
  0xeb   : > { %v1377_v28 = vadd.f32 %v1376_v23, %v8510_v30  ;;  %1660 = vmatpush.bf16.msra.mxu0 %v5999_v10 }
  0xec   : > { %v1425_v29 = vpop.f32.mrf.mxu3  ;;  %v1280_v31 = vpop.f32.mrf.mxu0  ;;  %1807 = vmatpush.bf16.msra.mxu3 %v6259_v18 }
  0xed   : > { %v1281_v35 = vadd.f32 %v1280_v31, %v8503_v22  ;;  %v1329_v36 = vpop.f32.mrf.mxu1  ;;  %v1426_v37 = vadd.f32 %v1425_v29, %v1377_v28  ;;  %v7457_v28 = vld [vmem:[#allocation2 + $0x2ec] sm:$0xf0] }
  0xee   : > { %v6255_v34 = vor.u32 %v7457_v28, %v6254_v25 }
  0xef   : > { %v1330_v38 = vadd.f32 %v1329_v36, %v1281_v35  ;;  %v2065_v59 = vmax.f32 %v1426_v37, 0.0 }
  0xf0   : > { %1709 = vmatpush.bf16.msra.mxu1 %v6255_v34 }
  0xf1   : > { %v2072_v42 = vmax.f32 %v1330_v38, 0.0 }
  0xf2   : > { %v1378_v44 = vpop.f32.mrf.mxu2 }
  0xf3   : > { %v8527_v46 = vpack.c.bf16 %v2072_v42, %v2064_v41  ;;  %v1379_v50 = vadd.f32 %v1378_v44, %v8510_v30 }
  0xf4   : > { %v1427_v51 = vpop.f32.mrf.mxu3  ;;  %v1283_v54 = vpop.f32.mrf.mxu0 }
  0xf5   : > { %v1284_v55 = vadd.f32 %v1283_v54, %v8503_v22  ;;  %v1332_v56 = vpop.f32.mrf.mxu1  ;;  %v1428_v57 = vadd.f32 %v1427_v51, %v1379_v50  ;;  %v7381_v51 = vld [vmem:[#allocation2 + $0x94] sm:$0xf] }
  0xf6   : > { %v5968_v54 = vld [vmem:[#allocation2 + $0xb0] sm:$0xf0] }
  0xf7   : > { %v1333_v58 = vadd.f32 %v1332_v56, %v1284_v55  ;;  %1478 = vmatmul.bf16.gmra.mxu0 %v8432_v32  ;;  %v2073_v60 = vmax.f32 %v1428_v57, 0.0  ;;  %1576 = vmatmul.bf16.gmra.mxu2 %v8432_v32  ;;  %v5971_v55 = vor.u32 %v7381_v51, %v5968_v54  ;;  %v5966_v56 = vld [vmem:[#allocation2 + $0x90] sm:$0xf] }
  0xf8   : > { %1527 = vmatmul.bf16.gmra.mxu1 %v8434_v33  ;;  %v7385_v57 = vld [vmem:[#allocation2 + $0xac] sm:$0xf0] }
  0xf9   : > { %1625 = vmatmul.bf16.gmra.mxu3 %v8434_v33  ;;  %v8535_v8 = vpack.c.bf16 %v2073_v60, %v2065_v59  ;;  %v2080_v29 = vmax.f32 %v1333_v58, 0.0  ;;  %v7445_v58 = vld [vmem:[#allocation2 + $0x294] sm:$0xf]  ;;  %v5967_v62 = vor.u32 %v7385_v57, %v5966_v56  ;;  %1759 = vmatpush.bf16.msra.mxu2 %v5971_v55 }
  0xfa   : > { %v1381_v9 = vpop.f32.mrf.mxu2  ;;  %v6227_v3 = vor.u32 %v7445_v58, %v6224_v63  ;;  %v6192_v56 = vld [vmem:[#allocation2 + $0x270] sm:$0xf0] }
  0xfb   : > { %v1382_v12 = vadd.f32 %v1381_v9, %v8510_v30  ;;  %1661 = vmatpush.bf16.msra.mxu0 %v5967_v62 }
  0xfc   : > { %v1430_v13 = vpop.f32.mrf.mxu3  ;;  %v1285_v17 = vpop.f32.mrf.mxu0  ;;  %1808 = vmatpush.bf16.msra.mxu3 %v6227_v3  ;;  %v6190_v3 = vld [vmem:[#allocation2 + $0x250] sm:$0xf] }
  0xfd   : > { %v1286_v20 = vadd.f32 %v1285_v17, %v8503_v22  ;;  %v1334_v21 = vpop.f32.mrf.mxu1  ;;  %v1431_v23 = vadd.f32 %v1430_v13, %v1382_v12  ;;  %v6222_v13 = vld [vmem:[#allocation2 + $0x290] sm:$0xf] }
  0xfe   : > { %v7449_v17 = vld [vmem:[#allocation2 + $0x2ac] sm:$0xf0] }
  0xff   : > { %v1335_v24 = vadd.f32 %v1334_v21, %v1286_v20  ;;  %v2081_v44 = vmax.f32 %v1431_v23, 0.0  ;;  %v6223_v21 = vor.u32 %v7449_v17, %v6222_v13 }
 0x101   : > { %v2088_v31 = vmax.f32 %v1335_v24, 0.0  ;;  %1710 = vmatpush.bf16.msra.mxu1 %v6223_v21 }
 0x102   : > { %v1383_v35 = vpop.f32.mrf.mxu2 }
 0x103   : > { %v8539_v36 = vpack.c.bf16 %v2088_v31, %v2080_v29  ;;  %v1384_v37 = vadd.f32 %v1383_v35, %v8510_v30 }
 0x104   : > { %v1432_v38 = vpop.f32.mrf.mxu3  ;;  %v1288_v39 = vpop.f32.mrf.mxu0 }
 0x105   : > { %v1289_v40 = vadd.f32 %v1288_v39, %v8503_v22  ;;  %v1337_v41 = vpop.f32.mrf.mxu1  ;;  %v1433_v42 = vadd.f32 %v1432_v38, %v1384_v37 }
 0x107   : > { %v1338_v43 = vadd.f32 %v1337_v41, %v1289_v40  ;;  %1483 = vmatmul.bf16.gmra.mxu0 %v8444_v52  ;;  %v2089_v50 = vmax.f32 %v1433_v42, 0.0  ;;  %1581 = vmatmul.bf16.gmra.mxu2 %v8444_v52  ;;  %v7373_v40 = vld [vmem:[#allocation2 + $0x54] sm:$0xf] }
 0x108   : > { %1532 = vmatmul.bf16.gmra.mxu1 %v8446_v53  ;;  %v5936_v41 = vld [vmem:[#allocation2 + $0x70] sm:$0xf0] }
 0x109   : > { %1630 = vmatmul.bf16.gmra.mxu3 %v8446_v53  ;;  %v8547_v59 = vpack.c.bf16 %v2089_v50, %v2081_v44  ;;  %v2096_v18 = vmax.f32 %v1338_v43, 0.0  ;;  %v5939_v42 = vor.u32 %v7373_v40, %v5936_v41  ;;  %v5934_v43 = vld [vmem:[#allocation2 + $0x50] sm:$0xf]  ;;  %v7437_v50 = vld [vmem:[#allocation2 + $0x254] sm:$0xf] }
 0x10a   : > { %v1386_v60 = vpop.f32.mrf.mxu2  ;;  %v7377_v44 = vld [vmem:[#allocation2 + $0x6c] sm:$0xf0]  ;;  %v6195_v62 = vor.u32 %v7437_v50, %v6192_v56  ;;  %v7429_v41 = vld [vmem:[#allocation2 + $0x214] sm:$0xf] }
 0x10b   : > { %v1387_v0 = vadd.f32 %v1386_v60, %v8510_v30  ;;  %v5935_v55 = vor.u32 %v7377_v44, %v5934_v43  ;;  %1760 = vmatpush.bf16.msra.mxu2 %v5939_v42  ;;  %v7369_v40 = vld [vmem:[#allocation2 + $0x2c] sm:$0xf0]  ;;  %v6160_v50 = vld [vmem:[#allocation2 + $0x230] sm:$0xf0] }
 0x10c   : > { %v1435_v1 = vpop.f32.mrf.mxu3  ;;  %v1290_v2 = vpop.f32.mrf.mxu0  ;;  %1809 = vmatpush.bf16.msra.mxu3 %v6195_v62 }
 0x10d   : > { %v1291_v9 = vadd.f32 %v1290_v2, %v8503_v22  ;;  %v1339_v10 = vpop.f32.mrf.mxu1  ;;  %v1436_v11 = vadd.f32 %v1435_v1, %v1387_v0  ;;  %1662 = vmatpush.bf16.msra.mxu0 %v5935_v55 }
 0x10f   : > { %v1340_v12 = vadd.f32 %v1339_v10, %v1291_v9  ;;  %v2097_v38 = vmax.f32 %v1436_v11, 0.0  ;;  %v7441_v9 = vld [vmem:[#allocation2 + $0x26c] sm:$0xf0] }
 0x111   : > { %v2104_v20 = vmax.f32 %v1340_v12, 0.0  ;;  %v6191_v12 = vor.u32 %v7441_v9, %v6190_v3 }
 0x112   : > { %v1388_v23 = vpop.f32.mrf.mxu2 }
 0x113   : > { %v8551_v24 = vpack.c.bf16 %v2104_v20, %v2096_v18  ;;  %v1389_v25 = vadd.f32 %v1388_v23, %v8510_v30  ;;  %1711 = vmatpush.bf16.msra.mxu1 %v6191_v12 }
 0x114   : > { %v1437_v28 = vpop.f32.mrf.mxu3  ;;  %v1293_v29 = vpop.f32.mrf.mxu0 }
 0x115   : > { %v1294_v31 = vadd.f32 %v1293_v29, %v8503_v22  ;;  %v1342_v34 = vpop.f32.mrf.mxu1  ;;  %v1438_v35 = vadd.f32 %v1437_v28, %v1389_v25 }
 0x117   : > { %v1343_v37 = vadd.f32 %v1342_v34, %v1294_v31  ;;  %1488 = vmatmul.bf16.gmra.mxu0 %v8456_v6  ;;  %v2105_v39 = vmax.f32 %v1438_v35, 0.0  ;;  %1586 = vmatmul.bf16.gmra.mxu2 %v8456_v6  ;;  %v7365_v35 = vld [vmem:[#allocation2 + $0x14] sm:$0xf] }
 0x118   : > { %1537 = vmatmul.bf16.gmra.mxu1 %v8458_v7 }
 0x119   : > { %1635 = vmatmul.bf16.gmra.mxu3 %v8458_v7  ;;  %v8559_v51 = vpack.c.bf16 %v2105_v39, %v2097_v38  ;;  %v2112_v10 = vmax.f32 %v1343_v37, 0.0  ;;  %v5904_v37 = vld [vmem:[#allocation2 + $0x30] sm:$0xf0]  ;;  %v5902_v39 = vld [vmem:[#allocation2 + $0x10] sm:$0xf] }
 0x11a   : > { %v1391_v54 = vpop.f32.mrf.mxu2  ;;  %v5907_v38 = vor.u32 %v7365_v35, %v5904_v37  ;;  %v5903_v44 = vor.u32 %v7369_v40, %v5902_v39  ;;  %v6134_v37 = vld [vmem:[#allocation2 + $0x1d8] sm:$0xf]  ;;  %v7486_v39 = vld [vmem:[#allocation2 + $0x3dc] sm:$0xf] }
 0x11b   : > { %v1392_v57 = vadd.f32 %v1391_v54, %v8510_v30 }
 0x11c   : > { %v1440_v58 = vpop.f32.mrf.mxu3  ;;  %v1295_v60 = vpop.f32.mrf.mxu0  ;;  %1761 = vmatpush.bf16.msra.mxu2 %v5907_v38  ;;  %1663 = vmatpush.bf16.msra.mxu0 %v5903_v44  ;;  %v7426_v38 = vld [vmem:[#allocation2 + $0x1f4] sm:$0xf0]  ;;  %v6392_v44 = vld [vmem:[#allocation2 + $0x3f8] sm:$0xf0] }
 0x11d   : > { %v1296_v63 = vadd.f32 %v1295_v60, %v8503_v22  ;;  %v1344_v0 = vpop.f32.mrf.mxu1  ;;  %v1441_v1 = vadd.f32 %v1440_v58, %v1392_v57  ;;  %v6163_v57 = vor.u32 %v7429_v41, %v6160_v50 }
 0x11f   : > { %v1345_v2 = vadd.f32 %v1344_v0, %v1296_v63  ;;  %v2113_v31 = vmax.f32 %v1441_v1, 0.0  ;;  %1810 = vmatpush.bf16.msra.mxu3 %v6163_v57  ;;  %v6158_v0 = vld [vmem:[#allocation2 + $0x210] sm:$0xf] }
 0x120   : > { %v7433_v1 = vld [vmem:[#allocation2 + $0x22c] sm:$0xf0] }
 0x121   : > { %v2120_v11 = vmax.f32 %v1345_v2, 0.0  ;;  %v6159_v9 = vor.u32 %v7433_v1, %v6158_v0  ;;  %v7490_v0 = vld [vmem:[#allocation2 + $0x3f4] sm:$0xf0] }
 0x122   : > { %v1393_v13 = vpop.f32.mrf.mxu2 }
 0x123   : > { %v8563_v17 = vpack.c.bf16 %v2120_v11, %v2112_v10  ;;  %v1394_v18 = vadd.f32 %v1393_v13, %v8510_v30  ;;  %1712 = vmatpush.bf16.msra.mxu1 %v6159_v9 }
 0x124   : > { %v1442_v20 = vpop.f32.mrf.mxu3  ;;  %v1298_v21 = vpop.f32.mrf.mxu0 }
 0x125   : > { %v1299_v23 = vadd.f32 %v1298_v21, %v8503_v22  ;;  %v1347_v25 = vpop.f32.mrf.mxu1  ;;  %v1443_v28 = vadd.f32 %v1442_v20, %v1394_v18 }
 0x127   : > { %v1348_v29 = vadd.f32 %v1347_v25, %v1299_v23  ;;  %1493 = vmatmul.bf16.gmra.mxu0 %v8468_v26  ;;  %v2121_v34 = vmax.f32 %v1443_v28, 0.0  ;;  %1591 = vmatmul.bf16.gmra.mxu2 %v8468_v26 }
 0x128   : > { %1542 = vmatmul.bf16.gmra.mxu1 %v8470_v27 }
 0x129   : > { %1640 = vmatmul.bf16.gmra.mxu3 %v8470_v27  ;;  %v8571_v42 = vpack.c.bf16 %v2121_v34, %v2113_v31  ;;  %v2128_v2 = vmax.f32 %v1348_v29, 0.0  ;;  %v7422_v29 = vld [vmem:[#allocation2 + $0x1dc] sm:$0xf] }
 0x12a   : > { %v1396_v43 = vpop.f32.mrf.mxu2  ;;  %v6136_v34 = vld [vmem:[#allocation2 + $0x1f8] sm:$0xf0] }
 0x12b   : > { %v1397_v54 = vadd.f32 %v1396_v43, %v8510_v30  ;;  %v6139_v35 = vor.u32 %v7422_v29, %v6136_v34  ;;  %v6135_v43 = vor.u32 %v7426_v38, %v6134_v37  ;;  %v6104_v34 = vld [vmem:[#allocation2 + $0x1b8] sm:$0xf0] }
 0x12c   : > { %v1445_v55 = vpop.f32.mrf.mxu3  ;;  %v1300_v56 = vpop.f32.mrf.mxu0 }
 0x12d   : > { %v1301_v58 = vadd.f32 %v1300_v56, %v8503_v22  ;;  %v1349_v60 = vpop.f32.mrf.mxu1  ;;  %v1446_v62 = vadd.f32 %v1445_v55, %v1397_v54  ;;  %1950 = vmatpush.bf16.msrb.mxu2 %v6139_v35  ;;  %v6395_v56 = vor.u32 %v7486_v39, %v6392_v44  ;;  %1852 = vmatpush.bf16.msrb.mxu0 %v6135_v43  ;;  %v6102_v35 = vld [vmem:[#allocation2 + $0x198] sm:$0xf]  ;;  %v7478_v43 = vld [vmem:[#allocation2 + $0x39c] sm:$0xf] }
 0x12e   : > { %v6360_v44 = vld [vmem:[#allocation2 + $0x3b8] sm:$0xf0] }
 0x12f   : > { %v1350_v63 = vadd.f32 %v1349_v60, %v1301_v58  ;;  %v2129_v28 = vmax.f32 %v1446_v62, 0.0  ;;  %1999 = vmatpush.bf16.msrb.mxu3 %v6395_v56 }
 0x131   : > { %v2136_v3 = vmax.f32 %v1350_v63, 0.0  ;;  %v6390_v63 = vld [vmem:[#allocation2 + $0x3d8] sm:$0xf] }
 0x132   : > { %v1398_v10 = vpop.f32.mrf.mxu2 }
 0x133   : > { %v8575_v11 = vpack.c.bf16 %v2136_v3, %v2128_v2  ;;  %v1399_v12 = vadd.f32 %v1398_v10, %v8510_v30  ;;  %v6391_v3 = vor.u32 %v7490_v0, %v6390_v63  ;;  %v6358_v0 = vld [vmem:[#allocation2 + $0x398] sm:$0xf] }
 0x134   : > { %v1447_v13 = vpop.f32.mrf.mxu3  ;;  %v1303_v18 = vpop.f32.mrf.mxu0 }
 0x135   : > { %v1304_v20 = vadd.f32 %v1303_v18, %v8503_v22  ;;  %v1352_v21 = vpop.f32.mrf.mxu1  ;;  %v1448_v23 = vadd.f32 %v1447_v13, %v1399_v12  ;;  %1901 = vmatpush.bf16.msrb.mxu1 %v6391_v3 }
 0x137   : > { %v1353_v25 = vadd.f32 %v1352_v21, %v1304_v20  ;;  %1498 = vmatmul.bf16.gmra.mxu0 %v8480_v47  ;;  %v2137_v31 = vmax.f32 %v1448_v23, 0.0  ;;  %1596 = vmatmul.bf16.gmra.mxu2 %v8480_v47 }
 0x138   : > { %1547 = vmatmul.bf16.gmra.mxu1 %v8482_v48 }
 0x139   : > { %1645 = vmatmul.bf16.gmra.mxu3 %v8482_v48  ;;  %v8583_v40 = vpack.c.bf16 %v2137_v31, %v2129_v28  ;;  %v2144_v1 = vmax.f32 %v1353_v25, 0.0  ;;  %v7414_v25 = vld [vmem:[#allocation2 + $0x19c] sm:$0xf] }
 0x13a   : > { %v1401_v41 = vpop.f32.mrf.mxu2  ;;  %v6107_v39 = vor.u32 %v7414_v25, %v6104_v34 }
 0x13b   : > { %v1402_v50 = vadd.f32 %v1401_v41, %v8510_v30  ;;  %v7418_v41 = vld [vmem:[#allocation2 + $0x1b4] sm:$0xf0] }
 0x13c   : > { %v1450_v54 = vpop.f32.mrf.mxu3  ;;  %v1305_v55 = vpop.f32.mrf.mxu0  ;;  %v6103_v56 = vor.u32 %v7418_v41, %v6102_v35  ;;  %1951 = vmatpush.bf16.msrb.mxu2 %v6107_v39  ;;  %v8610_v35 = vperm.slane %v8500_v19, 3  ;;  %v6070_v41 = vld [vmem:[#allocation2 + $0x158] sm:$0xf] }
 0x13d   : > { %v1306_v57 = vadd.f32 %v1305_v55, %v8503_v22  ;;  %v1354_v58 = vpop.f32.mrf.mxu1  ;;  %v1451_v60 = vadd.f32 %v1450_v54, %v1402_v50 }
 0x13e   : > { %1853 = vmatpush.bf16.msrb.mxu0 %v6103_v56  ;;  %v6328_v56 = vld [vmem:[#allocation2 + $0x378] sm:$0xf0] }
 0x13f   : > { %v1355_v62 = vadd.f32 %v1354_v58, %v1306_v57  ;;  %v2145_v31 = vmax.f32 %v1451_v60, 0.0  ;;  %v6363_v57 = vor.u32 %v7478_v43, %v6360_v44  ;;  %v7410_v43 = vld [vmem:[#allocation2 + $0x174] sm:$0xf0]  ;;  %v7470_v44 = vld [vmem:[#allocation2 + $0x35c] sm:$0xf] }
 0x141   : > { %v2152_v2 = vmax.f32 %v1355_v62, 0.0  ;;  %2000 = vmatpush.bf16.msrb.mxu3 %v6363_v57 }
 0x142   : > { %v1403_v9 = vpop.f32.mrf.mxu2 }
 0x143   : > { %v8587_v10 = vpack.c.bf16 %v2152_v2, %v2144_v1  ;;  %v1404_v12 = vadd.f32 %v1403_v9, %v8510_v30  ;;  %v7482_v1 = vld [vmem:[#allocation2 + $0x3b4] sm:$0xf0]  ;;  %v8600_v9 = vperm.slane %v8500_v19, 2  ;;  %v6331_v19 = vor.u32 %v7470_v44, %v6328_v56 }
 0x144   : > { %v1452_v13 = vpop.f32.mrf.mxu3  ;;  %v1308_v18 = vpop.f32.mrf.mxu0  ;;  %v7402_v56 = vld [vmem:[#allocation2 + $0x134] sm:$0xf0] }
 0x145   : > { %v1309_v20 = vadd.f32 %v1308_v18, %v8503_v22  ;;  %v1357_v21 = vpop.f32.mrf.mxu1  ;;  %v1453_v23 = vadd.f32 %v1452_v13, %v1404_v12  ;;  %v6359_v12 = vor.u32 %v7482_v1, %v6358_v0  ;;  %2001 = vmatpush.bf16.msrb.mxu3 %v6331_v19  ;;  %v6296_v19 = vld [vmem:[#allocation2 + $0x338] sm:$0xf0] }
 0x147   : > { %v1358_v28 = vadd.f32 %v1357_v21, %v1309_v20  ;;  %1503 = vmatmul.bf16.gmra.mxu0 %v8492_v4  ;;  %v2153_v29 = vmax.f32 %v1453_v23, 0.0  ;;  %1601 = vmatmul.bf16.gmra.mxu2 %v8492_v4 }
 0x148   : > { %1552 = vmatmul.bf16.gmra.mxu1 %v8494_v5 }
 0x149   : > { %1650 = vmatmul.bf16.gmra.mxu3 %v8494_v5  ;;  %v8595_v37 = vpack.c.bf16 %v2153_v29, %v2145_v31  ;;  %v2160_v2 = vmax.f32 %v1358_v28, 0.0  ;;  %1902 = vmatpush.bf16.msrb.mxu1 %v6359_v12 }
 0x14a   : > { %v1406_v38 = vpop.f32.mrf.mxu2 }
 0x14b   : > { %v1407_v50 = vadd.f32 %v1406_v38, %v8510_v30  ;;  %v6072_v38 = vld [vmem:[#allocation2 + $0x178] sm:$0xf0] }
 0x14c   : > { %v1455_v54 = vpop.f32.mrf.mxu3  ;;  %v1310_v55 = vpop.f32.mrf.mxu0 }
 0x14d   : > { %v1311_v58 = vadd.f32 %v1310_v55, %v8503_v22  ;;  %v1359_v60 = vpop.f32.mrf.mxu1  ;;  %v1456_v62 = vadd.f32 %v1455_v54, %v1407_v50  ;;  %v6071_v55 = vor.u32 %v7410_v43, %v6070_v41  ;;  %v6040_v43 = vld [vmem:[#allocation2 + $0x138] sm:$0xf0] }
 0x14f   : > { %v1360_v63 = vadd.f32 %v1359_v60, %v1311_v58  ;;  %v2161_v28 = vmax.f32 %v1456_v62, 0.0  ;;  %1854 = vmatpush.bf16.msrb.mxu0 %v6071_v55  ;;  %v6038_v55 = vld [vmem:[#allocation2 + $0x118] sm:$0xf] }
 0x151   : > { %v2168_v3 = vmax.f32 %v1360_v63, 0.0 }
 0x152   : > { %v1408_v13 = vpop.f32.mrf.mxu2 }
 0x153   : > { %v8602_v18 = vpack.c.bf16 %v2168_v3, %v2160_v2  ;;  %v1409_v22 = vadd.f32 %v1408_v13, %v8510_v30  ;;  %v7406_v30 = vld [vmem:[#allocation2 + $0x15c] sm:$0xf]  ;;  %v6326_v2 = vld [vmem:[#allocation2 + $0x358] sm:$0xf] }
 0x154   : > { %v1457_v20 = vpop.f32.mrf.mxu3  ;;  %v1469_v21 = vpop.f32.mrf.mxu0  ;;  %v6075_v39 = vor.u32 %v7406_v30, %v6072_v38  ;;  %v7474_v3 = vld [vmem:[#allocation2 + $0x374] sm:$0xf0] }
 0x155   : > { %v1470_v23 = vadd.f32 %v1469_v21, %v8600_v9  ;;  %v1518_v31 = vpop.f32.mrf.mxu1  ;;  %v1458_v29 = vadd.f32 %v1457_v20, %v1409_v22  ;;  %v6327_v22 = vor.u32 %v7474_v3, %v6326_v2 }
 0x156   : > { %1952 = vmatpush.bf16.msrb.mxu2 %v6075_v39 }
 0x157   : > { %v1519_v25 = vadd.f32 %v1518_v31, %v1470_v23  ;;  %1664 = vmatmul.bf16.vlgmr.msra.gmra.mxu0 %v8408_v45  ;;  %v2169_v34 = vmax.f32 %v1458_v29, 0.0  ;;  %1762 = vmatmul.bf16.vlgmr.msra.gmra.mxu2 %v8408_v45 }
 0x158   : > { %1713 = vmatmul.bf16.vlgmr.msra.gmra.mxu1 %v8410_v49 }
 0x159   : > { %1811 = vmatmul.bf16.vlgmr.msra.gmra.mxu3 %v8410_v49  ;;  %v8613_v50 = vpack.c.bf16 %v2169_v34, %v2161_v28  ;;  %v2050_v12 = vmax.f32 %v1519_v25, 0.0  ;;  %1903 = vmatpush.bf16.msrb.mxu1 %v6327_v22  ;;  %v7398_v25 = vld [vmem:[#allocation2 + $0x11c] sm:$0xf]  ;;  %v6294_v22 = vld [vmem:[#allocation2 + $0x318] sm:$0xf] }
 0x15a   : > { %v1567_v54 = vpop.f32.mrf.mxu2 }
 0x15b   : > { %10245 = vst [vmem:[#allocation21_spill] sm:$0xff] %v8613_v50  ;;  %v1568_v57 = vadd.f32 %v1567_v54, %v8610_v35  ;;  %v6043_v54 = vor.u32 %v7398_v25, %v6040_v43 }
 0x15c   : > { %v1616_v58 = vpop.f32.mrf.mxu3  ;;  %v1471_v60 = vpop.f32.mrf.mxu0 }
 0x15d   : > { %v1472_v62 = vadd.f32 %v1471_v60, %v8600_v9  ;;  %v1520_v63 = vpop.f32.mrf.mxu1  ;;  %v1617_v0 = vadd.f32 %v1616_v58, %v1568_v57  ;;  %v7462_v57 = vld [vmem:[#allocation2 + $0x31c] sm:$0xf]  ;;  %v6039_v60 = vor.u32 %v7402_v56, %v6038_v55  ;;  %1953 = vmatpush.bf16.msrb.mxu2 %v6043_v54 }
 0x15f   : > { %v1521_v1 = vadd.f32 %v1520_v63, %v1472_v62  ;;  %v2051_v39 = vmax.f32 %v1617_v0, 0.0  ;;  %1855 = vmatpush.bf16.msrb.mxu0 %v6039_v60 }
 0x161   : > { %v2058_v13 = vmax.f32 %v1521_v1, 0.0  ;;  %v6299_v1 = vor.u32 %v7462_v57, %v6296_v19  ;;  %v6006_v19 = vld [vmem:[#allocation2 + $0xd8] sm:$0xf] }
 0x162   : > { %v1569_v21 = vpop.f32.mrf.mxu2 }
 0x163   : > { %v8617_v20 = vpack.c.bf16 %v2058_v13, %v2050_v12  ;;  %v1570_v23 = vadd.f32 %v1569_v21, %v8610_v35  ;;  %2002 = vmatpush.bf16.msrb.mxu3 %v6299_v1  ;;  %v7466_v21 = vld [vmem:[#allocation2 + $0x334] sm:$0xf0] }
 0x164   : > { %v1618_v31 = vpop.f32.mrf.mxu3  ;;  %v1474_v29 = vpop.f32.mrf.mxu0 }
 0x165   : > { %v1475_v28 = vadd.f32 %v1474_v29, %v8600_v9  ;;  %v1523_v34 = vpop.f32.mrf.mxu1  ;;  %v1619_v30 = vadd.f32 %v1618_v31, %v1570_v23  ;;  %v6295_v29 = vor.u32 %v7466_v21, %v6294_v22 }
 0x167   : > { %v1524_v38 = vadd.f32 %v1523_v34, %v1475_v28  ;;  %1669 = vmatmul.bf16.gmra.mxu0 %v8420_v14  ;;  %v2059_v41 = vmax.f32 %v1619_v30, 0.0  ;;  %1767 = vmatmul.bf16.gmra.mxu2 %v8420_v14 }
 0x168   : > { %1718 = vmatmul.bf16.gmra.mxu1 %v8422_v15 }
 0x169   : > { %1816 = vmatmul.bf16.gmra.mxu3 %v8422_v15  ;;  %v8625_v44 = vpack.c.bf16 %v2059_v41, %v2051_v39  ;;  %v2066_v23 = vmax.f32 %v1524_v38, 0.0  ;;  %1904 = vmatpush.bf16.msrb.mxu1 %v6295_v29  ;;  %v7390_v38 = vld [vmem:[#allocation2 + $0xdc] sm:$0xf] }
 0x16a   : > { %v1572_v58 = vpop.f32.mrf.mxu2 }
 0x16b   : > { %v1573_v62 = vadd.f32 %v1572_v58, %v8610_v35  ;;  %v6008_v58 = vld [vmem:[#allocation2 + $0xf8] sm:$0xf0] }
 0x16c   : > { %v1621_v63 = vpop.f32.mrf.mxu3  ;;  %v1476_v0 = vpop.f32.mrf.mxu0  ;;  %v6011_v60 = vor.u32 %v7390_v38, %v6008_v58 }
 0x16d   : > { %v1477_v2 = vadd.f32 %v1476_v0, %v8600_v9  ;;  %v1525_v3 = vpop.f32.mrf.mxu1  ;;  %v1622_v12 = vadd.f32 %v1621_v63, %v1573_v62  ;;  %v7394_v62 = vld [vmem:[#allocation2 + $0xf4] sm:$0xf0]  ;;  %v7454_v63 = vld [vmem:[#allocation2 + $0x2dc] sm:$0xf] }
 0x16e   : > { %1954 = vmatpush.bf16.msrb.mxu2 %v6011_v60 }
 0x16f   : > { %v1526_v13 = vadd.f32 %v1525_v3, %v1477_v2  ;;  %v2067_v56 = vmax.f32 %v1622_v12, 0.0  ;;  %v6007_v2 = vor.u32 %v7394_v62, %v6006_v19  ;;  %v6264_v3 = vld [vmem:[#allocation2 + $0x2f8] sm:$0xf0] }
 0x170   : > { %v6267_v21 = vor.u32 %v7454_v63, %v6264_v3  ;;  %v5976_v3 = vld [vmem:[#allocation2 + $0xb8] sm:$0xf0] }
 0x171   : > { %v2074_v31 = vmax.f32 %v1526_v13, 0.0  ;;  %1856 = vmatpush.bf16.msrb.mxu0 %v6007_v2 }
 0x172   : > { %v1574_v28 = vpop.f32.mrf.mxu2  ;;  %2003 = vmatpush.bf16.msrb.mxu3 %v6267_v21  ;;  %v7446_v21 = vld [vmem:[#allocation2 + $0x29c] sm:$0xf] }
 0x173   : > { %v8629_v34 = vpack.c.bf16 %v2074_v31, %v2066_v23  ;;  %v1575_v30 = vadd.f32 %v1574_v28, %v8610_v35 }
 0x174   : > { %v1623_v39 = vpop.f32.mrf.mxu3  ;;  %v1479_v41 = vpop.f32.mrf.mxu0 }
 0x175   : > { %v1480_v25 = vadd.f32 %v1479_v41, %v8600_v9  ;;  %v1528_v43 = vpop.f32.mrf.mxu1  ;;  %v1624_v54 = vadd.f32 %v1623_v39, %v1575_v30  ;;  %v6262_v30 = vld [vmem:[#allocation2 + $0x2d8] sm:$0xf] }
 0x176   : > { %v7458_v39 = vld [vmem:[#allocation2 + $0x2f4] sm:$0xf0] }
 0x177   : > { %v1529_v55 = vadd.f32 %v1528_v43, %v1480_v25  ;;  %1674 = vmatmul.bf16.gmra.mxu0 %v8432_v32  ;;  %v2075_v57 = vmax.f32 %v1624_v54, 0.0  ;;  %1772 = vmatmul.bf16.gmra.mxu2 %v8432_v32  ;;  %v6263_v43 = vor.u32 %v7458_v39, %v6262_v30  ;;  %v6232_v30 = vld [vmem:[#allocation2 + $0x2b8] sm:$0xf0] }
 0x178   : > { %1723 = vmatmul.bf16.gmra.mxu1 %v8434_v33 }
 0x179   : > { %1821 = vmatmul.bf16.gmra.mxu3 %v8434_v33  ;;  %v8637_v0 = vpack.c.bf16 %v2075_v57, %v2067_v56  ;;  %v2082_v41 = vmax.f32 %v1529_v55, 0.0  ;;  %1905 = vmatpush.bf16.msrb.mxu1 %v6263_v43  ;;  %v7382_v55 = vld [vmem:[#allocation2 + $0x9c] sm:$0xf] }
 0x17a   : > { %v1577_v1 = vpop.f32.mrf.mxu2 }
 0x17b   : > { %v1578_v12 = vadd.f32 %v1577_v1, %v8610_v35 }
 0x17c   : > { %v1626_v13 = vpop.f32.mrf.mxu3  ;;  %v1481_v22 = vpop.f32.mrf.mxu0 }
 0x17d   : > { %v1482_v23 = vadd.f32 %v1481_v22, %v8600_v9  ;;  %v1530_v31 = vpop.f32.mrf.mxu1  ;;  %v1627_v29 = vadd.f32 %v1626_v13, %v1578_v12  ;;  %v5979_v12 = vor.u32 %v7382_v55, %v5976_v3  ;;  %v5974_v13 = vld [vmem:[#allocation2 + $0x98] sm:$0xf] }
 0x17e   : > { %v7386_v22 = vld [vmem:[#allocation2 + $0xb4] sm:$0xf0] }
 0x17f   : > { %v1531_v28 = vadd.f32 %v1530_v31, %v1482_v23  ;;  %v2083_v1 = vmax.f32 %v1627_v29, 0.0  ;;  %1955 = vmatpush.bf16.msrb.mxu2 %v5979_v12 }
 0x181   : > { %v2090_v25 = vmax.f32 %v1531_v28, 0.0  ;;  %v5975_v28 = vor.u32 %v7386_v22, %v5974_v13 }
 0x182   : > { %v1579_v54 = vpop.f32.mrf.mxu2 }
 0x183   : > { %v8641_v56 = vpack.c.bf16 %v2090_v25, %v2082_v41  ;;  %v1580_v57 = vadd.f32 %v1579_v54, %v8610_v35  ;;  %v6235_v25 = vor.u32 %v7446_v21, %v6232_v30  ;;  %1857 = vmatpush.bf16.msrb.mxu0 %v5975_v28 }
 0x184   : > { %v1628_v38 = vpop.f32.mrf.mxu3  ;;  %v1484_v58 = vpop.f32.mrf.mxu0 }
 0x185   : > { %v1485_v60 = vadd.f32 %v1484_v58, %v8600_v9  ;;  %v1533_v19 = vpop.f32.mrf.mxu1  ;;  %v1629_v62 = vadd.f32 %v1628_v38, %v1580_v57  ;;  %2004 = vmatpush.bf16.msrb.mxu3 %v6235_v25  ;;  %v6230_v58 = vld [vmem:[#allocation2 + $0x298] sm:$0xf] }
 0x186   : > { %v5942_v25 = vld [vmem:[#allocation2 + $0x58] sm:$0xf] }
 0x187   : > { %v1534_v63 = vadd.f32 %v1533_v19, %v1485_v60  ;;  %1679 = vmatmul.bf16.gmra.mxu0 %v8444_v52  ;;  %v2091_v2 = vmax.f32 %v1629_v62, 0.0  ;;  %1777 = vmatmul.bf16.gmra.mxu2 %v8444_v52  ;;  %v7450_v60 = vld [vmem:[#allocation2 + $0x2b4] sm:$0xf0] }
 0x188   : > { %1728 = vmatmul.bf16.gmra.mxu1 %v8446_v53 }
 0x189   : > { %1826 = vmatmul.bf16.gmra.mxu3 %v8446_v53  ;;  %v8649_v23 = vpack.c.bf16 %v2091_v2, %v2083_v1  ;;  %v2098_v19 = vmax.f32 %v1534_v63, 0.0  ;;  %v6231_v1 = vor.u32 %v7450_v60, %v6230_v58  ;;  %v7374_v63 = vld [vmem:[#allocation2 + $0x5c] sm:$0xf] }
 0x18a   : > { %v1582_v31 = vpop.f32.mrf.mxu2 }
 0x18b   : > { %v1583_v29 = vadd.f32 %v1582_v31, %v8610_v35  ;;  %1906 = vmatpush.bf16.msrb.mxu1 %v6231_v1 }
 0x18c   : > { %v1631_v39 = vpop.f32.mrf.mxu3  ;;  %v1486_v41 = vpop.f32.mrf.mxu0 }
 0x18d   : > { %v1487_v43 = vadd.f32 %v1486_v41, %v8600_v9  ;;  %v1535_v54 = vpop.f32.mrf.mxu1  ;;  %v1632_v57 = vadd.f32 %v1631_v39, %v1583_v29  ;;  %v5944_v39 = vld [vmem:[#allocation2 + $0x78] sm:$0xf0] }
 0x18e   : > { %v5947_v41 = vor.u32 %v7374_v63, %v5944_v39 }
 0x18f   : > { %v1536_v38 = vadd.f32 %v1535_v54, %v1487_v43  ;;  %v2099_v30 = vmax.f32 %v1632_v57, 0.0  ;;  %v7378_v43 = vld [vmem:[#allocation2 + $0x74] sm:$0xf0]  ;;  %v7438_v54 = vld [vmem:[#allocation2 + $0x25c] sm:$0xf] }
 0x190   : > { %v5943_v60 = vor.u32 %v7378_v43, %v5942_v25  ;;  %1956 = vmatpush.bf16.msrb.mxu2 %v5947_v41 }
 0x191   : > { %v2106_v62 = vmax.f32 %v1536_v38, 0.0 }
 0x192   : > { %v1584_v2 = vpop.f32.mrf.mxu2  ;;  %1858 = vmatpush.bf16.msrb.mxu0 %v5943_v60 }
 0x193   : > { %v8653_v55 = vpack.c.bf16 %v2106_v62, %v2098_v19  ;;  %v1585_v3 = vadd.f32 %v1584_v2, %v8610_v35  ;;  %v6200_v19 = vld [vmem:[#allocation2 + $0x278] sm:$0xf0] }
 0x194   : > { %v1633_v12 = vpop.f32.mrf.mxu3  ;;  %v1489_v13 = vpop.f32.mrf.mxu0  ;;  %v6203_v2 = vor.u32 %v7438_v54, %v6200_v19 }
 0x195   : > { %v1490_v22 = vadd.f32 %v1489_v13, %v8600_v9  ;;  %v1538_v21 = vpop.f32.mrf.mxu1  ;;  %v1634_v31 = vadd.f32 %v1633_v12, %v1585_v3 }
 0x196   : > { %2005 = vmatpush.bf16.msrb.mxu3 %v6203_v2  ;;  %v5912_v2 = vld [vmem:[#allocation2 + $0x38] sm:$0xf0] }
 0x197   : > { %v1539_v28 = vadd.f32 %v1538_v21, %v1490_v22  ;;  %1684 = vmatmul.bf16.gmra.mxu0 %v8456_v6  ;;  %v2107_v29 = vmax.f32 %v1634_v31, 0.0  ;;  %1782 = vmatmul.bf16.gmra.mxu2 %v8456_v6  ;;  %v6198_v21 = vld [vmem:[#allocation2 + $0x258] sm:$0xf] }
 0x198   : > { %1733 = vmatmul.bf16.gmra.mxu1 %v8458_v7  ;;  %v7442_v31 = vld [vmem:[#allocation2 + $0x274] sm:$0xf0] }
 0x199   : > { %1831 = vmatmul.bf16.gmra.mxu3 %v8458_v7  ;;  %v8661_v38 = vpack.c.bf16 %v2107_v29, %v2099_v30  ;;  %v2114_v30 = vmax.f32 %v1539_v28, 0.0  ;;  %v6199_v63 = vor.u32 %v7442_v31, %v6198_v21  ;;  %v7366_v28 = vld [vmem:[#allocation2 + $0x1c] sm:$0xf] }
 0x19a   : > { %v1587_v58 = vpop.f32.mrf.mxu2  ;;  %v7430_v21 = vld [vmem:[#allocation2 + $0x21c] sm:$0xf] }
 0x19b   : > { %v1588_v57 = vadd.f32 %v1587_v58, %v8610_v35  ;;  %1907 = vmatpush.bf16.msrb.mxu1 %v6199_v63  ;;  %v6168_v63 = vld [vmem:[#allocation2 + $0x238] sm:$0xf0] }
 0x19c   : > { %v1636_v62 = vpop.f32.mrf.mxu3  ;;  %v1491_v1 = vpop.f32.mrf.mxu0 }
 0x19d   : > { %v1492_v3 = vadd.f32 %v1491_v1, %v8600_v9  ;;  %v1540_v12 = vpop.f32.mrf.mxu1  ;;  %v1637_v13 = vadd.f32 %v1636_v62, %v1588_v57 }
 0x19f   : > { %v1541_v22 = vadd.f32 %v1540_v12, %v1492_v3  ;;  %v2115_v62 = vmax.f32 %v1637_v13, 0.0  ;;  %v5915_v3 = vor.u32 %v7366_v28, %v5912_v2  ;;  %v5910_v12 = vld [vmem:[#allocation2 + $0x18] sm:$0xf] }
 0x1a0   : > { %v6166_v28 = vld [vmem:[#allocation2 + $0x218] sm:$0xf] }
 0x1a1   : > { %v2122_v29 = vmax.f32 %v1541_v22, 0.0  ;;  %v7370_v22 = vld [vmem:[#allocation2 + $0x34] sm:$0xf0]  ;;  %1957 = vmatpush.bf16.msrb.mxu2 %v5915_v3 }
 0x1a2   : > { %v1589_v39 = vpop.f32.mrf.mxu2  ;;  %v7434_v2 = vld [vmem:[#allocation2 + $0x234] sm:$0xf0] }
 0x1a3   : > { %v8665_v25 = vpack.c.bf16 %v2122_v29, %v2114_v30  ;;  %v1590_v43 = vadd.f32 %v1589_v39, %v8610_v35  ;;  %v5911_v29 = vor.u32 %v7370_v22, %v5910_v12  ;;  %v6167_v50 = vor.u32 %v7434_v2, %v6166_v28 }
 0x1a4   : > { %v1638_v41 = vpop.f32.mrf.mxu3  ;;  %v1494_v54 = vpop.f32.mrf.mxu0 }
 0x1a5   : > { %v1495_v58 = vadd.f32 %v1494_v54, %v8600_v9  ;;  %v1543_v19 = vpop.f32.mrf.mxu1  ;;  %v1639_v60 = vadd.f32 %v1638_v41, %v1590_v43  ;;  %v6171_v41 = vor.u32 %v7430_v21, %v6168_v63  ;;  %1859 = vmatpush.bf16.msrb.mxu0 %v5911_v29  ;;  %1908 = vmatpush.bf16.msrb.mxu1 %v6167_v50  ;;  %v7514_v50 = vld [vmem:[%s10190_s3 + $0xb8] sm:$0xff] }
 0x1a6   : > { %2854 = vmatpush.bf16.msra.mxu2 %v7514_v50 }
 0x1a7   : > { %v1544_v57 = vadd.f32 %v1543_v19, %v1495_v58  ;;  %1689 = vmatmul.bf16.gmra.mxu0 %v8468_v26  ;;  %v2123_v1 = vmax.f32 %v1639_v60, 0.0  ;;  %1787 = vmatmul.bf16.gmra.mxu2 %v8468_v26 }
 0x1a8   : > { %1738 = vmatmul.bf16.gmra.mxu1 %v8470_v27  ;;  %2006 = vmatpush.bf16.msrb.mxu3 %v6171_v41 }
 0x1a9   : > { %1836 = vmatmul.bf16.gmra.mxu3 %v8470_v27  ;;  %v8673_v31 = vpack.c.bf16 %v2123_v1, %v2115_v62  ;;  %v2130_v62 = vmax.f32 %v1544_v57, 0.0  ;;  %v7498_v57 = vld [vmem:[%s10190_s3 + $0x38] sm:$0xff] }
 0x1aa   : > { %v1592_v30 = vpop.f32.mrf.mxu2  ;;  %2756 = vmatpush.bf16.msra.mxu0 %v7498_v57 }
 0x1ab   : > { %v1593_v13 = vadd.f32 %v1592_v30, %v8610_v35 }
 0x1ac   : > { %v1641_v39 = vpop.f32.mrf.mxu3  ;;  %v1496_v43 = vpop.f32.mrf.mxu0 }
 0x1ad   : > { %v1497_v54 = vadd.f32 %v1496_v43, %v8600_v9  ;;  %v1545_v58 = vpop.f32.mrf.mxu1  ;;  %v1642_v19 = vadd.f32 %v1641_v39, %v1593_v13 }
 0x1af   : > { %v1546_v60 = vadd.f32 %v1545_v58, %v1497_v54  ;;  %v2131_v39 = vmax.f32 %v1642_v19, 0.0  ;;  %v7522_v54 = vld [vmem:[%s10190_s3 + $0xf8] sm:$0xff] }
 0x1b0   : > { %2903 = vmatpush.bf16.msra.mxu3 %v7522_v54 }
 0x1b1   : > { %v2138_v1 = vmax.f32 %v1546_v60, 0.0 }
 0x1b2   : > { %v1594_v12 = vpop.f32.mrf.mxu2 }
 0x1b3   : > { %v8677_v22 = vpack.c.bf16 %v2138_v1, %v2130_v62  ;;  %v1595_v30 = vadd.f32 %v1594_v12, %v8610_v35 }
 0x1b4   : > { %v1643_v3 = vpop.f32.mrf.mxu3  ;;  %v1499_v21 = vpop.f32.mrf.mxu0 }
 0x1b5   : > { %v1500_v63 = vadd.f32 %v1499_v21, %v8600_v9  ;;  %v1548_v43 = vpop.f32.mrf.mxu1  ;;  %v1644_v29 = vadd.f32 %v1643_v3, %v1595_v30  ;;  %v7506_v3 = vld [vmem:[%s10190_s3 + $0x78] sm:$0xff] }
 0x1b6   : > { %2805 = vmatpush.bf16.msra.mxu1 %v7506_v3 }
 0x1b7   : > { %v1549_v13 = vadd.f32 %v1548_v43, %v1500_v63  ;;  %1694 = vmatmul.bf16.gmra.mxu0 %v8480_v47  ;;  %v2139_v41 = vmax.f32 %v1644_v29, 0.0  ;;  %1792 = vmatmul.bf16.gmra.mxu2 %v8480_v47 }
 0x1b8   : > { %1743 = vmatmul.bf16.gmra.mxu1 %v8482_v48 }
 0x1b9   : > { %1841 = vmatmul.bf16.gmra.mxu3 %v8482_v48  ;;  %v8694_v58 = vpack.c.bf16 %v2139_v41, %v2131_v39  ;;  %v2146_v21 = vmax.f32 %v1549_v13, 0.0  ;;  %v7513_v13 = vld [vmem:[%s10190_s3 + $0xb0] sm:$0xff] }
 0x1ba   : > { %v1597_v19 = vpop.f32.mrf.mxu2  ;;  %2855 = vmatpush.bf16.msra.mxu2 %v7513_v13 }
 0x1bb   : > { %v1598_v60 = vadd.f32 %v1597_v19, %v8610_v35 }
 0x1bc   : > { %v1646_v28 = vpop.f32.mrf.mxu3  ;;  %v1501_v2 = vpop.f32.mrf.mxu0 }
 0x1bd   : > { %v1502_v62 = vadd.f32 %v1501_v2, %v8600_v9  ;;  %v1550_v1 = vpop.f32.mrf.mxu1  ;;  %v1647_v12 = vadd.f32 %v1646_v28, %v1598_v60 }
 0x1bf   : > { %v1551_v30 = vadd.f32 %v1550_v1, %v1502_v62  ;;  %v2147_v28 = vmax.f32 %v1647_v12, 0.0  ;;  %v7497_v62 = vld [vmem:[%s10190_s3 + $0x30] sm:$0xff] }
 0x1c0   : > { %v7521_v1 = vld [vmem:[%s10190_s3 + $0xf0] sm:$0xff]  ;;  %2757 = vmatpush.bf16.msra.mxu0 %v7497_v62 }
 0x1c1   : > { %v2154_v63 = vmax.f32 %v1551_v30, 0.0  ;;  %2904 = vmatpush.bf16.msra.mxu3 %v7521_v1 }
 0x1c2   : > { %v1599_v43 = vpop.f32.mrf.mxu2 }
 0x1c3   : > { %v8701_v29 = vpack.c.bf16 %v2154_v63, %v2146_v21  ;;  %v1600_v39 = vadd.f32 %v1599_v43, %v8610_v35 }
 0x1c4   : > { %v1648_v41 = vpop.f32.mrf.mxu3  ;;  %v1504_v50 = vpop.f32.mrf.mxu0 }
 0x1c5   : > { %v1505_v57 = vadd.f32 %v1504_v50, %v8600_v9  ;;  %v1553_v54 = vpop.f32.mrf.mxu1  ;;  %v1649_v19 = vadd.f32 %v1648_v41, %v1600_v39 }
 0x1c7   : > { %v1554_v60 = vadd.f32 %v1553_v54, %v1505_v57  ;;  %1699 = vmatmul.bf16.gmra.mxu0 %v8492_v4  ;;  %v2155_v2 = vmax.f32 %v1649_v19, 0.0  ;;  %1797 = vmatmul.bf16.gmra.mxu2 %v8492_v4  ;;  %v7505_v57 = vld [vmem:[%s10190_s3 + $0x70] sm:$0xff] }
 0x1c8   : > { %1748 = vmatmul.bf16.gmra.mxu1 %v8494_v5 }
 0x1c9   : > { %1846 = vmatmul.bf16.gmra.mxu3 %v8494_v5  ;;  %v8718_v12 = vpack.c.bf16 %v2155_v2, %v2147_v28  ;;  %v2162_v54 = vmax.f32 %v1554_v60, 0.0  ;;  %v8725_v28 = vld [vmem:[#allocation5] sm:$0xff]  ;;  %2806 = vmatpush.bf16.msra.mxu1 %v7505_v57  ;;  %v7496_v57 = vld [vmem:[%s10190_s3 + $0x28] sm:$0xff] }
 0x1ca   : > { %v1602_v30 = vpop.f32.mrf.mxu2  ;;  %v8728_v2 = vperm.slane %v8725_v28, 4  ;;  %2758 = vmatpush.bf16.msra.mxu0 %v7496_v57 }
 0x1cb   : > { %v1603_v3 = vadd.f32 %v1602_v30, %v8610_v35 }
 0x1cc   : > { %v1651_v21 = vpop.f32.mrf.mxu3  ;;  %v1506_v63 = vpop.f32.mrf.mxu0 }
 0x1cd   : > { %v1507_v43 = vadd.f32 %v1506_v63, %v8600_v9  ;;  %v1555_v39 = vpop.f32.mrf.mxu1  ;;  %v1652_v41 = vadd.f32 %v1651_v21, %v1603_v3 }
 0x1cf   : > { %v1556_v50 = vadd.f32 %v1555_v39, %v1507_v43  ;;  %v2163_v60 = vmax.f32 %v1652_v41, 0.0  ;;  %v7520_v41 = vld [vmem:[%s10190_s3 + $0xe8] sm:$0xff] }
 0x1d0   : > { %2905 = vmatpush.bf16.msra.mxu3 %v7520_v41 }
 0x1d1   : > { %v2170_v19 = vmax.f32 %v1556_v50, 0.0  ;;  %v8738_v50 = vperm.slane %v8725_v28, 5 }
 0x1d2   : > { %v1604_v13 = vpop.f32.mrf.mxu2 }
 0x1d3   : > { %v8730_v62 = vpack.c.bf16 %v2170_v19, %v2162_v54  ;;  %v1605_v9 = vadd.f32 %v1604_v13, %v8610_v35  ;;  %v7512_v35 = vld [vmem:[%s10190_s3 + $0xa8] sm:$0xff] }
 0x1d4   : > { %v1653_v1 = vpop.f32.mrf.mxu3  ;;  %v1665_v30 = vpop.f32.mrf.mxu0  ;;  %2856 = vmatpush.bf16.msra.mxu2 %v7512_v35 }
 0x1d5   : > { %10246 = vst [vmem:[#allocation22_spill] sm:$0xff] %v8730_v62  ;;  %v1666_v3 = vadd.f32 %v1665_v30, %v8728_v2  ;;  %v1714_v21 = vpop.f32.mrf.mxu1  ;;  %v1654_v63 = vadd.f32 %v1653_v1, %v1605_v9 }
 0x1d7   : > { %v1715_v43 = vadd.f32 %v1714_v21, %v1666_v3  ;;  %1860 = vmatmul.bf16.vlgmr.msrb.gmra.mxu0 %v8408_v45  ;;  %v2171_v39 = vmax.f32 %v1654_v63, 0.0  ;;  %1958 = vmatmul.bf16.vlgmr.msrb.gmra.mxu2 %v8408_v45  ;;  %v7504_v21 = vld [vmem:[%s10190_s3 + $0x68] sm:$0xff] }
 0x1d8   : > { %1909 = vmatmul.bf16.vlgmr.msrb.gmra.mxu1 %v8410_v49 }
 0x1d9   : > { %2007 = vmatmul.bf16.vlgmr.msrb.gmra.mxu3 %v8410_v49  ;;  %v8750_v54 = vpack.c.bf16 %v2171_v39, %v2163_v60  ;;  %v2052_v63 = vmax.f32 %v1715_v43, 0.0  ;;  %2807 = vmatpush.bf16.msra.mxu1 %v7504_v21  ;;  %v7511_v43 = vld [vmem:[%s10190_s3 + $0xa0] sm:$0xff] }
 0x1da   : > { %v1763_v45 = vpop.f32.mrf.mxu2  ;;  %2857 = vmatpush.bf16.msra.mxu2 %v7511_v43 }
 0x1db   : > { %10247 = vst [vmem:[#allocation23_spill] sm:$0xff] %v8750_v54  ;;  %v1764_v19 = vadd.f32 %v1763_v45, %v8738_v50 }
 0x1dc   : > { %v1812_v49 = vpop.f32.mrf.mxu3  ;;  %v1667_v13 = vpop.f32.mrf.mxu0 }
 0x1dd   : > { %v1668_v9 = vadd.f32 %v1667_v13, %v8728_v2  ;;  %v1716_v1 = vpop.f32.mrf.mxu1  ;;  %v1813_v30 = vadd.f32 %v1812_v49, %v1764_v19 }
 0x1df   : > { %v1717_v3 = vadd.f32 %v1716_v1, %v1668_v9  ;;  %v2053_v49 = vmax.f32 %v1813_v30, 0.0  ;;  %v7519_v1 = vld [vmem:[%s10190_s3 + $0xe0] sm:$0xff] }
 0x1e0   : > { %2906 = vmatpush.bf16.msra.mxu3 %v7519_v1 }
 0x1e1   : > { %v2060_v60 = vmax.f32 %v1717_v3, 0.0 }
 0x1e2   : > { %v1765_v35 = vpop.f32.mrf.mxu2 }
 0x1e3   : > { %v8757_v39 = vpack.c.bf16 %v2060_v60, %v2052_v63  ;;  %v1766_v57 = vadd.f32 %v1765_v35, %v8738_v50 }
 0x1e4   : > { %v1814_v45 = vpop.f32.mrf.mxu3  ;;  %v1670_v54 = vpop.f32.mrf.mxu0 }
 0x1e5   : > { %v1671_v41 = vadd.f32 %v1670_v54, %v8728_v2  ;;  %v1719_v13 = vpop.f32.mrf.mxu1  ;;  %v1815_v62 = vadd.f32 %v1814_v45, %v1766_v57  ;;  %v7495_v54 = vld [vmem:[%s10190_s3 + $0x20] sm:$0xff] }
 0x1e6   : > { %2759 = vmatpush.bf16.msra.mxu0 %v7495_v54  ;;  %v7503_v57 = vld [vmem:[%s10190_s3 + $0x60] sm:$0xff] }
 0x1e7   : > { %v1720_v19 = vadd.f32 %v1719_v13, %v1671_v41  ;;  %1865 = vmatmul.bf16.gmra.mxu0 %v8420_v14  ;;  %v2061_v9 = vmax.f32 %v1815_v62, 0.0  ;;  %1963 = vmatmul.bf16.gmra.mxu2 %v8420_v14 }
 0x1e8   : > { %1914 = vmatmul.bf16.gmra.mxu1 %v8422_v15 }
 0x1e9   : > { %2012 = vmatmul.bf16.gmra.mxu3 %v8422_v15  ;;  %v8774_v30 = vpack.c.bf16 %v2061_v9, %v2053_v49  ;;  %v2068_v45 = vmax.f32 %v1720_v19, 0.0  ;;  %2808 = vmatpush.bf16.msra.mxu1 %v7503_v57  ;;  %v7510_v19 = vld [vmem:[%s10190_s3 + $0x98] sm:$0xff] }
 0x1ea   : > { %v1768_v62 = vpop.f32.mrf.mxu2  ;;  %2858 = vmatpush.bf16.msra.mxu2 %v7510_v19 }
 0x1eb   : > { %v1769_v14 = vadd.f32 %v1768_v62, %v8738_v50 }
 0x1ec   : > { %v1817_v15 = vpop.f32.mrf.mxu3  ;;  %v1672_v3 = vpop.f32.mrf.mxu0 }
 0x1ed   : > { %v1673_v21 = vadd.f32 %v1672_v3, %v8728_v2  ;;  %v1721_v63 = vpop.f32.mrf.mxu1  ;;  %v1818_v60 = vadd.f32 %v1817_v15, %v1769_v14 }
 0x1ef   : > { %v1722_v35 = vadd.f32 %v1721_v63, %v1673_v21  ;;  %v2069_v15 = vmax.f32 %v1818_v60, 0.0  ;;  %v7494_v63 = vld [vmem:[%s10190_s3 + $0x18] sm:$0xff] }
 0x1f0   : > { %2760 = vmatpush.bf16.msra.mxu0 %v7494_v63 }
 0x1f1   : > { %v2076_v41 = vmax.f32 %v1722_v35, 0.0  ;;  %v7518_v35 = vld [vmem:[%s10190_s3 + $0xd8] sm:$0xff] }
 0x1f2   : > { %v1770_v13 = vpop.f32.mrf.mxu2  ;;  %2907 = vmatpush.bf16.msra.mxu3 %v7518_v35 }
 0x1f3   : > { %v8781_v49 = vpack.c.bf16 %v2076_v41, %v2068_v45  ;;  %v1771_v9 = vadd.f32 %v1770_v13, %v8738_v50 }
 0x1f4   : > { %v1819_v43 = vpop.f32.mrf.mxu3  ;;  %v1675_v54 = vpop.f32.mrf.mxu0 }
 0x1f5   : > { %v1676_v1 = vadd.f32 %v1675_v54, %v8728_v2  ;;  %v1724_v62 = vpop.f32.mrf.mxu1  ;;  %v1820_v3 = vadd.f32 %v1819_v43, %v1771_v9  ;;  %v7502_v54 = vld [vmem:[%s10190_s3 + $0x58] sm:$0xff] }
 0x1f6   : > { %2809 = vmatpush.bf16.msra.mxu1 %v7502_v54 }
 0x1f7   : > { %v1725_v14 = vadd.f32 %v1724_v62, %v1676_v1  ;;  %1870 = vmatmul.bf16.gmra.mxu0 %v8432_v32  ;;  %v2077_v21 = vmax.f32 %v1820_v3, 0.0  ;;  %1968 = vmatmul.bf16.gmra.mxu2 %v8432_v32 }
 0x1f8   : > { %1919 = vmatmul.bf16.gmra.mxu1 %v8434_v33 }
 0x1f9   : > { %2017 = vmatmul.bf16.gmra.mxu3 %v8434_v33  ;;  %v8798_v60 = vpack.c.bf16 %v2077_v21, %v2069_v15  ;;  %v2084_v1 = vmax.f32 %v1725_v14, 0.0  ;;  %v7509_v14 = vld [vmem:[%s10190_s3 + $0x90] sm:$0xff] }
 0x1fa   : > { %v1773_v57 = vpop.f32.mrf.mxu2  ;;  %2859 = vmatpush.bf16.msra.mxu2 %v7509_v14 }
 0x1fb   : > { %v1774_v32 = vadd.f32 %v1773_v57, %v8738_v50 }
 0x1fc   : > { %v1822_v33 = vpop.f32.mrf.mxu3  ;;  %v1677_v45 = vpop.f32.mrf.mxu0 }
 0x1fd   : > { %v1678_v41 = vadd.f32 %v1677_v45, %v8728_v2  ;;  %v1726_v13 = vpop.f32.mrf.mxu1  ;;  %v1823_v9 = vadd.f32 %v1822_v33, %v1774_v32 }
 0x1ff   : > { %v1727_v43 = vadd.f32 %v1726_v13, %v1678_v41  ;;  %v2085_v33 = vmax.f32 %v1823_v9, 0.0  ;;  %v7493_v13 = vld [vmem:[%s10190_s3 + $0x10] sm:$0xff] }
 0x200   : > { %2761 = vmatpush.bf16.msra.mxu0 %v7493_v13 }
 0x201   : > { %v2092_v62 = vmax.f32 %v1727_v43, 0.0  ;;  %v7517_v43 = vld [vmem:[%s10190_s3 + $0xd0] sm:$0xff] }
 0x202   : > { %v1775_v3 = vpop.f32.mrf.mxu2  ;;  %2908 = vmatpush.bf16.msra.mxu3 %v7517_v43 }
 0x203   : > { %v8805_v15 = vpack.c.bf16 %v2092_v62, %v2084_v1  ;;  %v1776_v21 = vadd.f32 %v1775_v3, %v8738_v50 }
 0x204   : > { %v1824_v19 = vpop.f32.mrf.mxu3  ;;  %v1680_v63 = vpop.f32.mrf.mxu0 }
 0x205   : > { %v1681_v35 = vadd.f32 %v1680_v63, %v8728_v2  ;;  %v1729_v57 = vpop.f32.mrf.mxu1  ;;  %v1825_v45 = vadd.f32 %v1824_v19, %v1776_v21  ;;  %v7501_v63 = vld [vmem:[%s10190_s3 + $0x50] sm:$0xff] }
 0x206   : > { %2810 = vmatpush.bf16.msra.mxu1 %v7501_v63 }
 0x207   : > { %v1730_v32 = vadd.f32 %v1729_v57, %v1681_v35  ;;  %1875 = vmatmul.bf16.gmra.mxu0 %v8444_v52  ;;  %v2093_v41 = vmax.f32 %v1825_v45, 0.0  ;;  %1973 = vmatmul.bf16.gmra.mxu2 %v8444_v52 }
 0x208   : > { %1924 = vmatmul.bf16.gmra.mxu1 %v8446_v53 }
 0x209   : > { %2022 = vmatmul.bf16.gmra.mxu3 %v8446_v53  ;;  %v8822_v9 = vpack.c.bf16 %v2093_v41, %v2085_v33  ;;  %v2100_v35 = vmax.f32 %v1730_v32, 0.0  ;;  %v7508_v32 = vld [vmem:[%s10190_s3 + $0x88] sm:$0xff] }
 0x20a   : > { %v1778_v54 = vpop.f32.mrf.mxu2  ;;  %2860 = vmatpush.bf16.msra.mxu2 %v7508_v32 }
 0x20b   : > { %v1779_v52 = vadd.f32 %v1778_v54, %v8738_v50 }
 0x20c   : > { %v1827_v53 = vpop.f32.mrf.mxu3  ;;  %v1682_v1 = vpop.f32.mrf.mxu0 }
 0x20d   : > { %v1683_v62 = vadd.f32 %v1682_v1, %v8728_v2  ;;  %v1731_v3 = vpop.f32.mrf.mxu1  ;;  %v1828_v21 = vadd.f32 %v1827_v53, %v1779_v52 }
 0x20f   : > { %v1732_v19 = vadd.f32 %v1731_v3, %v1683_v62  ;;  %v2101_v53 = vmax.f32 %v1828_v21, 0.0  ;;  %v7492_v3 = vld [vmem:[%s10190_s3 + $0x8] sm:$0xff] }
 0x210   : > { %2762 = vmatpush.bf16.msra.mxu0 %v7492_v3 }
 0x211   : > { %v2108_v57 = vmax.f32 %v1732_v19, 0.0  ;;  %v7516_v19 = vld [vmem:[%s10190_s3 + $0xc8] sm:$0xff] }
 0x212   : > { %v1780_v45 = vpop.f32.mrf.mxu2  ;;  %2909 = vmatpush.bf16.msra.mxu3 %v7516_v19 }
 0x213   : > { %v8829_v33 = vpack.c.bf16 %v2108_v57, %v2100_v35  ;;  %v1781_v41 = vadd.f32 %v1780_v45, %v8738_v50 }
 0x214   : > { %v1829_v14 = vpop.f32.mrf.mxu3  ;;  %v1685_v13 = vpop.f32.mrf.mxu0 }
 0x215   : > { %v1686_v43 = vadd.f32 %v1685_v13, %v8728_v2  ;;  %v1734_v54 = vpop.f32.mrf.mxu1  ;;  %v1830_v1 = vadd.f32 %v1829_v14, %v1781_v41  ;;  %v7500_v13 = vld [vmem:[%s10190_s3 + $0x48] sm:$0xff] }
 0x216   : > { %2811 = vmatpush.bf16.msra.mxu1 %v7500_v13 }
 0x217   : > { %v1735_v52 = vadd.f32 %v1734_v54, %v1686_v43  ;;  %1880 = vmatmul.bf16.gmra.mxu0 %v8456_v6  ;;  %v2109_v62 = vmax.f32 %v1830_v1, 0.0  ;;  %1978 = vmatmul.bf16.gmra.mxu2 %v8456_v6 }
 0x218   : > { %1929 = vmatmul.bf16.gmra.mxu1 %v8458_v7 }
 0x219   : > { %2027 = vmatmul.bf16.gmra.mxu3 %v8458_v7  ;;  %v8846_v21 = vpack.c.bf16 %v2109_v62, %v2101_v53  ;;  %v2116_v43 = vmax.f32 %v1735_v52, 0.0  ;;  %v7507_v52 = vld [vmem:[%s10190_s3 + $0x80] sm:$0xff] }
 0x21a   : > { %v1783_v63 = vpop.f32.mrf.mxu2  ;;  %2861 = vmatpush.bf16.msra.mxu2 %v7507_v52 }
 0x21b   : > { %v1784_v6 = vadd.f32 %v1783_v63, %v8738_v50 }
 0x21c   : > { %v1832_v7 = vpop.f32.mrf.mxu3  ;;  %v1687_v35 = vpop.f32.mrf.mxu0 }
 0x21d   : > { %v1688_v57 = vadd.f32 %v1687_v35, %v8728_v2  ;;  %v1736_v45 = vpop.f32.mrf.mxu1  ;;  %v1833_v41 = vadd.f32 %v1832_v7, %v1784_v6 }
 0x21f   : > { %v1737_v14 = vadd.f32 %v1736_v45, %v1688_v57  ;;  %v2117_v7 = vmax.f32 %v1833_v41, 0.0  ;;  %v7491_v45 = vld [vmem:[%s10190_s3] sm:$0xff] }
 0x220   : > { %2763 = vmatpush.bf16.msra.mxu0 %v7491_v45 }
 0x221   : > { %v2124_v54 = vmax.f32 %v1737_v14, 0.0  ;;  %v7515_v14 = vld [vmem:[%s10190_s3 + $0xc0] sm:$0xff] }
 0x222   : > { %v1785_v1 = vpop.f32.mrf.mxu2  ;;  %2910 = vmatpush.bf16.msra.mxu3 %v7515_v14 }
 0x223   : > { %v8853_v53 = vpack.c.bf16 %v2124_v54, %v2116_v43  ;;  %v1786_v62 = vadd.f32 %v1785_v1, %v8738_v50 }
 0x224   : > { %v1834_v32 = vpop.f32.mrf.mxu3  ;;  %v1690_v3 = vpop.f32.mrf.mxu0 }
 0x225   : > { %v1691_v19 = vadd.f32 %v1690_v3, %v8728_v2  ;;  %v1739_v63 = vpop.f32.mrf.mxu1  ;;  %v1835_v35 = vadd.f32 %v1834_v32, %v1786_v62  ;;  %v7499_v3 = vld [vmem:[%s10190_s3 + $0x40] sm:$0xff] }
 0x226   : > { %2812 = vmatpush.bf16.msra.mxu1 %v7499_v3 }
 0x227   : > { %v1740_v6 = vadd.f32 %v1739_v63, %v1691_v19  ;;  %1885 = vmatmul.bf16.gmra.mxu0 %v8468_v26  ;;  %v2125_v57 = vmax.f32 %v1835_v35, 0.0  ;;  %1983 = vmatmul.bf16.gmra.mxu2 %v8468_v26 }
 0x228   : > { %1934 = vmatmul.bf16.gmra.mxu1 %v8470_v27 }
 0x229   : > { %2032 = vmatmul.bf16.gmra.mxu3 %v8470_v27  ;;  %v8870_v41 = vpack.c.bf16 %v2125_v57, %v2117_v7  ;;  %v2132_v19 = vmax.f32 %v1740_v6, 0.0  ;;  %v7546_v6 = vld [vmem:[%s10190_s3 + $0x1b8] sm:$0xff] }
 0x22a   : > { %v1788_v13 = vpop.f32.mrf.mxu2  ;;  %3050 = vmatpush.bf16.msrb.mxu2 %v7546_v6 }
 0x22b   : > { %v1789_v26 = vadd.f32 %v1788_v13, %v8738_v50 }
 0x22c   : > { %v1837_v27 = vpop.f32.mrf.mxu3  ;;  %v1692_v43 = vpop.f32.mrf.mxu0 }
 0x22d   : > { %v1693_v54 = vadd.f32 %v1692_v43, %v8728_v2  ;;  %v1741_v1 = vpop.f32.mrf.mxu1  ;;  %v1838_v62 = vadd.f32 %v1837_v27, %v1789_v26 }
 0x22f   : > { %v1742_v32 = vadd.f32 %v1741_v1, %v1693_v54  ;;  %v2133_v27 = vmax.f32 %v1838_v62, 0.0  ;;  %v7530_v1 = vld [vmem:[%s10190_s3 + $0x138] sm:$0xff] }
 0x230   : > { %2952 = vmatpush.bf16.msrb.mxu0 %v7530_v1 }
 0x231   : > { %v2140_v63 = vmax.f32 %v1742_v32, 0.0  ;;  %v7554_v32 = vld [vmem:[%s10190_s3 + $0x1f8] sm:$0xff] }
 0x232   : > { %v1790_v35 = vpop.f32.mrf.mxu2  ;;  %3099 = vmatpush.bf16.msrb.mxu3 %v7554_v32 }
 0x233   : > { %v8877_v7 = vpack.c.bf16 %v2140_v63, %v2132_v19  ;;  %v1791_v57 = vadd.f32 %v1790_v35, %v8738_v50 }
 0x234   : > { %v1839_v52 = vpop.f32.mrf.mxu3  ;;  %v1695_v45 = vpop.f32.mrf.mxu0 }
 0x235   : > { %v1696_v14 = vadd.f32 %v1695_v45, %v8728_v2  ;;  %v1744_v13 = vpop.f32.mrf.mxu1  ;;  %v1840_v43 = vadd.f32 %v1839_v52, %v1791_v57  ;;  %v7538_v45 = vld [vmem:[%s10190_s3 + $0x178] sm:$0xff] }
 0x236   : > { %3001 = vmatpush.bf16.msrb.mxu1 %v7538_v45 }
 0x237   : > { %v1745_v26 = vadd.f32 %v1744_v13, %v1696_v14  ;;  %1890 = vmatmul.bf16.gmra.mxu0 %v8480_v47  ;;  %v2141_v54 = vmax.f32 %v1840_v43, 0.0  ;;  %1988 = vmatmul.bf16.gmra.mxu2 %v8480_v47 }
 0x238   : > { %1939 = vmatmul.bf16.gmra.mxu1 %v8482_v48 }
 0x239   : > { %2037 = vmatmul.bf16.gmra.mxu3 %v8482_v48  ;;  %v8894_v62 = vpack.c.bf16 %v2141_v54, %v2133_v27  ;;  %v2148_v14 = vmax.f32 %v1745_v26, 0.0  ;;  %v7545_v26 = vld [vmem:[%s10190_s3 + $0x1b0] sm:$0xff] }
 0x23a   : > { %v1793_v3 = vpop.f32.mrf.mxu2  ;;  %3051 = vmatpush.bf16.msrb.mxu2 %v7545_v26 }
 0x23b   : > { %v1794_v47 = vadd.f32 %v1793_v3, %v8738_v50 }
 0x23c   : > { %v1842_v48 = vpop.f32.mrf.mxu3  ;;  %v1697_v19 = vpop.f32.mrf.mxu0 }
 0x23d   : > { %v1698_v63 = vadd.f32 %v1697_v19, %v8728_v2  ;;  %v1746_v35 = vpop.f32.mrf.mxu1  ;;  %v1843_v57 = vadd.f32 %v1842_v48, %v1794_v47 }
 0x23f   : > { %v1747_v52 = vadd.f32 %v1746_v35, %v1698_v63  ;;  %v2149_v48 = vmax.f32 %v1843_v57, 0.0  ;;  %v7529_v35 = vld [vmem:[%s10190_s3 + $0x130] sm:$0xff] }
 0x240   : > { %2953 = vmatpush.bf16.msrb.mxu0 %v7529_v35 }
 0x241   : > { %v2156_v13 = vmax.f32 %v1747_v52, 0.0  ;;  %v7553_v52 = vld [vmem:[%s10190_s3 + $0x1f0] sm:$0xff] }
 0x242   : > { %v1795_v43 = vpop.f32.mrf.mxu2  ;;  %3100 = vmatpush.bf16.msrb.mxu3 %v7553_v52 }
 0x243   : > { %v8901_v27 = vpack.c.bf16 %v2156_v13, %v2148_v14  ;;  %v1796_v54 = vadd.f32 %v1795_v43, %v8738_v50 }
 0x244   : > { %v1844_v6 = vpop.f32.mrf.mxu3  ;;  %v1700_v1 = vpop.f32.mrf.mxu0 }
 0x245   : > { %v1701_v32 = vadd.f32 %v1700_v1, %v8728_v2  ;;  %v1749_v3 = vpop.f32.mrf.mxu1  ;;  %v1845_v19 = vadd.f32 %v1844_v6, %v1796_v54  ;;  %v7537_v1 = vld [vmem:[%s10190_s3 + $0x170] sm:$0xff] }
 0x246   : > { %3002 = vmatpush.bf16.msrb.mxu1 %v7537_v1 }
 0x247   : > { %v1750_v47 = vadd.f32 %v1749_v3, %v1701_v32  ;;  %1895 = vmatmul.bf16.gmra.mxu0 %v8492_v4  ;;  %v2157_v63 = vmax.f32 %v1845_v19, 0.0  ;;  %1993 = vmatmul.bf16.gmra.mxu2 %v8492_v4  ;;  %v8926_v19 = vperm.slane %v8725_v28, 6 }
 0x248   : > { %1944 = vmatmul.bf16.gmra.mxu1 %v8494_v5 }
 0x249   : > { %2042 = vmatmul.bf16.gmra.mxu3 %v8494_v5  ;;  %v8918_v57 = vpack.c.bf16 %v2157_v63, %v2149_v48  ;;  %v2164_v32 = vmax.f32 %v1750_v47, 0.0 }
 0x24a   : > { %v1798_v45 = vpop.f32.mrf.mxu2 }
 0x24b   : > { %v1799_v14 = vadd.f32 %v1798_v45, %v8738_v50 }
 0x24c   : > { %v1847_v4 = vpop.f32.mrf.mxu3  ;;  %v1702_v13 = vpop.f32.mrf.mxu0 }
 0x24d   : > { %v1703_v5 = vadd.f32 %v1702_v13, %v8728_v2  ;;  %v1751_v43 = vpop.f32.mrf.mxu1  ;;  %v1848_v54 = vadd.f32 %v1847_v4, %v1799_v14 }
 0x24f   : > { %v1752_v6 = vadd.f32 %v1751_v43, %v1703_v5  ;;  %v2165_v47 = vmax.f32 %v1848_v54, 0.0  ;;  %v8936_v5 = vperm.slane %v8725_v28, 7  ;;  %v7528_v43 = vld [vmem:[%s10190_s3 + $0x128] sm:$0xff] }
 0x250   : > { %2954 = vmatpush.bf16.msrb.mxu0 %v7528_v43 }
 0x251   : > { %v2172_v3 = vmax.f32 %v1752_v6, 0.0 }
 0x252   : > { %v1800_v48 = vpop.f32.mrf.mxu2 }
 0x253   : > { %v8928_v63 = vpack.c.bf16 %v2172_v3, %v2164_v32  ;;  %v1801_v26 = vadd.f32 %v1800_v48, %v8738_v50  ;;  %v7544_v50 = vld [vmem:[%s10190_s3 + $0x1a8] sm:$0xff] }
 0x254   : > { %v1849_v2 = vpop.f32.mrf.mxu3  ;;  %v1861_v35 = vpop.f32.mrf.mxu0  ;;  %3052 = vmatpush.bf16.msrb.mxu2 %v7544_v50  ;;  %v7536_v48 = vld [vmem:[%s10190_s3 + $0x168] sm:$0xff] }
 0x255   : > { %v1862_v52 = vadd.f32 %v1861_v35, %v8926_v19  ;;  %v1910_v45 = vpop.f32.mrf.mxu1  ;;  %v1850_v14 = vadd.f32 %v1849_v2, %v1801_v26  ;;  %3003 = vmatpush.bf16.msrb.mxu1 %v7536_v48 }
 0x257   : > { %v1911_v4 = vadd.f32 %v1910_v45, %v1862_v52  ;;  %2764 = vmatmul.bf16.vlgmr.msra.gmra.mxu0 %v8515_v61  ;;  %v2173_v13 = vmax.f32 %v1850_v14, 0.0  ;;  %2862 = vmatmul.bf16.vlgmr.msra.gmra.mxu2 %v8617_v20  ;;  %v7552_v61 = vld [vmem:[%s10190_s3 + $0x1e8] sm:$0xff] }
 0x258   : > { %2813 = vmatmul.bf16.vlgmr.msra.gmra.mxu1 %v8523_v16  ;;  %3101 = vmatpush.bf16.msrb.mxu3 %v7552_v61 }
 0x259   : > { %2911 = vmatmul.bf16.vlgmr.msra.gmra.mxu3 %v8625_v44  ;;  %v8948_v16 = vpack.c.bf16 %v2173_v13, %v2165_v47  ;;  %v2054_v26 = vmax.f32 %v1911_v4, 0.0  ;;  %v7543_v4 = vld [vmem:[%s10190_s3 + $0x1a0] sm:$0xff] }
 0x25a   : > { %v1959_v20 = vpop.f32.mrf.mxu2  ;;  %3053 = vmatpush.bf16.msrb.mxu2 %v7543_v4 }
 0x25b   : > { %v1960_v28 = vadd.f32 %v1959_v20, %v8936_v5 }
 0x25c   : > { %v2008_v44 = vpop.f32.mrf.mxu3  ;;  %v1863_v54 = vpop.f32.mrf.mxu0 }
 0x25d   : > { %v1864_v6 = vadd.f32 %v1863_v54, %v8926_v19  ;;  %v1912_v1 = vpop.f32.mrf.mxu1  ;;  %v2009_v32 = vadd.f32 %v2008_v44, %v1960_v28  ;;  %v7527_v44 = vld [vmem:[%s10190_s3 + $0x120] sm:$0xff] }
 0x25e   : > { %2955 = vmatpush.bf16.msrb.mxu0 %v7527_v44 }
 0x25f   : > { %v1913_v3 = vadd.f32 %v1912_v1, %v1864_v6  ;;  %v2055_v20 = vmax.f32 %v2009_v32, 0.0 }
 0x261   : > { %v2062_v2 = vmax.f32 %v1913_v3, 0.0 }
 0x262   : > { %v1961_v52 = vpop.f32.mrf.mxu2 }
 0x263   : > { %v8955_v35 = vpack.c.bf16 %v2062_v2, %v2054_v26  ;;  %v1962_v45 = vadd.f32 %v1961_v52, %v8936_v5  ;;  %v7535_v26 = vld [vmem:[%s10190_s3 + $0x160] sm:$0xff] }
 0x264   : > { %v2010_v14 = vpop.f32.mrf.mxu3  ;;  %v1866_v47 = vpop.f32.mrf.mxu0  ;;  %3004 = vmatpush.bf16.msrb.mxu1 %v7535_v26 }
 0x265   : > { %v1867_v13 = vadd.f32 %v1866_v47, %v8926_v19  ;;  %v1915_v50 = vpop.f32.mrf.mxu1  ;;  %v2011_v43 = vadd.f32 %v2010_v14, %v1962_v45 }
 0x267   : > { %v1916_v61 = vadd.f32 %v1915_v50, %v1867_v13  ;;  %2769 = vmatmul.bf16.gmra.mxu0 %v8527_v46  ;;  %v2063_v28 = vmax.f32 %v2011_v43, 0.0  ;;  %2867 = vmatmul.bf16.gmra.mxu2 %v8629_v34  ;;  %v7551_v46 = vld [vmem:[%s10190_s3 + $0x1e0] sm:$0xff] }
 0x268   : > { %2818 = vmatmul.bf16.gmra.mxu1 %v8535_v8  ;;  %3102 = vmatpush.bf16.msrb.mxu3 %v7551_v46 }
 0x269   : > { %2916 = vmatmul.bf16.gmra.mxu3 %v8637_v0  ;;  %v8972_v54 = vpack.c.bf16 %v2063_v28, %v2055_v20  ;;  %v2070_v2 = vmax.f32 %v1916_v61, 0.0  ;;  %v7542_v61 = vld [vmem:[%s10190_s3 + $0x198] sm:$0xff] }
 0x26a   : > { %v1964_v6 = vpop.f32.mrf.mxu2  ;;  %3054 = vmatpush.bf16.msrb.mxu2 %v7542_v61 }
 0x26b   : > { %v1965_v8 = vadd.f32 %v1964_v6, %v8936_v5  ;;  %v7526_v6 = vld [vmem:[%s10190_s3 + $0x118] sm:$0xff] }
 0x26c   : > { %v2013_v34 = vpop.f32.mrf.mxu3  ;;  %v1868_v0 = vpop.f32.mrf.mxu0  ;;  %2956 = vmatpush.bf16.msrb.mxu0 %v7526_v6  ;;  %v7525_v6 = vld [vmem:[%s10190_s3 + $0x110] sm:$0xff] }
 0x26d   : > { %v1869_v1 = vadd.f32 %v1868_v0, %v8926_v19  ;;  %v1917_v32 = vpop.f32.mrf.mxu1  ;;  %v2014_v3 = vadd.f32 %v2013_v34, %v1965_v8 }
 0x26f   : > { %v1918_v48 = vadd.f32 %v1917_v32, %v1869_v1  ;;  %v2071_v44 = vmax.f32 %v2014_v3, 0.0 }
 0x270   : > { %2957 = vmatpush.bf16.msrb.mxu0 %v7525_v6 }
 0x271   : > { %v2078_v52 = vmax.f32 %v1918_v48, 0.0  ;;  %v7534_v48 = vld [vmem:[%s10190_s3 + $0x158] sm:$0xff] }
 0x272   : > { %v1966_v45 = vpop.f32.mrf.mxu2  ;;  %3005 = vmatpush.bf16.msrb.mxu1 %v7534_v48 }
 0x273   : > { %v8979_v14 = vpack.c.bf16 %v2078_v52, %v2070_v2  ;;  %v1967_v47 = vadd.f32 %v1966_v45, %v8936_v5 }
 0x274   : > { %v2015_v13 = vpop.f32.mrf.mxu3  ;;  %v1871_v50 = vpop.f32.mrf.mxu0 }
 0x275   : > { %v1872_v43 = vadd.f32 %v1871_v50, %v8926_v19  ;;  %v1920_v20 = vpop.f32.mrf.mxu1  ;;  %v2016_v28 = vadd.f32 %v2015_v13, %v1967_v47 }
 0x277   : > { %v1921_v4 = vadd.f32 %v1920_v20, %v1872_v43  ;;  %2774 = vmatmul.bf16.gmra.mxu0 %v8539_v36  ;;  %v2079_v46 = vmax.f32 %v2016_v28, 0.0  ;;  %2872 = vmatmul.bf16.gmra.mxu2 %v8641_v56  ;;  %v7550_v36 = vld [vmem:[%s10190_s3 + $0x1d8] sm:$0xff] }
 0x278   : > { %2823 = vmatmul.bf16.gmra.mxu1 %v8547_v59  ;;  %3103 = vmatpush.bf16.msrb.mxu3 %v7550_v36 }
 0x279   : > { %2921 = vmatmul.bf16.gmra.mxu3 %v8649_v23  ;;  %v8996_v8 = vpack.c.bf16 %v2079_v46, %v2071_v44  ;;  %v2086_v26 = vmax.f32 %v1921_v4, 0.0  ;;  %v7541_v4 = vld [vmem:[%s10190_s3 + $0x190] sm:$0xff] }
 0x27a   : > { %v1969_v34 = vpop.f32.mrf.mxu2  ;;  %3055 = vmatpush.bf16.msrb.mxu2 %v7541_v4 }
 0x27b   : > { %v1970_v59 = vadd.f32 %v1969_v34, %v8936_v5 }
 0x27c   : > { %v2018_v56 = vpop.f32.mrf.mxu3  ;;  %v1873_v23 = vpop.f32.mrf.mxu0 }
 0x27d   : > { %v1874_v0 = vadd.f32 %v1873_v23, %v8926_v19  ;;  %v1922_v1 = vpop.f32.mrf.mxu1  ;;  %v2019_v32 = vadd.f32 %v2018_v56, %v1970_v59 }
 0x27f   : > { %v1923_v3 = vadd.f32 %v1922_v1, %v1874_v0  ;;  %v2087_v46 = vmax.f32 %v2019_v32, 0.0  ;;  %v7533_v1 = vld [vmem:[%s10190_s3 + $0x150] sm:$0xff] }
 0x280   : > { %3006 = vmatpush.bf16.msrb.mxu1 %v7533_v1 }
 0x281   : > { %v2094_v2 = vmax.f32 %v1923_v3, 0.0 }
 0x282   : > { %v1971_v52 = vpop.f32.mrf.mxu2 }
 0x283   : > { %v9003_v45 = vpack.c.bf16 %v2094_v2, %v2086_v26  ;;  %v1972_v47 = vadd.f32 %v1971_v52, %v8936_v5 }
 0x284   : > { %v2020_v13 = vpop.f32.mrf.mxu3  ;;  %v1876_v50 = vpop.f32.mrf.mxu0 }
 0x285   : > { %v1877_v43 = vadd.f32 %v1876_v50, %v8926_v19  ;;  %v1925_v20 = vpop.f32.mrf.mxu1  ;;  %v2021_v28 = vadd.f32 %v2020_v13, %v1972_v47 }
 0x287   : > { %v1926_v44 = vadd.f32 %v1925_v20, %v1877_v43  ;;  %2779 = vmatmul.bf16.gmra.mxu0 %v8551_v24  ;;  %v2095_v61 = vmax.f32 %v2021_v28, 0.0  ;;  %2877 = vmatmul.bf16.gmra.mxu2 %v8653_v55  ;;  %v7549_v24 = vld [vmem:[%s10190_s3 + $0x1d0] sm:$0xff] }
 0x288   : > { %2828 = vmatmul.bf16.gmra.mxu1 %v8559_v51  ;;  %3104 = vmatpush.bf16.msrb.mxu3 %v7549_v24 }
 0x289   : > { %2926 = vmatmul.bf16.gmra.mxu3 %v8661_v38  ;;  %v9020_v36 = vpack.c.bf16 %v2095_v61, %v2087_v46  ;;  %v2102_v32 = vmax.f32 %v1926_v44, 0.0  ;;  %v7540_v44 = vld [vmem:[%s10190_s3 + $0x188] sm:$0xff] }
 0x28a   : > { %v1974_v34 = vpop.f32.mrf.mxu2  ;;  %v7524_v61 = vld [vmem:[%s10190_s3 + $0x108] sm:$0xff]  ;;  %3056 = vmatpush.bf16.msrb.mxu2 %v7540_v44 }
 0x28b   : > { %v1975_v51 = vadd.f32 %v1974_v34, %v8936_v5  ;;  %2958 = vmatpush.bf16.msrb.mxu0 %v7524_v61 }
 0x28c   : > { %v2023_v55 = vpop.f32.mrf.mxu3  ;;  %v1878_v38 = vpop.f32.mrf.mxu0 }
 0x28d   : > { %v1879_v59 = vadd.f32 %v1878_v38, %v8926_v19  ;;  %v1927_v56 = vpop.f32.mrf.mxu1  ;;  %v2024_v23 = vadd.f32 %v2023_v55, %v1975_v51  ;;  %v7532_v38 = vld [vmem:[%s10190_s3 + $0x148] sm:$0xff] }
 0x28e   : > { %3007 = vmatpush.bf16.msrb.mxu1 %v7532_v38 }
 0x28f   : > { %v1928_v0 = vadd.f32 %v1927_v56, %v1879_v59  ;;  %v2103_v28 = vmax.f32 %v2024_v23, 0.0 }
 0x291   : > { %v2110_v3 = vmax.f32 %v1928_v0, 0.0 }
 0x292   : > { %v1976_v48 = vpop.f32.mrf.mxu2 }
 0x293   : > { %v9027_v26 = vpack.c.bf16 %v2110_v3, %v2102_v32  ;;  %v1977_v2 = vadd.f32 %v1976_v48, %v8936_v5 }
 0x294   : > { %v2025_v52 = vpop.f32.mrf.mxu3  ;;  %v1881_v47 = vpop.f32.mrf.mxu0 }
 0x295   : > { %v1882_v13 = vadd.f32 %v1881_v47, %v8926_v19  ;;  %v1930_v50 = vpop.f32.mrf.mxu1  ;;  %v2026_v43 = vadd.f32 %v2025_v52, %v1977_v2 }
 0x297   : > { %v1931_v20 = vadd.f32 %v1930_v50, %v1882_v13  ;;  %2784 = vmatmul.bf16.gmra.mxu0 %v8563_v17  ;;  %v2111_v46 = vmax.f32 %v2026_v43, 0.0  ;;  %2882 = vmatmul.bf16.gmra.mxu2 %v8665_v25  ;;  %v7548_v17 = vld [vmem:[%s10190_s3 + $0x1c8] sm:$0xff]  ;;  %v7539_v43 = vld [vmem:[%s10190_s3 + $0x180] sm:$0xff] }
 0x298   : > { %2833 = vmatmul.bf16.gmra.mxu1 %v8571_v42  ;;  %3105 = vmatpush.bf16.msrb.mxu3 %v7548_v17 }
 0x299   : > { %2931 = vmatmul.bf16.gmra.mxu3 %v8673_v31  ;;  %v9044_v4 = vpack.c.bf16 %v2111_v46, %v2103_v28  ;;  %v2118_v59 = vmax.f32 %v1931_v20, 0.0  ;;  %v7523_v20 = vld [vmem:[%s10190_s3 + $0x100] sm:$0xff]  ;;  %3057 = vmatpush.bf16.msrb.mxu2 %v7539_v43 }
 0x29a   : > { %v1979_v6 = vpop.f32.mrf.mxu2  ;;  %2959 = vmatpush.bf16.msrb.mxu0 %v7523_v20 }
 0x29b   : > { %v1980_v42 = vadd.f32 %v1979_v6, %v8936_v5 }
 0x29c   : > { %v2028_v25 = vpop.f32.mrf.mxu3  ;;  %v1883_v31 = vpop.f32.mrf.mxu0 }
 0x29d   : > { %v1884_v24 = vadd.f32 %v1883_v31, %v8926_v19  ;;  %v1932_v34 = vpop.f32.mrf.mxu1  ;;  %v2029_v51 = vadd.f32 %v2028_v25, %v1980_v42  ;;  %v7531_v42 = vld [vmem:[%s10190_s3 + $0x140] sm:$0xff] }
 0x29e   : > { %3008 = vmatpush.bf16.msrb.mxu1 %v7531_v42 }
 0x29f   : > { %v1933_v55 = vadd.f32 %v1932_v34, %v1884_v24  ;;  %v2119_v13 = vmax.f32 %v2029_v51, 0.0 }
 0x2a1   : > { %v2126_v56 = vmax.f32 %v1933_v55, 0.0 }
 0x2a2   : > { %v1981_v23 = vpop.f32.mrf.mxu2 }
 0x2a3   : > { %v9051_v0 = vpack.c.bf16 %v2126_v56, %v2118_v59  ;;  %v1982_v1 = vadd.f32 %v1981_v23, %v8936_v5 }
 0x2a4   : > { %v2030_v32 = vpop.f32.mrf.mxu3  ;;  %v1886_v3 = vpop.f32.mrf.mxu0 }
 0x2a5   : > { %v1887_v48 = vadd.f32 %v1886_v3, %v8926_v19  ;;  %v1935_v2 = vpop.f32.mrf.mxu1  ;;  %v2031_v52 = vadd.f32 %v2030_v32, %v1982_v1 }
 0x2a7   : > { %v1936_v47 = vadd.f32 %v1935_v2, %v1887_v48  ;;  %2789 = vmatmul.bf16.gmra.mxu0 %v8575_v11  ;;  %v2127_v50 = vmax.f32 %v2031_v52, 0.0  ;;  %2887 = vmatmul.bf16.gmra.mxu2 %v8677_v22  ;;  %v7547_v11 = vld [vmem:[%s10190_s3 + $0x1c0] sm:$0xff] }
 0x2a8   : > { %2838 = vmatmul.bf16.gmra.mxu1 %v8583_v40  ;;  %3106 = vmatpush.bf16.msrb.mxu3 %v7547_v11 }
 0x2a9   : > { %2936 = vmatmul.bf16.gmra.mxu3 %v8694_v58  ;;  %v9068_v28 = vpack.c.bf16 %v2127_v50, %v2119_v13  ;;  %v2134_v25 = vmax.f32 %v1936_v47, 0.0 }
 0x2aa   : > { %v1984_v46 = vpop.f32.mrf.mxu2 }
 0x2ab   : > { %v1985_v40 = vadd.f32 %v1984_v46, %v8936_v5 }
 0x2ac   : > { %v2033_v22 = vpop.f32.mrf.mxu3  ;;  %v1888_v58 = vpop.f32.mrf.mxu0 }
 0x2ad   : > { %v1889_v44 = vadd.f32 %v1888_v58, %v8926_v19  ;;  %v1937_v61 = vpop.f32.mrf.mxu1  ;;  %v2034_v17 = vadd.f32 %v2033_v22, %v1985_v40 }
 0x2af   : > { %v1938_v6 = vadd.f32 %v1937_v61, %v1889_v44  ;;  %v2135_v32 = vmax.f32 %v2034_v17, 0.0 }
 0x2b1   : > { %v2142_v31 = vmax.f32 %v1938_v6, 0.0 }
 0x2b2   : > { %v1986_v24 = vpop.f32.mrf.mxu2 }
 0x2b3   : > { %v9075_v34 = vpack.c.bf16 %v2142_v31, %v2134_v25  ;;  %v1987_v51 = vadd.f32 %v1986_v24, %v8936_v5  ;;  %v10248_v25 = vld [vmem:[#allocation21_spill] sm:$0xff]  ;;  %v10249_v31 = vld [vmem:[#allocation22_spill] sm:$0xff]  ;;  %v10250_v24 = vld [vmem:[#allocation23_spill] sm:$0xff] }
 0x2b4   : > { %v2035_v55 = vpop.f32.mrf.mxu3  ;;  %v1891_v38 = vpop.f32.mrf.mxu0 }
 0x2b5   : > { %v1892_v59 = vadd.f32 %v1891_v38, %v8926_v19  ;;  %v1940_v56 = vpop.f32.mrf.mxu1  ;;  %v2036_v23 = vadd.f32 %v2035_v55, %v1987_v51  ;;  %v6758_v51 = vld [vmem:[%s10192_s5 + $0xc8] sm:$0xf] }
 0x2b6   : > { %v7584_v55 = vld [vmem:[%s10192_s5 + $0xe4] sm:$0xf0] }
 0x2b7   : > { %v1941_v1 = vadd.f32 %v1940_v56, %v1892_v59  ;;  %2794 = vmatmul.bf16.gmra.mxu0 %v8587_v10  ;;  %v2143_v3 = vmax.f32 %v2036_v23, 0.0  ;;  %2892 = vmatmul.bf16.gmra.mxu2 %v8701_v29  ;;  %v6759_v38 = vor.u32 %v7584_v55, %v6758_v51 }
 0x2b8   : > { %2843 = vmatmul.bf16.gmra.mxu1 %v8595_v37 }
 0x2b9   : > { %2941 = vmatmul.bf16.gmra.mxu3 %v8718_v12  ;;  %v9083_v48 = vpack.c.bf16 %v2143_v3, %v2135_v32  ;;  %v2150_v11 = vmax.f32 %v1941_v1, 0.0  ;;  %3493 = vmatpush.bf16.msra.mxu2 %v6759_v38 }
 0x2ba   : > { %v1989_v2 = vpop.f32.mrf.mxu2 }
 0x2bb   : > { %v1990_v52 = vadd.f32 %v1989_v2, %v8936_v5 }
 0x2bc   : > { %v2038_v47 = vpop.f32.mrf.mxu3  ;;  %v1893_v13 = vpop.f32.mrf.mxu0 }
 0x2bd   : > { %v1894_v50 = vadd.f32 %v1893_v13, %v8926_v19  ;;  %v1942_v43 = vpop.f32.mrf.mxu1  ;;  %v2039_v20 = vadd.f32 %v2038_v47, %v1990_v52  ;;  %v6750_v52 = vld [vmem:[%s10192_s5 + $0xc0] sm:$0xf]  ;;  %v7580_v13 = vld [vmem:[%s10192_s5 + $0xcc] sm:$0xf] }
 0x2be   : > { %v7583_v47 = vld [vmem:[%s10192_s5 + $0xdc] sm:$0xf0] }
 0x2bf   : > { %v1943_v10 = vadd.f32 %v1942_v43, %v1894_v50  ;;  %v2151_v6 = vmax.f32 %v2039_v20, 0.0  ;;  %v6751_v43 = vor.u32 %v7583_v47, %v6750_v52  ;;  %v7579_v20 = vld [vmem:[%s10192_s5 + $0xc4] sm:$0xf] }
 0x2c1   : > { %v2158_v46 = vmax.f32 %v1943_v10, 0.0  ;;  %v6752_v10 = vld [vmem:[%s10192_s5 + $0xe0] sm:$0xf0]  ;;  %3395 = vmatpush.bf16.msra.mxu0 %v6751_v43  ;;  %v7576_v43 = vld [vmem:[%s10192_s5 + $0xa4] sm:$0xf0] }
 0x2c2   : > { %v1991_v40 = vpop.f32.mrf.mxu2 }
 0x2c3   : > { %v9087_v37 = vpack.c.bf16 %v2158_v46, %v2150_v11  ;;  %v1992_v29 = vadd.f32 %v1991_v40, %v8936_v5  ;;  %v6755_v46 = vor.u32 %v7579_v20, %v6752_v10 }
 0x2c4   : > { %v2040_v12 = vpop.f32.mrf.mxu3  ;;  %v1896_v22 = vpop.f32.mrf.mxu0 }
 0x2c5   : > { %v1897_v58 = vadd.f32 %v1896_v22, %v8926_v19  ;;  %v1945_v44 = vpop.f32.mrf.mxu1  ;;  %v2041_v61 = vadd.f32 %v2040_v12, %v1992_v29  ;;  %v9123_v12 = vld [vmem:[#allocation7] ss:$0 sm:$0xff]  ;;  %3444 = vmatpush.bf16.msra.mxu1 %v6755_v46 }
 0x2c7   : > { %v1946_v17 = vadd.f32 %v1945_v44, %v1897_v58  ;;  %2799 = vmatmul.bf16.gmra.mxu0 %v8602_v18  ;;  %v2159_v42 = vmax.f32 %v2041_v61, 0.0  ;;  %2897 = vmatmul.bf16.gmra.mxu2 %v10249_v31 }
 0x2c8   : > { %2848 = vmatmul.bf16.gmra.mxu1 %v10248_v25 }
 0x2c9   : > { %2946 = vmatmul.bf16.gmra.mxu3 %v10250_v24  ;;  %v9101_v59 = vpack.c.bf16 %v2159_v42, %v2151_v6  ;;  %v2166_v40 = vmax.f32 %v1946_v17, 0.0 }
 0x2ca   : > { %v1994_v18 = vpop.f32.mrf.mxu2 }
 0x2cb   : > { %v1995_v56 = vadd.f32 %v1994_v18, %v8936_v5 }
 0x2cc   : > { %v2043_v23 = vpop.f32.mrf.mxu3  ;;  %v1898_v1 = vpop.f32.mrf.mxu0 }
 0x2cd   : > { %v1899_v32 = vadd.f32 %v1898_v1, %v8926_v19  ;;  %v1947_v3 = vpop.f32.mrf.mxu1  ;;  %v2044_v2 = vadd.f32 %v2043_v23, %v1995_v56  ;;  %v6760_v19 = vld [vmem:[%s10192_s5 + $0xe8] sm:$0xf0] }
 0x2ce   : > { %v6763_v11 = vor.u32 %v7580_v13, %v6760_v19 }
 0x2cf   : > { %v1948_v50 = vadd.f32 %v1947_v3, %v1899_v32  ;;  %v2167_v17 = vmax.f32 %v2044_v2, 0.0 }
 0x2d0   : > { %3542 = vmatpush.bf16.msra.mxu3 %v6763_v11 }
 0x2d1   : > { %v2174_v29 = vmax.f32 %v1948_v50, 0.0  ;;  %v6726_v50 = vld [vmem:[%s10192_s5 + $0x88] sm:$0xf] }
 0x2d2   : > { %v1996_v22 = vpop.f32.mrf.mxu2  ;;  %v6727_v19 = vor.u32 %v7576_v43, %v6726_v50 }
 0x2d3   : > { %v9125_v58 = vpack.c.bf16 %v2174_v29, %v2166_v40  ;;  %v1997_v44 = vadd.f32 %v1996_v22, %v8936_v5  ;;  %v7575_v40 = vld [vmem:[%s10192_s5 + $0x9c] sm:$0xf0]  ;;  %v7572_v29 = vld [vmem:[%s10192_s5 + $0x8c] sm:$0xf] }
 0x2d4   : > { %v2045_v61 = vpop.f32.mrf.mxu3  ;;  %v2765_v6 = vpop.f32.mrf.mxu0  ;;  %3494 = vmatpush.bf16.msra.mxu2 %v6727_v19 }
 0x2d5   : > { %v2766_v42 = vadd.f32 %v9123_v12, %v2765_v6  ;;  %v2814_v25 = vpop.f32.mrf.mxu1  ;;  %v2046_v31 = vadd.f32 %v2045_v61, %v1997_v44  ;;  %v6728_v61 = vld [vmem:[%s10192_s5 + $0xa8] sm:$0xf0]  ;;  %v7571_v6 = vld [vmem:[%s10192_s5 + $0x84] sm:$0xf] }
 0x2d7   : > { %v2815_v24 = vadd.f32 %v2814_v25, %v2766_v42  ;;  %2960 = vmatmul.bf16.vlgmr.msrb.gmra.mxu0 %v8757_v39  ;;  %v2175_v51 = vmax.f32 %v2046_v31, 0.0  ;;  %3058 = vmatmul.bf16.vlgmr.msrb.gmra.mxu2 %v8955_v35  ;;  %v6720_v42 = vld [vmem:[%s10192_s5 + $0xa0] sm:$0xf0]  ;;  %v6731_v25 = vor.u32 %v7572_v29, %v6728_v61  ;;  %v7564_v29 = vld [vmem:[%s10192_s5 + $0x4c] sm:$0xf] }
 0x2d8   : > { %3009 = vmatmul.bf16.vlgmr.msrb.gmra.mxu1 %v8774_v30  ;;  %v6723_v31 = vor.u32 %v7571_v6, %v6720_v42  ;;  %v6696_v61 = vld [vmem:[%s10192_s5 + $0x68] sm:$0xf0]  ;;  %v7563_v6 = vld [vmem:[%s10192_s5 + $0x44] sm:$0xf] }
 0x2d9   : > { %3107 = vmatmul.bf16.vlgmr.msrb.gmra.mxu3 %v8972_v54  ;;  %v9133_v55 = vpack.c.bf16 %v2175_v51, %v2167_v17  ;;  %v6688_v42 = vld [vmem:[%s10192_s5 + $0x60] sm:$0xf0] }
 0x2da   : > { %v2863_v5 = vpop.f32.mrf.mxu2  ;;  %3543 = vmatpush.bf16.msra.mxu3 %v6731_v25  ;;  %3445 = vmatpush.bf16.msra.mxu1 %v6723_v31  ;;  %v6699_v25 = vor.u32 %v7564_v29, %v6696_v61  ;;  %v6691_v31 = vor.u32 %v7563_v6, %v6688_v42 }
 0x2db   : > { %v2864_v38 = vadd.f32 %v2863_v5, %v2815_v24 }
 0x2dc   : > { %v2912_v18 = vpop.f32.mrf.mxu3  ;;  %v2767_v56 = vpop.f32.mrf.mxu0 }
 0x2dd   : > { %v2768_v23 = vadd.f32 %v9123_v12, %v2767_v56  ;;  %v2816_v1 = vpop.f32.mrf.mxu1  ;;  %v9136_v32 = vadd.f32 %v2912_v18, %v2864_v38 }
 0x2de   : > { %3544 = vmatpush.bf16.msra.mxu3 %v6699_v25  ;;  %3446 = vmatpush.bf16.msra.mxu1 %v6691_v31 }
 0x2df   : > { %v2817_v39 = vadd.f32 %v2816_v1, %v2768_v23 }
 0x2e2   : > { %v2865_v3 = vpop.f32.mrf.mxu2 }
 0x2e3   : > { %v2866_v2 = vadd.f32 %v2865_v3, %v2817_v39 }
 0x2e4   : > { %v2914_v52 = vpop.f32.mrf.mxu3  ;;  %v2770_v30 = vpop.f32.mrf.mxu0 }
 0x2e5   : > { %v2771_v35 = vadd.f32 %v9123_v12, %v2770_v30  ;;  %v2819_v47 = vpop.f32.mrf.mxu1  ;;  %v9139_v54 = vadd.f32 %v2914_v52, %v2866_v2 }
 0x2e7   : > { %v2820_v13 = vadd.f32 %v2819_v47, %v2771_v35  ;;  %2965 = vmatmul.bf16.gmra.mxu0 %v8781_v49  ;;  %3063 = vmatmul.bf16.gmra.mxu2 %v8979_v14 }
 0x2e8   : > { %3014 = vmatmul.bf16.gmra.mxu1 %v8798_v60 }
 0x2e9   : > { %3112 = vmatmul.bf16.gmra.mxu3 %v8996_v8  ;;  %v6718_v8 = vld [vmem:[%s10192_s5 + $0x80] sm:$0xf] }
 0x2ea   : > { %v2868_v20 = vpop.f32.mrf.mxu2  ;;  %v6719_v44 = vor.u32 %v7575_v40, %v6718_v8  ;;  %v7567_v40 = vld [vmem:[%s10192_s5 + $0x5c] sm:$0xf0] }
 0x2eb   : > { %v2869_v10 = vadd.f32 %v2868_v20, %v2820_v13  ;;  %v6694_v20 = vld [vmem:[%s10192_s5 + $0x48] sm:$0xf] }
 0x2ec   : > { %v2917_v11 = vpop.f32.mrf.mxu3  ;;  %v2772_v46 = vpop.f32.mrf.mxu0  ;;  %3396 = vmatpush.bf16.msra.mxu0 %v6719_v44 }
 0x2ed   : > { %v2773_v49 = vadd.f32 %v9123_v12, %v2772_v46  ;;  %v2821_v60 = vpop.f32.mrf.mxu1  ;;  %v9152_v14 = vadd.f32 %v2917_v11, %v2869_v10  ;;  %v7568_v10 = vld [vmem:[%s10192_s5 + $0x64] sm:$0xf0] }
 0x2ee   : > { %v6695_v11 = vor.u32 %v7568_v10, %v6694_v20 }
 0x2ef   : > { %v2822_v22 = vadd.f32 %v2821_v60, %v2773_v49 }
 0x2f0   : > { %3495 = vmatpush.bf16.msra.mxu2 %v6695_v11  ;;  %v7556_v11 = vld [vmem:[%s10192_s5 + $0xc] sm:$0xf] }
 0x2f2   : > { %v2870_v24 = vpop.f32.mrf.mxu2 }
 0x2f3   : > { %v2871_v17 = vadd.f32 %v2870_v24, %v2822_v22 }
 0x2f4   : > { %v2919_v51 = vpop.f32.mrf.mxu3  ;;  %v2775_v5 = vpop.f32.mrf.mxu0 }
 0x2f5   : > { %v2776_v38 = vadd.f32 %v9123_v12, %v2775_v5  ;;  %v2824_v18 = vpop.f32.mrf.mxu1  ;;  %v9173_v56 = vadd.f32 %v2919_v51, %v2871_v17 }
 0x2f7   : > { %v2825_v23 = vadd.f32 %v2824_v18, %v2776_v38  ;;  %2970 = vmatmul.bf16.gmra.mxu0 %v8805_v15  ;;  %3068 = vmatmul.bf16.gmra.mxu2 %v9003_v45 }
 0x2f8   : > { %3019 = vmatmul.bf16.gmra.mxu1 %v8822_v9 }
 0x2f9   : > { %3117 = vmatmul.bf16.gmra.mxu3 %v9020_v36 }
 0x2fa   : > { %v2873_v1 = vpop.f32.mrf.mxu2 }
 0x2fb   : > { %v2874_v39 = vadd.f32 %v2873_v1, %v2825_v23 }
 0x2fc   : > { %v2922_v3 = vpop.f32.mrf.mxu3  ;;  %v2777_v2 = vpop.f32.mrf.mxu0 }
 0x2fd   : > { %v2778_v52 = vadd.f32 %v9123_v12, %v2777_v2  ;;  %v2826_v30 = vpop.f32.mrf.mxu1  ;;  %v9180_v35 = vadd.f32 %v2922_v3, %v2874_v39 }
 0x2ff   : > { %v2827_v47 = vadd.f32 %v2826_v30, %v2778_v52 }
 0x302   : > { %v2875_v13 = vpop.f32.mrf.mxu2 }
 0x303   : > { %v2876_v50 = vadd.f32 %v2875_v13, %v2827_v47 }
 0x304   : > { %v2924_v43 = vpop.f32.mrf.mxu3  ;;  %v2780_v15 = vpop.f32.mrf.mxu0 }
 0x305   : > { %v2781_v9 = vadd.f32 %v9123_v12, %v2780_v15  ;;  %v2829_v19 = vpop.f32.mrf.mxu1  ;;  %v9183_v45 = vadd.f32 %v2924_v43, %v2876_v50  ;;  %v7560_v15 = vld [vmem:[%s10192_s5 + $0x24] sm:$0xf0] }
 0x307   : > { %v2830_v36 = vadd.f32 %v2829_v19, %v2781_v9  ;;  %2975 = vmatmul.bf16.gmra.mxu0 %v8829_v33  ;;  %3073 = vmatmul.bf16.gmra.mxu2 %v9027_v26 }
 0x308   : > { %3024 = vmatmul.bf16.gmra.mxu1 %v8846_v21 }
 0x309   : > { %3122 = vmatmul.bf16.gmra.mxu3 %v9044_v4  ;;  %v6686_v4 = vld [vmem:[%s10192_s5 + $0x40] sm:$0xf] }
 0x30a   : > { %v2878_v46 = vpop.f32.mrf.mxu2  ;;  %v6687_v44 = vor.u32 %v7567_v40, %v6686_v4 }
 0x30b   : > { %v2879_v49 = vadd.f32 %v2878_v46, %v2830_v36 }
 0x30c   : > { %v2927_v60 = vpop.f32.mrf.mxu3  ;;  %v2782_v8 = vpop.f32.mrf.mxu0  ;;  %3397 = vmatpush.bf16.msra.mxu0 %v6687_v44 }
 0x30d   : > { %v2783_v33 = vadd.f32 %v9123_v12, %v2782_v8  ;;  %v2831_v21 = vpop.f32.mrf.mxu1  ;;  %v9196_v26 = vadd.f32 %v2927_v60, %v2879_v49  ;;  %v6664_v49 = vld [vmem:[%s10192_s5 + $0x28] sm:$0xf0]  ;;  %v7555_v60 = vld [vmem:[%s10192_s5 + $0x4] sm:$0xf] }
 0x30e   : > { %v6656_v8 = vld [vmem:[%s10192_s5 + $0x20] sm:$0xf0] }
 0x30f   : > { %v2832_v22 = vadd.f32 %v2831_v21, %v2783_v33  ;;  %v6667_v33 = vor.u32 %v7556_v11, %v6664_v49  ;;  %v6659_v21 = vor.u32 %v7555_v60, %v6656_v8 }
 0x311   : > { %3545 = vmatpush.bf16.msra.mxu3 %v6667_v33  ;;  %3447 = vmatpush.bf16.msra.mxu1 %v6659_v21 }
 0x312   : > { %v2880_v24 = vpop.f32.mrf.mxu2 }
 0x313   : > { %v2881_v17 = vadd.f32 %v2880_v24, %v2832_v22 }
 0x314   : > { %v2929_v51 = vpop.f32.mrf.mxu3  ;;  %v2785_v5 = vpop.f32.mrf.mxu0 }
 0x315   : > { %v2786_v38 = vadd.f32 %v9123_v12, %v2785_v5  ;;  %v2834_v18 = vpop.f32.mrf.mxu1  ;;  %v9217_v23 = vadd.f32 %v2929_v51, %v2881_v17 }
 0x317   : > { %v2835_v1 = vadd.f32 %v2834_v18, %v2786_v38  ;;  %2980 = vmatmul.bf16.gmra.mxu0 %v8853_v53  ;;  %3078 = vmatmul.bf16.gmra.mxu2 %v9051_v0  ;;  %v6774_v18 = vld [vmem:[%s10192_s5 + $0xd8] sm:$0xf] }
 0x318   : > { %3029 = vmatmul.bf16.gmra.mxu1 %v8870_v41 }
 0x319   : > { %3127 = vmatmul.bf16.gmra.mxu3 %v9068_v28  ;;  %v6662_v28 = vld [vmem:[%s10192_s5 + $0x8] sm:$0xf] }
 0x31a   : > { %v2883_v39 = vpop.f32.mrf.mxu2  ;;  %v6663_v9 = vor.u32 %v7560_v15, %v6662_v28  ;;  %v7581_v28 = vld [vmem:[%s10192_s5 + $0xd4] sm:$0xf] }
 0x31b   : > { %v2884_v3 = vadd.f32 %v2883_v39, %v2835_v1  ;;  %v7586_v1 = vld [vmem:[%s10192_s5 + $0xf4] sm:$0xf0]  ;;  %v6768_v15 = vld [vmem:[%s10192_s5 + $0xf0] sm:$0xf0] }
 0x31c   : > { %v2932_v2 = vpop.f32.mrf.mxu3  ;;  %v9223_v52 = vpop.f32.mrf.mxu0  ;;  %3496 = vmatpush.bf16.msra.mxu2 %v6663_v9 }
 0x31d   : > { %v9225_v30 = vpop.f32.mrf.mxu1  ;;  %v9227_v47 = vadd.f32 %v2932_v2, %v2884_v3 }
 0x322   : > { %v9229_v13 = vpop.f32.mrf.mxu2 }
 0x324   : > { %v9231_v50 = vpop.f32.mrf.mxu3  ;;  %v2790_v53 = vpop.f32.mrf.mxu0 }
 0x325   : > { %v2791_v41 = vadd.f32 %v9123_v12, %v2790_v53  ;;  %v2839_v43 = vpop.f32.mrf.mxu1 }
 0x327   : > { %v2840_v0 = vadd.f32 %v2839_v43, %v2791_v41  ;;  %2985 = vmatmul.bf16.gmra.mxu0 %v8877_v7  ;;  %3083 = vmatmul.bf16.gmra.mxu2 %v9075_v34  ;;  %v6654_v34 = vld [vmem:[%s10192_s5] sm:$0xf]  ;;  %v7582_v41 = vld [vmem:[%s10192_s5 + $0xdc] sm:$0xf] }
 0x328   : > { %3034 = vmatmul.bf16.gmra.mxu1 %v8894_v62 }
 0x329   : > { %3132 = vmatmul.bf16.gmra.mxu3 %v9083_v48  ;;  %v7559_v48 = vld [vmem:[%s10192_s5 + $0x1c] sm:$0xf0] }
 0x32a   : > { %v2888_v19 = vpop.f32.mrf.mxu2  ;;  %v6655_v46 = vor.u32 %v7559_v48, %v6654_v34 }
 0x32b   : > { %v2889_v36 = vadd.f32 %v2888_v19, %v2840_v0  ;;  %v6776_v0 = vld [vmem:[%s10192_s5 + $0xf8] sm:$0xf0]  ;;  %v6771_v19 = vor.u32 %v7581_v28, %v6768_v15 }
 0x32c   : > { %v2937_v20 = vpop.f32.mrf.mxu3  ;;  %v9244_v10 = vpop.f32.mrf.mxu0  ;;  %3398 = vmatpush.bf16.msra.mxu0 %v6655_v46  ;;  %v6779_v9 = vor.u32 %v7582_v41, %v6776_v0  ;;  %v7574_v41 = vld [vmem:[%s10192_s5 + $0x9c] sm:$0xf]  ;;  %v6736_v0 = vld [vmem:[%s10192_s5 + $0xb0] sm:$0xf0] }
 0x32d   : > { %v9246_v7 = vpop.f32.mrf.mxu1  ;;  %v9248_v62 = vadd.f32 %v2937_v20, %v2889_v36  ;;  %3640 = vmatpush.bf16.msrb.mxu1 %v6771_v19 }
 0x32e   : > { %3738 = vmatpush.bf16.msrb.mxu3 %v6779_v9 }
 0x332   : > { %v9268_v4 = vpop.f32.mrf.mxu2 }
 0x334   : > { %v9270_v40 = vpop.f32.mrf.mxu3  ;;  %v2795_v29 = vpop.f32.mrf.mxu0 }
 0x335   : > { %v2796_v22 = vadd.f32 %v9123_v12, %v2795_v29  ;;  %v2844_v44 = vpop.f32.mrf.mxu1 }
 0x337   : > { %v2845_v61 = vadd.f32 %v2844_v44, %v2796_v22  ;;  %2990 = vmatmul.bf16.gmra.mxu0 %v8901_v27  ;;  %3088 = vmatmul.bf16.gmra.mxu2 %v9087_v37 }
 0x338   : > { %3039 = vmatmul.bf16.gmra.mxu1 %v8918_v57 }
 0x339   : > { %3137 = vmatmul.bf16.gmra.mxu3 %v9101_v59 }
 0x33a   : > { %v2893_v6 = vpop.f32.mrf.mxu2 }
 0x33b   : > { %v2894_v42 = vadd.f32 %v2893_v6, %v2845_v61 }
 0x33c   : > { %v2942_v25 = vpop.f32.mrf.mxu3  ;;  %v9277_v31 = vpop.f32.mrf.mxu0 }
 0x33d   : > { %v9279_v24 = vpop.f32.mrf.mxu1  ;;  %v9281_v17 = vadd.f32 %v2942_v25, %v2894_v42 }
 0x342   : > { %v9283_v51 = vpop.f32.mrf.mxu2 }
 0x344   : > { %v9285_v5 = vpop.f32.mrf.mxu3  ;;  %v2800_v27 = vpop.f32.mrf.mxu0 }
 0x345   : > { %v2801_v57 = vadd.f32 %v9123_v12, %v2800_v27  ;;  %v2849_v38 = vpop.f32.mrf.mxu1 }
 0x347   : > { %v2850_v37 = vadd.f32 %v2849_v38, %v2801_v57  ;;  %2995 = vmatmul.bf16.gmra.mxu0 %v8928_v63  ;;  %3093 = vmatmul.bf16.gmra.mxu2 %v9125_v58  ;;  %v6775_v63 = vor.u32 %v7586_v1, %v6774_v18  ;;  %v6766_v58 = vld [vmem:[%s10192_s5 + $0xd0] sm:$0xf] }
 0x348   : > { %3044 = vmatmul.bf16.gmra.mxu1 %v8948_v16 }
 0x349   : > { %3142 = vmatmul.bf16.gmra.mxu3 %v9133_v55  ;;  %3689 = vmatpush.bf16.msrb.mxu2 %v6775_v63  ;;  %v7585_v55 = vld [vmem:[%s10192_s5 + $0xec] sm:$0xf0] }
 0x34a   : > { %v2898_v59 = vpop.f32.mrf.mxu2  ;;  %v6767_v43 = vor.u32 %v7585_v55, %v6766_v58  ;;  %v6734_v58 = vld [vmem:[%s10192_s5 + $0x90] sm:$0xf] }
 0x34b   : > { %v2899_v39 = vadd.f32 %v2898_v59, %v2850_v37  ;;  %v7578_v37 = vld [vmem:[%s10192_s5 + $0xb4] sm:$0xf0]  ;;  %v7577_v55 = vld [vmem:[%s10192_s5 + $0xac] sm:$0xf0] }
 0x34c   : > { %v2947_v3 = vpop.f32.mrf.mxu3  ;;  %v9298_v2 = vpop.f32.mrf.mxu0  ;;  %3591 = vmatpush.bf16.msrb.mxu0 %v6767_v43  ;;  %v6744_v43 = vld [vmem:[%s10192_s5 + $0xb8] sm:$0xf0] }
 0x34d   : > { %v9300_v53 = vpop.f32.mrf.mxu1  ;;  %v9302_v16 = vadd.f32 %v2947_v3, %v2899_v39  ;;  %v6747_v15 = vor.u32 %v7574_v41, %v6744_v43 }
 0x34f   : > { %3739 = vmatpush.bf16.msrb.mxu3 %v6747_v15  ;;  %v7566_v15 = vld [vmem:[%s10192_s5 + $0x5c] sm:$0xf] }
 0x352   : > { %v9322_v36 = vpop.f32.mrf.mxu2 }
 0x354   : > { %v9324_v20 = vpop.f32.mrf.mxu3  ;;  %v2961_v34 = vpop.f32.mrf.mxu0 }
 0x355   : > { %v3010_v48 = vpop.f32.mrf.mxu1  ;;  %v2962_v46 = vadd.f32 %v2961_v34, %v9136_v32 }
 0x357   : > { %v3011_v21 = vadd.f32 %v3010_v48, %v2962_v46 }
 0x35a   : > { %v3059_v11 = vpop.f32.mrf.mxu2 }
 0x35b   : > { %v3060_v29 = vadd.f32 %v3059_v11, %v3011_v21 }
 0x35c   : > { %v3108_v49 = vpop.f32.mrf.mxu3  ;;  %v2963_v60 = vpop.f32.mrf.mxu0 }
 0x35d   : > { %v3012_v8 = vpop.f32.mrf.mxu1  ;;  %v2964_v33 = vadd.f32 %v2963_v60, %v9139_v54  ;;  %v3109_v27 = vadd.f32 %v3108_v49, %v3060_v29  ;;  %v6742_v54 = vld [vmem:[%s10192_s5 + $0x98] sm:$0xf] }
 0x35e   : > { %v6743_v39 = vor.u32 %v7578_v37, %v6742_v54 }
 0x35f   : > { %v3013_v22 = vadd.f32 %v3012_v8, %v2964_v33 }
 0x360   : > { %3690 = vmatpush.bf16.msrb.mxu2 %v6743_v39 }
 0x362   : > { %v3061_v44 = vpop.f32.mrf.mxu2 }
 0x363   : > { %v3062_v61 = vadd.f32 %v3061_v44, %v3013_v22 }
 0x364   : > { %v3110_v6 = vpop.f32.mrf.mxu3  ;;  %v2966_v42 = vpop.f32.mrf.mxu0 }
 0x365   : > { %v3015_v25 = vpop.f32.mrf.mxu1  ;;  %v3111_v57 = vadd.f32 %v3110_v6, %v3062_v61  ;;  %v2967_v59 = vadd.f32 %v2966_v42, %v9152_v14  ;;  %v6735_v14 = vor.u32 %v7577_v55, %v6734_v58 }
 0x367   : > { %v9328_v38 = vpack.c.bf16 %v3111_v57, %v3109_v27  ;;  %v3016_v28 = vadd.f32 %v3015_v25, %v2967_v59  ;;  %3592 = vmatpush.bf16.msrb.mxu0 %v6735_v14 }
 0x369   : > { %6780 = vmatmul.msk.bf16.vlgmr.msra.gmra.mxu0 %vm3366_vm0, %v9328_v38  ;;  %6788 = vmatmul.msk.bf16.vlgmr.msra.gmra.mxu1 %vm3366_vm0, %v9328_v38 }
 0x36a   : > { %6796 = vmatmul.msk.bf16.vlgmr.msra.gmra.mxu2 %vm3366_vm0, %v9328_v38  ;;  %6804 = vmatmul.msk.bf16.vlgmr.msra.gmra.mxu3 %vm3366_vm0, %v9328_v38  ;;  %v3064_v32 = vpop.f32.mrf.mxu2 }
 0x36b   : > { %v3065_v19 = vadd.f32 %v3064_v32, %v3016_v28  ;;  %v7569_v28 = vld [vmem:[%s10192_s5 + $0x6c] sm:$0xf0] }
 0x36c   : > { %v3113_v18 = vpop.f32.mrf.mxu3  ;;  %v2968_v1 = vpop.f32.mrf.mxu0 }
 0x36d   : > { %v3017_v3 = vpop.f32.mrf.mxu1  ;;  %v2969_v63 = vadd.f32 %v2968_v1, %v9173_v56  ;;  %v7573_v56 = vld [vmem:[%s10192_s5 + $0x94] sm:$0xf]  ;;  %v3114_v8 = vadd.f32 %v3113_v18, %v3065_v19 }
 0x36e   : > { %v6739_v9 = vor.u32 %v7573_v56, %v6736_v0  ;;  %v6702_v0 = vld [vmem:[%s10192_s5 + $0x50] sm:$0xf]  ;;  %v6704_v19 = vld [vmem:[%s10192_s5 + $0x70] sm:$0xf0] }
 0x36f   : > { %v3018_v34 = vadd.f32 %v3017_v3, %v2969_v63  ;;  %v7570_v63 = vld [vmem:[%s10192_s5 + $0x74] sm:$0xf0] }
 0x370   : > { %3641 = vmatpush.bf16.msrb.mxu1 %v6739_v9  ;;  %v6712_v9 = vld [vmem:[%s10192_s5 + $0x78] sm:$0xf0] }
 0x372   : > { %v3066_v48 = vpop.f32.mrf.mxu2 }
 0x373   : > { %v3067_v11 = vadd.f32 %v3066_v48, %v3018_v34  ;;  %v6715_v48 = vor.u32 %v7566_v15, %v6712_v9 }
 0x374   : > { %v3115_v46 = vpop.f32.mrf.mxu3  ;;  %v2971_v49 = vpop.f32.mrf.mxu0 }
 0x375   : > { %v3020_v60 = vpop.f32.mrf.mxu1  ;;  %v3116_v33 = vadd.f32 %v3115_v46, %v3067_v11  ;;  %v2972_v22 = vadd.f32 %v2971_v49, %v9180_v35  ;;  %v2788_v46 = vadd.f32 %v9123_v12, %v9223_v52  ;;  %3740 = vmatpush.bf16.msrb.mxu3 %v6715_v48 }
 0x377   : > { %v9364_v21 = vpack.c.bf16 %v3116_v33, %v3114_v8  ;;  %v3021_v25 = vadd.f32 %v3020_v60, %v2972_v22 }
 0x379   : > { %6781 = vmatmul.msk.bf16.gmra.mxu0 %vm3366_vm0, %v9364_v21  ;;  %6789 = vmatmul.msk.bf16.gmra.mxu1 %vm3366_vm0, %v9364_v21 }
 0x37a   : > { %6797 = vmatmul.msk.bf16.gmra.mxu2 %vm3366_vm0, %v9364_v21  ;;  %6805 = vmatmul.msk.bf16.gmra.mxu3 %vm3366_vm0, %v9364_v21  ;;  %v3069_v29 = vpop.f32.mrf.mxu2 }
 0x37b   : > { %v3070_v27 = vadd.f32 %v3069_v29, %v3021_v25 }
 0x37c   : > { %v3118_v44 = vpop.f32.mrf.mxu3  ;;  %v2973_v61 = vpop.f32.mrf.mxu0 }
 0x37d   : > { %v3022_v6 = vpop.f32.mrf.mxu1  ;;  %v2974_v42 = vadd.f32 %v2973_v61, %v9183_v45  ;;  %v3119_v1 = vadd.f32 %v3118_v44, %v3070_v27  ;;  %v6710_v45 = vld [vmem:[%s10192_s5 + $0x58] sm:$0xf]  ;;  %v2837_v61 = vadd.f32 %v9225_v30, %v2788_v46  ;;  %v6672_v46 = vld [vmem:[%s10192_s5 + $0x30] sm:$0xf0] }
 0x37e   : > { %v6711_v14 = vor.u32 %v7570_v63, %v6710_v45 }
 0x37f   : > { %v3023_v57 = vadd.f32 %v3022_v6, %v2974_v42  ;;  %v2886_v25 = vadd.f32 %v9229_v13, %v2837_v61 }
 0x380   : > { %3691 = vmatpush.bf16.msrb.mxu2 %v6711_v14 }
 0x381   : > { %v2935_v30 = vadd.f32 %v9231_v50, %v2886_v25 }
 0x382   : > { %v3071_v32 = vpop.f32.mrf.mxu2 }
 0x383   : > { %v3072_v54 = vadd.f32 %v3071_v32, %v3023_v57 }
 0x384   : > { %v3120_v37 = vpop.f32.mrf.mxu3  ;;  %v2976_v59 = vpop.f32.mrf.mxu0 }
 0x385   : > { %v3025_v18 = vpop.f32.mrf.mxu1  ;;  %v3121_v39 = vadd.f32 %v3120_v37, %v3072_v54  ;;  %v2977_v58 = vadd.f32 %v2976_v59, %v9196_v26  ;;  %v6703_v26 = vor.u32 %v7569_v28, %v6702_v0 }
 0x387   : > { %v9376_v3 = vpack.c.bf16 %v3121_v39, %v3119_v1  ;;  %v3026_v34 = vadd.f32 %v3025_v18, %v2977_v58  ;;  %3593 = vmatpush.bf16.msrb.mxu0 %v6703_v26  ;;  %v2793_v18 = vadd.f32 %v9123_v12, %v9244_v10 }
 0x389   : > { %6782 = vmatmul.msk.bf16.gmra.mxu0 %vm3366_vm0, %v9376_v3  ;;  %6790 = vmatmul.msk.bf16.gmra.mxu1 %vm3366_vm0, %v9376_v3 }
 0x38a   : > { %6798 = vmatmul.msk.bf16.gmra.mxu2 %vm3366_vm0, %v9376_v3  ;;  %6806 = vmatmul.msk.bf16.gmra.mxu3 %vm3366_vm0, %v9376_v3  ;;  %v3074_v35 = vpop.f32.mrf.mxu2 }
 0x38b   : > { %v3075_v49 = vadd.f32 %v3074_v35, %v3026_v34  ;;  %v7561_v34 = vld [vmem:[%s10192_s5 + $0x2c] sm:$0xf0] }
 0x38c   : > { %v3123_v55 = vpop.f32.mrf.mxu3  ;;  %v2978_v41 = vpop.f32.mrf.mxu0 }
 0x38d   : > { %v3027_v43 = vpop.f32.mrf.mxu1  ;;  %v2979_v56 = vadd.f32 %v2978_v41, %v9217_v23  ;;  %v7565_v23 = vld [vmem:[%s10192_s5 + $0x54] sm:$0xf]  ;;  %v3124_v6 = vadd.f32 %v3123_v55, %v3075_v49  ;;  %v2842_v41 = vadd.f32 %v9246_v7, %v2793_v18  ;;  %v6678_v7 = vld [vmem:[%s10192_s5 + $0x18] sm:$0xf] }
 0x38e   : > { %v6707_v11 = vor.u32 %v7565_v23, %v6704_v19  ;;  %v6670_v19 = vld [vmem:[%s10192_s5 + $0x10] sm:$0xf] }
 0x38f   : > { %v3028_v60 = vadd.f32 %v3027_v43, %v2979_v56  ;;  %v6671_v48 = vor.u32 %v7561_v34, %v6670_v19 }
 0x390   : > { %3642 = vmatpush.bf16.msrb.mxu1 %v6707_v11  ;;  %v7557_v11 = vld [vmem:[%s10192_s5 + $0x14] sm:$0xf] }
 0x391   : > { %3594 = vmatpush.bf16.msrb.mxu0 %v6671_v48 }
 0x392   : > { %v3076_v8 = vpop.f32.mrf.mxu2 }
 0x393   : > { %v3077_v33 = vadd.f32 %v3076_v8, %v3028_v60  ;;  %v6675_v8 = vor.u32 %v7557_v11, %v6672_v46  ;;  %v7618_v11 = vld [vmem:[#allocation10 + $0xf4] sm:$0xf0] }
 0x394   : > { %v3125_v29 = vpop.f32.mrf.mxu3  ;;  %v2981_v22 = vpop.f32.mrf.mxu0 }
 0x395   : > { %v3030_v44 = vpop.f32.mrf.mxu1  ;;  %v3126_v42 = vadd.f32 %v3125_v29, %v3077_v33  ;;  %v2982_v57 = vadd.f32 %v2981_v22, %v9227_v47  ;;  %v2891_v47 = vadd.f32 %v9268_v4, %v2842_v41  ;;  %v7562_v4 = vld [vmem:[%s10192_s5 + $0x34] sm:$0xf0]  ;;  %v2798_v33 = vadd.f32 %v9123_v12, %v9277_v31  ;;  %3643 = vmatpush.bf16.msrb.mxu1 %v6675_v8 }
 0x396   : > { %v6679_v26 = vor.u32 %v7562_v4, %v6678_v7  ;;  %v6902_v7 = vld [vmem:[#allocation10 + $0x70] sm:$0xf] }
 0x397   : > { %v9416_v27 = vpack.c.bf16 %v3126_v42, %v3124_v6  ;;  %v3031_v59 = vadd.f32 %v3030_v44, %v2982_v57  ;;  %v2940_v56 = vadd.f32 %v9270_v40, %v2891_v47  ;;  %v7558_v40 = vld [vmem:[%s10192_s5 + $0x1c] sm:$0xf] }
 0x398   : > { %3692 = vmatpush.bf16.msrb.mxu2 %v6679_v26  ;;  %v7094_v26 = vld [vmem:[#allocation10 + $0x1f0] sm:$0xf] }
 0x399   : > { %6783 = vmatmul.msk.bf16.gmra.mxu0 %vm3366_vm0, %v9416_v27  ;;  %6791 = vmatmul.msk.bf16.gmra.mxu1 %vm3366_vm0, %v9416_v27 }
 0x39a   : > { %6799 = vmatmul.msk.bf16.gmra.mxu2 %vm3366_vm0, %v9416_v27  ;;  %6807 = vmatmul.msk.bf16.gmra.mxu3 %vm3366_vm0, %v9416_v27  ;;  %v3079_v52 = vpop.f32.mrf.mxu2 }
 0x39b   : > { %v3080_v1 = vadd.f32 %v3079_v52, %v3031_v59  ;;  %v2847_v52 = vadd.f32 %v9279_v24, %v2798_v33 }
 0x39c   : > { %v3128_v13 = vpop.f32.mrf.mxu3  ;;  %v2983_v32 = vpop.f32.mrf.mxu0 }
 0x39d   : > { %v3032_v54 = vpop.f32.mrf.mxu1  ;;  %v2984_v37 = vadd.f32 %v2983_v32, %v2935_v30  ;;  %v3129_v50 = vadd.f32 %v3128_v13, %v3080_v1  ;;  %v2896_v13 = vadd.f32 %v9283_v51, %v2847_v52  ;;  %v7086_v52 = vld [vmem:[#allocation10 + $0x1e0] sm:$0xf] }
 0x39f   : > { %v3033_v39 = vadd.f32 %v3032_v54, %v2984_v37  ;;  %v2945_v24 = vadd.f32 %v9285_v5, %v2896_v13 }
 0x3a2   : > { %v3081_v35 = vpop.f32.mrf.mxu2 }
 0x3a3   : > { %v3082_v45 = vadd.f32 %v3081_v35, %v3033_v39  ;;  %v2803_v39 = vadd.f32 %v9123_v12, %v9298_v2  ;;  %v7030_v2 = vld [vmem:[#allocation10 + $0x170] sm:$0xf] }
 0x3a4   : > { %v3130_v63 = vpop.f32.mrf.mxu3  ;;  %v2986_v58 = vpop.f32.mrf.mxu0 }
 0x3a5   : > { %v3035_v55 = vpop.f32.mrf.mxu1  ;;  %v3131_v14 = vadd.f32 %v3130_v63, %v3082_v45  ;;  %v2987_v0 = vadd.f32 %v2986_v58, %v9248_v62  ;;  %v6680_v62 = vld [vmem:[%s10192_s5 + $0x38] sm:$0xf0] }
 0x3a6   : > { %v6683_v60 = vor.u32 %v7558_v40, %v6680_v62  ;;  %v6966_v62 = vld [vmem:[#allocation10 + $0xf0] sm:$0xf] }
 0x3a7   : > { %v9432_v43 = vpack.c.bf16 %v3131_v14, %v3129_v50  ;;  %v3036_v49 = vadd.f32 %v3035_v55, %v2987_v0  ;;  %v2852_v50 = vadd.f32 %v9300_v53, %v2803_v39  ;;  %v7634_v53 = vld [vmem:[#allocation10 + $0x174] sm:$0xf0]  ;;  %v7014_v39 = vld [vmem:[#allocation10 + $0x150] sm:$0xf] }
 0x3a8   : > { %3741 = vmatpush.bf16.msrb.mxu3 %v6683_v60 }
 0x3a9   : > { %6784 = vmatmul.msk.bf16.gmra.mxu0 %vm3366_vm0, %v9432_v43  ;;  %6792 = vmatmul.msk.bf16.gmra.mxu1 %vm3366_vm0, %v9432_v43 }
 0x3aa   : > { %6800 = vmatmul.msk.bf16.gmra.mxu2 %vm3366_vm0, %v9432_v43  ;;  %6808 = vmatmul.msk.bf16.gmra.mxu3 %vm3366_vm0, %v9432_v43  ;;  %v3084_v10 = vpop.f32.mrf.mxu2 }
 0x3ab   : > { %v3085_v29 = vadd.f32 %v3084_v10, %v3036_v49  ;;  %v6967_v49 = vor.u32 %v7618_v11, %v6966_v62 }
 0x3ac   : > { %v3133_v28 = vpop.f32.mrf.mxu3  ;;  %v2988_v15 = vpop.f32.mrf.mxu0 }
 0x3ad   : > { %v3037_v9 = vpop.f32.mrf.mxu1  ;;  %v2989_v23 = vadd.f32 %v2988_v15, %v2940_v56  ;;  %v3134_v30 = vadd.f32 %v3133_v28, %v3085_v29  ;;  %v7031_v28 = vor.u32 %v7634_v53, %v7030_v2  ;;  %v7602_v15 = vld [vmem:[#allocation10 + $0x74] sm:$0xf0]  ;;  %4798 = vmatpush.bf16.msra.mxu1 %v6967_v49 }
 0x3af   : > { %v3038_v22 = vadd.f32 %v3037_v9, %v2989_v23  ;;  %v7650_v9 = vld [vmem:[#allocation10 + $0x1f4] sm:$0xf0]  ;;  %v6903_v23 = vor.u32 %v7602_v15, %v6902_v7  ;;  %4847 = vmatpush.bf16.msra.mxu2 %v7031_v28 }
 0x3b0   : > { %v7095_v19 = vor.u32 %v7650_v9, %v7094_v26  ;;  %v7614_v28 = vld [vmem:[#allocation10 + $0xd4] sm:$0xf0] }
 0x3b1   : > { %4749 = vmatpush.bf16.msra.mxu0 %v6903_v23 }
 0x3b2   : > { %v3086_v44 = vpop.f32.mrf.mxu2  ;;  %4896 = vmatpush.bf16.msra.mxu3 %v7095_v19 }
 0x3b3   : > { %v3087_v61 = vadd.f32 %v3086_v44, %v3038_v22  ;;  %v7022_v44 = vld [vmem:[#allocation10 + $0x160] sm:$0xf] }
 0x3b4   : > { %v3135_v6 = vpop.f32.mrf.mxu3  ;;  %v2991_v42 = vpop.f32.mrf.mxu0 }
 0x3b5   : > { %v3040_v25 = vpop.f32.mrf.mxu1  ;;  %v3136_v57 = vadd.f32 %v3135_v6, %v3087_v61  ;;  %v2992_v54 = vadd.f32 %v2991_v42, %v9281_v17  ;;  %v2901_v17 = vadd.f32 %v9322_v36, %v2852_v50  ;;  %v7632_v61 = vld [vmem:[#allocation10 + $0x164] sm:$0xf0]  ;;  %v6894_v6 = vld [vmem:[#allocation10 + $0x60] sm:$0xf] }
 0x3b6   : > { %v7023_v42 = vor.u32 %v7632_v61, %v7022_v44 }
 0x3b7   : > { %v9472_v32 = vpack.c.bf16 %v3136_v57, %v3134_v30  ;;  %v3041_v1 = vadd.f32 %v3040_v25, %v2992_v54  ;;  %v2950_v36 = vadd.f32 %v9324_v20, %v2901_v17  ;;  %v7600_v25 = vld [vmem:[#allocation10 + $0x64] sm:$0xf0] }
 0x3b8   : > { %v7648_v30 = vld [vmem:[#allocation10 + $0x1e4] sm:$0xf0]  ;;  %v6895_v57 = vor.u32 %v7600_v25, %v6894_v6  ;;  %4848 = vmatpush.bf16.msra.mxu2 %v7023_v42  ;;  %v7006_v6 = vld [vmem:[#allocation10 + $0x140] sm:$0xf] }
 0x3b9   : > { %6785 = vmatmul.msk.bf16.gmra.mxu0 %vm3366_vm0, %v9472_v32  ;;  %6793 = vmatmul.msk.bf16.gmra.mxu1 %vm3366_vm0, %v9472_v32  ;;  %v7087_v13 = vor.u32 %v7648_v30, %v7086_v52  ;;  %v7628_v42 = vld [vmem:[#allocation10 + $0x144] sm:$0xf0]  ;;  %v6878_v25 = vld [vmem:[#allocation10 + $0x40] sm:$0xf] }
 0x3ba   : > { %6801 = vmatmul.msk.bf16.gmra.mxu2 %vm3366_vm0, %v9472_v32  ;;  %6809 = vmatmul.msk.bf16.gmra.mxu3 %vm3366_vm0, %v9472_v32  ;;  %v3089_v31 = vpop.f32.mrf.mxu2  ;;  %v7007_v52 = vor.u32 %v7628_v42, %v7006_v6  ;;  %v7596_v30 = vld [vmem:[#allocation10 + $0x44] sm:$0xf0] }
 0x3bb   : > { %v3090_v35 = vadd.f32 %v3089_v31, %v3041_v1  ;;  %4750 = vmatpush.bf16.msra.mxu0 %v6895_v57  ;;  %4897 = vmatpush.bf16.msra.mxu3 %v7087_v13  ;;  %v6958_v31 = vld [vmem:[#allocation10 + $0xe0] sm:$0xf]  ;;  %v7644_v13 = vld [vmem:[#allocation10 + $0x1c4] sm:$0xf0] }
 0x3bc   : > { %v3138_v51 = vpop.f32.mrf.mxu3  ;;  %v2993_v37 = vpop.f32.mrf.mxu0  ;;  %v7070_v57 = vld [vmem:[#allocation10 + $0x1c0] sm:$0xf] }
 0x3bd   : > { %v3042_v59 = vpop.f32.mrf.mxu1  ;;  %v2994_v18 = vadd.f32 %v2993_v37, %v2945_v24  ;;  %v3139_v14 = vadd.f32 %v3138_v51, %v3090_v35  ;;  %v7616_v24 = vld [vmem:[#allocation10 + $0xe4] sm:$0xf0]  ;;  %v9510_v51 = vld [vmem:[#allocation8] sm:$0xff] }
 0x3be   : > { %v6959_v54 = vor.u32 %v7616_v24, %v6958_v31  ;;  %v9516_v1 = vperm.slane %v9510_v51, 1  ;;  %v7630_v35 = vld [vmem:[#allocation10 + $0x154] sm:$0xf0]  ;;  %v6879_v24 = vor.u32 %v7596_v30, %v6878_v25 }
 0x3bf   : > { %v3043_v45 = vadd.f32 %v3042_v59, %v2994_v18  ;;  %v9513_v18 = vperm.slane %v9510_v51, 0 }
 0x3c0   : > { %4799 = vmatpush.bf16.msra.mxu1 %v6959_v54  ;;  %v7071_v54 = vor.u32 %v7644_v13, %v7070_v57 }
 0x3c2   : > { %v3091_v63 = vpop.f32.mrf.mxu2 }
 0x3c3   : > { %v3092_v58 = vadd.f32 %v3091_v63, %v3043_v45  ;;  %v6886_v45 = vld [vmem:[#allocation10 + $0x50] sm:$0xf]  ;;  %v7015_v63 = vor.u32 %v7630_v35, %v7014_v39 }
 0x3c4   : > { %v3140_v55 = vpop.f32.mrf.mxu3  ;;  %v2996_v41 = vpop.f32.mrf.mxu0 }
 0x3c5   : > { %v3141_v5 = vadd.f32 %v3140_v55, %v3092_v58  ;;  %v3045_v47 = vpop.f32.mrf.mxu1  ;;  %v2997_v4 = vadd.f32 %v2996_v41, %v9302_v16  ;;  %v7598_v58 = vld [vmem:[#allocation10 + $0x54] sm:$0xf0]  ;;  %v7078_v55 = vld [vmem:[#allocation10 + $0x1d0] sm:$0xf]  ;;  %4849 = vmatpush.bf16.msra.mxu2 %v7015_v63 }
 0x3c6   : > { %v7646_v41 = vld [vmem:[#allocation10 + $0x1d4] sm:$0xf0] }
 0x3c7   : > { %v9488_v10 = vpack.c.bf16 %v3141_v5, %v3139_v14  ;;  %v3046_v40 = vadd.f32 %v3045_v47, %v2997_v4  ;;  %v6887_v14 = vor.u32 %v7598_v58, %v6886_v45  ;;  %v7079_v5 = vor.u32 %v7646_v41, %v7078_v55  ;;  %v6942_v55 = vld [vmem:[#allocation10 + $0xc0] sm:$0xf]  ;;  %v7612_v41 = vld [vmem:[#allocation10 + $0xc4] sm:$0xf0] }
 0x3c9   : > { %6786 = vmatmul.msk.bf16.gmra.mxu0 %vm3366_vm0, %v9488_v10  ;;  %6794 = vmatmul.msk.bf16.gmra.mxu1 %vm3366_vm0, %v9488_v10 }
 0x3ca   : > { %6802 = vmatmul.msk.bf16.gmra.mxu2 %vm3366_vm0, %v9488_v10  ;;  %6810 = vmatmul.msk.bf16.gmra.mxu3 %vm3366_vm0, %v9488_v10  ;;  %v3094_v12 = vpop.f32.mrf.mxu2 }
 0x3cb   : > { %v3095_v46 = vadd.f32 %v3094_v12, %v3046_v40  ;;  %4751 = vmatpush.bf16.msra.mxu0 %v6887_v14  ;;  %4898 = vmatpush.bf16.msra.mxu3 %v7079_v5 }
 0x3cc   : > { %v3143_v56 = vpop.f32.mrf.mxu3  ;;  %v2998_v0 = vpop.f32.mrf.mxu0  ;;  %4850 = vmatpush.bf16.msra.mxu2 %v7007_v52 }
 0x3cd   : > { %v2999_v34 = vadd.f32 %v2998_v0, %v2950_v36  ;;  %v3047_v48 = vpop.f32.mrf.mxu1  ;;  %v3144_v33 = vadd.f32 %v3143_v56, %v3095_v46  ;;  %v9534_v56 = vperm.slane %v9510_v51, 3  ;;  %v6950_v0 = vld [vmem:[#allocation10 + $0xd0] sm:$0xf] }
 0x3ce   : > { %v6951_v23 = vor.u32 %v7614_v28, %v6950_v0 }
 0x3cf   : > { %v3048_v20 = vadd.f32 %v3047_v48, %v2999_v34  ;;  %4752 = vmatpush.bf16.msra.mxu0 %v6879_v24  ;;  %4899 = vmatpush.bf16.msra.mxu3 %v7071_v54  ;;  %v6934_v24 = vld [vmem:[#allocation10 + $0xb0] sm:$0xf]  ;;  %v7610_v54 = vld [vmem:[#allocation10 + $0xb4] sm:$0xf0] }
 0x3d0   : > { %4800 = vmatpush.bf16.msra.mxu1 %v6951_v23 }
 0x3d2   : > { %v3096_v16 = vpop.f32.mrf.mxu2 }
 0x3d3   : > { %v3097_v60 = vadd.f32 %v3096_v16, %v3048_v20 }
 0x3d4   : > { %v3145_v8 = vpop.f32.mrf.mxu3 }
 0x3d5   : > { %v3146_v29 = vadd.f32 %v3145_v8, %v3097_v60 }
 0x3d7   : > { %v9500_v22 = vpack.c.bf16 %v3146_v29, %v3144_v33 }
 0x3d9   : > { %6787 = vmatmul.msk.bf16.gmra.mxu0 %vm3366_vm0, %v9500_v22  ;;  %6795 = vmatmul.msk.bf16.gmra.mxu1 %vm3366_vm0, %v9500_v22 }
 0x3da   : > { %6803 = vmatmul.msk.bf16.gmra.mxu2 %vm3366_vm0, %v9500_v22  ;;  %6811 = vmatmul.msk.bf16.gmra.mxu3 %vm3366_vm0, %v9500_v22 }
 0x3e6   : > { %v3400_v37 = vpop.f32.mrf.mxu0  ;;  %v3449_v59 = vpop.f32.mrf.mxu1 }
 0x3e7   : > { %v3401_v50 = vadd.f32 %v3400_v37, %v9513_v18  ;;  %v3450_v47 = vadd.f32 %v3449_v59, %v9516_v1 }
 0x3e9   : > { %6812 = vmatmul.msk.bf16.vlgmr.msrb.gmra.mxu0 %vm3366_vm0, %v9328_v38  ;;  %6820 = vmatmul.msk.bf16.vlgmr.msrb.gmra.mxu1 %vm3366_vm0, %v9328_v38  ;;  %v3783_v4 = vmax.f32 %v3401_v50, 0.0  ;;  %v3784_v15 = vmax.f32 %v3450_v47, 0.0  ;;  %v6943_v47 = vor.u32 %v7612_v41, %v6942_v55 }
 0x3ea   : > { %6828 = vmatmul.msk.bf16.vlgmr.msrb.gmra.mxu2 %vm3366_vm0, %v9328_v38  ;;  %6836 = vmatmul.msk.bf16.vlgmr.msrb.gmra.mxu3 %vm3366_vm0, %v9328_v38  ;;  %v9529_v38 = vperm.slane %v9510_v51, 2 }
 0x3eb   : > { %4801 = vmatpush.bf16.msra.mxu1 %v6943_v47 }
 0x3ed   : > { %v3498_v17 = vpop.f32.mrf.mxu2  ;;  %v3547_v12 = vpop.f32.mrf.mxu3 }
 0x3ee   : > { %v3402_v2 = vpop.f32.mrf.mxu0  ;;  %v3451_v53 = vpop.f32.mrf.mxu1  ;;  %v3499_v40 = vadd.f32 %v3498_v17, %v9529_v38  ;;  %v3548_v48 = vadd.f32 %v3547_v12, %v9534_v56 }
 0x3ef   : > { %v3403_v7 = vadd.f32 %v3402_v2, %v9513_v18  ;;  %v3452_v36 = vadd.f32 %v3451_v53, %v9516_v1 }
 0x3f0   : > { %v3785_v60 = vmax.f32 %v3499_v40, 0.0  ;;  %v3786_v8 = vmax.f32 %v3548_v48, 0.0  ;;  %v6998_v48 = vld [vmem:[#allocation10 + $0x130] sm:$0xf] }
 0x3f1   : > { %v3791_v26 = vmax.f32 %v3403_v7, 0.0  ;;  %v3792_v9 = vmax.f32 %v3452_v36, 0.0 }
 0x3f3   : > { %v9536_v19 = vpack.c.bf16 %v3791_v26, %v3783_v4  ;;  %v9538_v34 = vpack.c.bf16 %v3792_v9, %v3784_v15 }
 0x3f5   : > { %v3500_v62 = vpop.f32.mrf.mxu2  ;;  %v3549_v11 = vpop.f32.mrf.mxu3 }
 0x3f6   : > { %v3501_v46 = vadd.f32 %v3500_v62, %v9529_v38  ;;  %v3550_v20 = vadd.f32 %v3549_v11, %v9534_v56  ;;  %v3405_v49 = vpop.f32.mrf.mxu0  ;;  %v3454_v16 = vpop.f32.mrf.mxu1  ;;  %v7626_v62 = vld [vmem:[#allocation10 + $0x134] sm:$0xf0]  ;;  %v6870_v11 = vld [vmem:[#allocation10 + $0x30] sm:$0xf] }
 0x3f7   : > { %v3406_v31 = vadd.f32 %v3405_v49, %v9513_v18  ;;  %v3455_v37 = vadd.f32 %v3454_v16, %v9516_v1  ;;  %v6999_v49 = vor.u32 %v7626_v62, %v6998_v48  ;;  %v7594_v16 = vld [vmem:[#allocation10 + $0x34] sm:$0xf0]  ;;  %v7640_v48 = vld [vmem:[#allocation10 + $0x1a4] sm:$0xf0] }
 0x3f8   : > { %v3793_v33 = vmax.f32 %v3501_v46, 0.0  ;;  %v3794_v29 = vmax.f32 %v3550_v20, 0.0 }
 0x3f9   : > { %6813 = vmatmul.msk.bf16.gmra.mxu0 %vm3366_vm0, %v9364_v21  ;;  %6821 = vmatmul.msk.bf16.gmra.mxu1 %vm3366_vm0, %v9364_v21  ;;  %v3799_v58 = vmax.f32 %v3406_v31, 0.0  ;;  %v3800_v50 = vmax.f32 %v3455_v37, 0.0 }
 0x3fa   : > { %v9548_v44 = vpack.c.bf16 %v3793_v33, %v3785_v60  ;;  %v9550_v61 = vpack.c.bf16 %v3794_v29, %v3786_v8  ;;  %6829 = vmatmul.msk.bf16.gmra.mxu2 %vm3366_vm0, %v9364_v21  ;;  %6837 = vmatmul.msk.bf16.gmra.mxu3 %vm3366_vm0, %v9364_v21  ;;  %v7062_v60 = vld [vmem:[#allocation10 + $0x1b0] sm:$0xf]  ;;  %v7642_v8 = vld [vmem:[#allocation10 + $0x1b4] sm:$0xf0]  ;;  %v6871_v29 = vor.u32 %v7594_v16, %v6870_v11 }
 0x3fb   : > { %v7063_v6 = vor.u32 %v7642_v8, %v7062_v60  ;;  %4851 = vmatpush.bf16.msra.mxu2 %v6999_v49 }
 0x3fc   : > { %4753 = vmatpush.bf16.msra.mxu0 %v6871_v29 }
 0x3fd   : > { %v3503_v59 = vpop.f32.mrf.mxu2  ;;  %v3552_v39 = vpop.f32.mrf.mxu3  ;;  %4900 = vmatpush.bf16.msra.mxu3 %v7063_v6 }
 0x3fe   : > { %v3407_v35 = vpop.f32.mrf.mxu0  ;;  %v3456_v45 = vpop.f32.mrf.mxu1  ;;  %v3504_v2 = vadd.f32 %v3503_v59, %v9529_v38  ;;  %v3553_v53 = vadd.f32 %v3552_v39, %v9534_v56 }
 0x3ff   : > { %v3408_v21 = vadd.f32 %v3407_v35, %v9513_v18  ;;  %v3457_v63 = vadd.f32 %v3456_v45, %v9516_v1  ;;  %v6935_v35 = vor.u32 %v7610_v54, %v6934_v24 }
 0x400   : > { %v3801_v26 = vmax.f32 %v3504_v2, 0.0  ;;  %v3802_v9 = vmax.f32 %v3553_v53, 0.0 }
 0x401   : > { %v3807_v14 = vmax.f32 %v3408_v21, 0.0  ;;  %v3808_v5 = vmax.f32 %v3457_v63, 0.0  ;;  %4802 = vmatpush.bf16.msra.mxu1 %v6935_v35 }
 0x403   : > { %v9560_v17 = vpack.c.bf16 %v3807_v14, %v3799_v58  ;;  %v9562_v12 = vpack.c.bf16 %v3808_v5, %v3800_v50 }
 0x405   : > { %v3505_v7 = vpop.f32.mrf.mxu2  ;;  %v3554_v36 = vpop.f32.mrf.mxu3 }
 0x406   : > { %v3506_v4 = vadd.f32 %v3505_v7, %v9529_v38  ;;  %v3555_v0 = vadd.f32 %v3554_v36, %v9534_v56  ;;  %v3410_v28 = vpop.f32.mrf.mxu0  ;;  %v3459_v15 = vpop.f32.mrf.mxu1 }
 0x407   : > { %v3411_v33 = vadd.f32 %v3410_v28, %v9513_v18  ;;  %v3460_v42 = vadd.f32 %v3459_v15, %v9516_v1  ;;  %v6862_v28 = vld [vmem:[#allocation10 + $0x20] sm:$0xf] }
 0x408   : > { %v3809_v23 = vmax.f32 %v3506_v4, 0.0  ;;  %v3810_v40 = vmax.f32 %v3555_v0, 0.0  ;;  %v6990_v4 = vld [vmem:[#allocation10 + $0x120] sm:$0xf]  ;;  %v7624_v0 = vld [vmem:[#allocation10 + $0x124] sm:$0xf0] }
 0x409   : > { %6814 = vmatmul.msk.bf16.gmra.mxu0 %vm3366_vm0, %v9376_v3  ;;  %6822 = vmatmul.msk.bf16.gmra.mxu1 %vm3366_vm0, %v9376_v3  ;;  %v3815_v31 = vmax.f32 %v3411_v33, 0.0  ;;  %v3816_v37 = vmax.f32 %v3460_v42, 0.0 }
 0x40a   : > { %6830 = vmatmul.msk.bf16.gmra.mxu2 %vm3366_vm0, %v9376_v3  ;;  %6838 = vmatmul.msk.bf16.gmra.mxu3 %vm3366_vm0, %v9376_v3  ;;  %v9576_v46 = vpack.c.bf16 %v3809_v23, %v3801_v26  ;;  %v9578_v20 = vpack.c.bf16 %v3810_v40, %v3802_v9  ;;  %v6991_v9 = vor.u32 %v7624_v0, %v6990_v4  ;;  %v7592_v23 = vld [vmem:[#allocation10 + $0x24] sm:$0xf0]  ;;  %v7054_v40 = vld [vmem:[#allocation10 + $0x1a0] sm:$0xf]  ;;  %v7590_v0 = vld [vmem:[#allocation10 + $0x14] sm:$0xf0] }
 0x40b   : > { %v6863_v11 = vor.u32 %v7592_v23, %v6862_v28  ;;  %v7055_v49 = vor.u32 %v7640_v48, %v7054_v40  ;;  %v7046_v28 = vld [vmem:[#allocation10 + $0x190] sm:$0xf] }
 0x40c   : > { %4852 = vmatpush.bf16.msra.mxu2 %v6991_v9  ;;  %v7638_v9 = vld [vmem:[#allocation10 + $0x194] sm:$0xf0] }
 0x40d   : > { %v3508_v25 = vpop.f32.mrf.mxu2  ;;  %v3557_v52 = vpop.f32.mrf.mxu3  ;;  %4754 = vmatpush.bf16.msra.mxu0 %v6863_v11  ;;  %4901 = vmatpush.bf16.msra.mxu3 %v7055_v49  ;;  %v7047_v48 = vor.u32 %v7638_v9, %v7046_v28  ;;  %v7038_v28 = vld [vmem:[#allocation10 + $0x180] sm:$0xf]  ;;  %v7636_v9 = vld [vmem:[#allocation10 + $0x184] sm:$0xf0] }
 0x40e   : > { %v3412_v3 = vpop.f32.mrf.mxu0  ;;  %v3461_v30 = vpop.f32.mrf.mxu1  ;;  %v3509_v63 = vadd.f32 %v3508_v25, %v9529_v38  ;;  %v3558_v58 = vadd.f32 %v3557_v52, %v9534_v56  ;;  %v6926_v25 = vld [vmem:[#allocation10 + $0xa0] sm:$0xf]  ;;  %v7608_v52 = vld [vmem:[#allocation10 + $0xa4] sm:$0xf0] }
 0x40f   : > { %v3413_v57 = vadd.f32 %v3412_v3, %v9513_v18  ;;  %v3462_v13 = vadd.f32 %v3461_v30, %v9516_v1 }
 0x410   : > { %v3817_v2 = vmax.f32 %v3509_v63, 0.0  ;;  %v3818_v53 = vmax.f32 %v3558_v58, 0.0 }
 0x411   : > { %v3823_v59 = vmax.f32 %v3413_v57, 0.0  ;;  %v3824_v39 = vmax.f32 %v3462_v13, 0.0  ;;  %v6927_v13 = vor.u32 %v7608_v52, %v6926_v25  ;;  %4902 = vmatpush.bf16.msra.mxu3 %v7047_v48  ;;  %v7039_v48 = vor.u32 %v7636_v9, %v7038_v28 }
 0x413   : > { %v9584_v45 = vpack.c.bf16 %v3823_v59, %v3815_v31  ;;  %v9586_v21 = vpack.c.bf16 %v3824_v39, %v3816_v37  ;;  %4803 = vmatpush.bf16.msra.mxu1 %v6927_v13 }
 0x415   : > { %v3510_v55 = vpop.f32.mrf.mxu2  ;;  %v3559_v41 = vpop.f32.mrf.mxu3  ;;  %4903 = vmatpush.bf16.msra.mxu3 %v7039_v48  ;;  %v7714_v48 = vld [vmem:[#allocation10 + $0x3f4] sm:$0xf0] }
 0x416   : > { %v3511_v50 = vadd.f32 %v3510_v55, %v9529_v38  ;;  %v3560_v14 = vadd.f32 %v3559_v41, %v9534_v56  ;;  %v3415_v5 = vpop.f32.mrf.mxu0  ;;  %v3464_v47 = vpop.f32.mrf.mxu1 }
 0x417   : > { %v3416_v62 = vadd.f32 %v3415_v5, %v9513_v18  ;;  %v3465_v16 = vadd.f32 %v3464_v47, %v9516_v1  ;;  %v6982_v47 = vld [vmem:[#allocation10 + $0x110] sm:$0xf] }
 0x418   : > { %v3825_v7 = vmax.f32 %v3511_v50, 0.0  ;;  %v3826_v36 = vmax.f32 %v3560_v14, 0.0 }
 0x419   : > { %6815 = vmatmul.msk.bf16.gmra.mxu0 %vm3366_vm0, %v9416_v27  ;;  %6823 = vmatmul.msk.bf16.gmra.mxu1 %vm3366_vm0, %v9416_v27  ;;  %v3831_v42 = vmax.f32 %v3416_v62, 0.0  ;;  %v3832_v3 = vmax.f32 %v3465_v16, 0.0 }
 0x41a   : > { %6831 = vmatmul.msk.bf16.gmra.mxu2 %vm3366_vm0, %v9416_v27  ;;  %6839 = vmatmul.msk.bf16.gmra.mxu3 %vm3366_vm0, %v9416_v27  ;;  %v9600_v15 = vpack.c.bf16 %v3825_v7, %v3817_v2  ;;  %v9602_v26 = vpack.c.bf16 %v3826_v36, %v3818_v53  ;;  %v7622_v2 = vld [vmem:[#allocation10 + $0x114] sm:$0xf0]  ;;  %v6854_v53 = vld [vmem:[#allocation10 + $0x10] sm:$0xf] }
 0x41b   : > { %v6983_v4 = vor.u32 %v7622_v2, %v6982_v47  ;;  %v6855_v40 = vor.u32 %v7590_v0, %v6854_v53  ;;  %v6846_v47 = vld [vmem:[#allocation10] sm:$0xf]  ;;  %v7588_v0 = vld [vmem:[#allocation10 + $0x4] sm:$0xf0] }
 0x41c   : > { %10251 = vst [vmem:[#allocation21_spill] sm:$0xff] %v9602_v26 }
 0x41d   : > { %v3513_v60 = vpop.f32.mrf.mxu2  ;;  %v3562_v8 = vpop.f32.mrf.mxu3  ;;  %4853 = vmatpush.bf16.msra.mxu2 %v6983_v4  ;;  %4755 = vmatpush.bf16.msra.mxu0 %v6855_v40  ;;  %v6847_v40 = vor.u32 %v7588_v0, %v6846_v47  ;;  %v7698_v47 = vld [vmem:[#allocation10 + $0x374] sm:$0xf0] }
 0x41e   : > { %v3417_v27 = vpop.f32.mrf.mxu0  ;;  %v3466_v33 = vpop.f32.mrf.mxu1  ;;  %v3514_v54 = vadd.f32 %v3513_v60, %v9529_v38  ;;  %v3563_v37 = vadd.f32 %v3562_v8, %v9534_v56 }
 0x41f   : > { %v3418_v29 = vadd.f32 %v3417_v27, %v9513_v18  ;;  %v3467_v6 = vadd.f32 %v3466_v33, %v9516_v1  ;;  %v6918_v33 = vld [vmem:[#allocation10 + $0x90] sm:$0xf] }
 0x420   : > { %v3833_v41 = vmax.f32 %v3514_v54, 0.0  ;;  %v3834_v50 = vmax.f32 %v3563_v37, 0.0 }
 0x421   : > { %v3839_v30 = vmax.f32 %v3418_v29, 0.0  ;;  %v3840_v57 = vmax.f32 %v3467_v6, 0.0  ;;  %v7606_v29 = vld [vmem:[#allocation10 + $0x94] sm:$0xf0]  ;;  %4756 = vmatpush.bf16.msra.mxu0 %v6847_v40  ;;  %v7350_v40 = vld [vmem:[#allocation10 + $0x3f0] sm:$0xf] }
 0x422   : > { %v6919_v52 = vor.u32 %v7606_v29, %v6918_v33  ;;  %v7604_v33 = vld [vmem:[#allocation10 + $0x84] sm:$0xf0] }
 0x423   : > { %v9608_v31 = vpack.c.bf16 %v3839_v30, %v3831_v42  ;;  %v9610_v24 = vpack.c.bf16 %v3840_v57, %v3832_v3 }
 0x424   : > { %4804 = vmatpush.bf16.msra.mxu1 %v6919_v52 }
 0x425   : > { %10252 = vst [vmem:[#allocation22_spill] sm:$0xff] %v9608_v31  ;;  %v3515_v59 = vpop.f32.mrf.mxu2  ;;  %v3564_v39 = vpop.f32.mrf.mxu3 }
 0x426   : > { %10253 = vst [vmem:[#allocation23_spill] sm:$0xff] %v9610_v24  ;;  %v3516_v35 = vadd.f32 %v3515_v59, %v9529_v38  ;;  %v3565_v63 = vadd.f32 %v3564_v39, %v9534_v56  ;;  %v3420_v58 = vpop.f32.mrf.mxu0  ;;  %v3469_v55 = vpop.f32.mrf.mxu1 }
 0x427   : > { %v3421_v23 = vadd.f32 %v3420_v58, %v9513_v18  ;;  %v3470_v62 = vadd.f32 %v3469_v55, %v9516_v1 }
 0x428   : > { %v3841_v14 = vmax.f32 %v3516_v35, 0.0  ;;  %v3842_v5 = vmax.f32 %v3565_v63, 0.0 }
 0x429   : > { %6816 = vmatmul.msk.bf16.gmra.mxu0 %vm3366_vm0, %v9432_v43  ;;  %6824 = vmatmul.msk.bf16.gmra.mxu1 %vm3366_vm0, %v9432_v43  ;;  %v3847_v27 = vmax.f32 %v3421_v23, 0.0  ;;  %v3848_v6 = vmax.f32 %v3470_v62, 0.0 }
 0x42a   : > { %6832 = vmatmul.msk.bf16.gmra.mxu2 %vm3366_vm0, %v9432_v43  ;;  %6840 = vmatmul.msk.bf16.gmra.mxu3 %vm3366_vm0, %v9432_v43  ;;  %v9624_v7 = vpack.c.bf16 %v3841_v14, %v3833_v41  ;;  %v9626_v36 = vpack.c.bf16 %v3842_v5, %v3834_v50  ;;  %v6974_v14 = vld [vmem:[#allocation10 + $0x100] sm:$0xf]  ;;  %v7620_v5 = vld [vmem:[#allocation10 + $0x104] sm:$0xf0] }
 0x42b   : > { %v6975_v4 = vor.u32 %v7620_v5, %v6974_v14  ;;  %v7286_v5 = vld [vmem:[#allocation10 + $0x370] sm:$0xf] }
 0x42c   : > { %10254 = vst [vmem:[#allocation24_spill] sm:$0xff] %v9624_v7  ;;  %v7287_v9 = vor.u32 %v7698_v47, %v7286_v5 }
 0x42d   : > { %10255 = vst [vmem:[#allocation25_spill] sm:$0xff] %v9626_v36  ;;  %v3518_v11 = vpop.f32.mrf.mxu2  ;;  %v3567_v49 = vpop.f32.mrf.mxu3  ;;  %4854 = vmatpush.bf16.msra.mxu2 %v6975_v4  ;;  %v7158_v4 = vld [vmem:[#allocation10 + $0x270] sm:$0xf] }
 0x42e   : > { %v3422_v43 = vpop.f32.mrf.mxu0  ;;  %v3471_v16 = vpop.f32.mrf.mxu1  ;;  %v3519_v57 = vadd.f32 %v3518_v11, %v9529_v38  ;;  %v3568_v13 = vadd.f32 %v3567_v49, %v9534_v56 }
 0x42f   : > { %v3423_v60 = vadd.f32 %v3422_v43, %v9513_v18  ;;  %v3472_v8 = vadd.f32 %v3471_v16, %v9516_v1 }
 0x430   : > { %v3849_v58 = vmax.f32 %v3519_v57, 0.0  ;;  %v3850_v55 = vmax.f32 %v3568_v13, 0.0 }
 0x431   : > { %v3855_v42 = vmax.f32 %v3423_v60, 0.0  ;;  %v3856_v25 = vmax.f32 %v3472_v8, 0.0  ;;  %5043 = vmatpush.bf16.msrb.mxu2 %v7287_v9 }
 0x433   : > { %v9632_v3 = vpack.c.bf16 %v3855_v42, %v3847_v27  ;;  %v9634_v30 = vpack.c.bf16 %v3856_v25, %v3848_v6  ;;  %v6910_v27 = vld [vmem:[#allocation10 + $0x80] sm:$0xf] }
 0x434   : > { %v6911_v25 = vor.u32 %v7604_v33, %v6910_v27 }
 0x435   : > { %10256 = vst [vmem:[#allocation26_spill] sm:$0xff] %v9632_v3  ;;  %v3520_v54 = vpop.f32.mrf.mxu2  ;;  %v3569_v37 = vpop.f32.mrf.mxu3 }
 0x436   : > { %10257 = vst [vmem:[#allocation27_spill] sm:$0xff] %v9634_v30  ;;  %v3521_v59 = vadd.f32 %v3520_v54, %v9529_v38  ;;  %v3570_v39 = vadd.f32 %v3569_v37, %v9534_v56  ;;  %v3425_v35 = vpop.f32.mrf.mxu0  ;;  %v3474_v63 = vpop.f32.mrf.mxu1  ;;  %4805 = vmatpush.bf16.msra.mxu1 %v6911_v25 }
 0x437   : > { %v3426_v23 = vadd.f32 %v3425_v35, %v9513_v18  ;;  %v3475_v62 = vadd.f32 %v3474_v63, %v9516_v1 }
 0x438   : > { %v3857_v41 = vmax.f32 %v3521_v59, 0.0  ;;  %v3858_v50 = vmax.f32 %v3570_v39, 0.0 }
 0x439   : > { %6817 = vmatmul.msk.bf16.gmra.mxu0 %vm3366_vm0, %v9472_v32  ;;  %6825 = vmatmul.msk.bf16.gmra.mxu1 %vm3366_vm0, %v9472_v32  ;;  %v3863_v8 = vmax.f32 %v3426_v23, 0.0  ;;  %v3864_v29 = vmax.f32 %v3475_v62, 0.0  ;;  %v7666_v23 = vld [vmem:[#allocation10 + $0x274] sm:$0xf0] }
 0x43a   : > { %6833 = vmatmul.msk.bf16.gmra.mxu2 %vm3366_vm0, %v9472_v32  ;;  %6841 = vmatmul.msk.bf16.gmra.mxu3 %vm3366_vm0, %v9472_v32  ;;  %v9648_v2 = vpack.c.bf16 %v3857_v41, %v3849_v58  ;;  %v9650_v53 = vpack.c.bf16 %v3858_v50, %v3850_v55 }
 0x43c   : > { %10258 = vst [vmem:[#allocation28_spill] sm:$0xff] %v9648_v2 }
 0x43d   : > { %10259 = vst [vmem:[#allocation29_spill] sm:$0xff] %v9650_v53  ;;  %v3523_v11 = vpop.f32.mrf.mxu2  ;;  %v3572_v49 = vpop.f32.mrf.mxu3 }
 0x43e   : > { %v3427_v32 = vpop.f32.mrf.mxu0  ;;  %v3476_v43 = vpop.f32.mrf.mxu1  ;;  %v3524_v13 = vadd.f32 %v3523_v11, %v9529_v38  ;;  %v3573_v54 = vadd.f32 %v3572_v49, %v9534_v56  ;;  %v7159_v11 = vor.u32 %v7666_v23, %v7158_v4  ;;  %v7351_v49 = vor.u32 %v7714_v48, %v7350_v40  ;;  %v7278_v23 = vld [vmem:[#allocation10 + $0x360] sm:$0xf]  ;;  %v7696_v40 = vld [vmem:[#allocation10 + $0x364] sm:$0xf0] }
 0x43f   : > { %v3428_v16 = vadd.f32 %v3427_v32, %v9513_v18  ;;  %v3477_v60 = vadd.f32 %v3476_v43, %v9516_v1  ;;  %v7150_v48 = vld [vmem:[#allocation10 + $0x260] sm:$0xf] }
 0x440   : > { %v3865_v55 = vmax.f32 %v3524_v13, 0.0  ;;  %v3866_v41 = vmax.f32 %v3573_v54, 0.0  ;;  %4945 = vmatpush.bf16.msrb.mxu0 %v7159_v11  ;;  %5092 = vmatpush.bf16.msrb.mxu3 %v7351_v49  ;;  %v7279_v49 = vor.u32 %v7696_v40, %v7278_v23  ;;  %v9713_v40 = vperm.slane %v9510_v51, 4 }
 0x441   : > { %v3871_v6 = vmax.f32 %v3428_v16, 0.0  ;;  %v3872_v42 = vmax.f32 %v3477_v60, 0.0 }
 0x442   : > { %5044 = vmatpush.bf16.msrb.mxu2 %v7279_v49 }
 0x443   : > { %v9656_v52 = vpack.c.bf16 %v3871_v6, %v3863_v8  ;;  %v9658_v57 = vpack.c.bf16 %v3872_v42, %v3864_v29  ;;  %v7222_v29 = vld [vmem:[#allocation10 + $0x2f0] sm:$0xf]  ;;  %v7682_v6 = vld [vmem:[#allocation10 + $0x2f4] sm:$0xf0] }
 0x444   : > { %v7223_v54 = vor.u32 %v7682_v6, %v7222_v29 }
 0x445   : > { %10260 = vst [vmem:[#allocation30_spill] sm:$0xff] %v9656_v52  ;;  %v3525_v37 = vpop.f32.mrf.mxu2  ;;  %v3574_v59 = vpop.f32.mrf.mxu3 }
 0x446   : > { %10261 = vst [vmem:[#allocation31_spill] sm:$0xff] %v9658_v57  ;;  %v3526_v39 = vadd.f32 %v3525_v37, %v9529_v38  ;;  %v3575_v35 = vadd.f32 %v3574_v59, %v9534_v56  ;;  %v3430_v63 = vpop.f32.mrf.mxu0  ;;  %v3479_v58 = vpop.f32.mrf.mxu1  ;;  %4994 = vmatpush.bf16.msrb.mxu1 %v7223_v54  ;;  %v7214_v54 = vld [vmem:[#allocation10 + $0x2e0] sm:$0xf] }
 0x447   : > { %v3431_v62 = vadd.f32 %v3430_v63, %v9513_v18  ;;  %v3480_v32 = vadd.f32 %v3479_v58, %v9516_v1 }
 0x448   : > { %v3873_v50 = vmax.f32 %v3526_v39, 0.0  ;;  %v3874_v14 = vmax.f32 %v3575_v35, 0.0 }
 0x449   : > { %6818 = vmatmul.msk.bf16.gmra.mxu0 %vm3366_vm0, %v9488_v10  ;;  %6826 = vmatmul.msk.bf16.gmra.mxu1 %vm3366_vm0, %v9488_v10  ;;  %v3879_v33 = vmax.f32 %v3431_v62, 0.0  ;;  %v3880_v42 = vmax.f32 %v3480_v32, 0.0  ;;  %v7664_v32 = vld [vmem:[#allocation10 + $0x264] sm:$0xf0] }
 0x44a   : > { %6834 = vmatmul.msk.bf16.gmra.mxu2 %vm3366_vm0, %v9488_v10  ;;  %6842 = vmatmul.msk.bf16.gmra.mxu3 %vm3366_vm0, %v9488_v10  ;;  %v9672_v0 = vpack.c.bf16 %v3873_v50, %v3865_v55  ;;  %v9674_v28 = vpack.c.bf16 %v3874_v14, %v3866_v41 }
 0x44c   : > { %10262 = vst [vmem:[#allocation32_spill] sm:$0xff] %v9672_v0 }
 0x44d   : > { %10263 = vst [vmem:[#allocation33_spill] sm:$0xff] %v9674_v28  ;;  %v3528_v43 = vpop.f32.mrf.mxu2  ;;  %v3577_v16 = vpop.f32.mrf.mxu3 }
 0x44e   : > { %v3432_v10 = vpop.f32.mrf.mxu0  ;;  %v3481_v60 = vpop.f32.mrf.mxu1  ;;  %v3529_v39 = vadd.f32 %v3528_v43, %v9529_v38  ;;  %v3578_v35 = vadd.f32 %v3577_v16, %v9534_v56  ;;  %v7342_v43 = vld [vmem:[#allocation10 + $0x3e0] sm:$0xf]  ;;  %v7712_v16 = vld [vmem:[#allocation10 + $0x3e4] sm:$0xf0] }
 0x44f   : > { %v3433_v8 = vadd.f32 %v3432_v10, %v9513_v18  ;;  %v3482_v27 = vadd.f32 %v3481_v60, %v9516_v1  ;;  %v7151_v60 = vor.u32 %v7664_v32, %v7150_v48 }
 0x450   : > { %v3881_v5 = vmax.f32 %v3529_v39, 0.0  ;;  %v3882_v47 = vmax.f32 %v3578_v35, 0.0  ;;  %v7680_v39 = vld [vmem:[#allocation10 + $0x2e4] sm:$0xf0] }
 0x451   : > { %v3887_v25 = vmax.f32 %v3433_v8, 0.0  ;;  %v3888_v13 = vmax.f32 %v3482_v27, 0.0  ;;  %v7343_v8 = vor.u32 %v7712_v16, %v7342_v43  ;;  %4946 = vmatpush.bf16.msrb.mxu0 %v7151_v60  ;;  %v9716_v16 = vperm.slane %v9510_v51, 5 }
 0x453   : > { %v9680_v37 = vpack.c.bf16 %v3887_v25, %v3879_v33  ;;  %v9682_v59 = vpack.c.bf16 %v3888_v13, %v3880_v42  ;;  %5093 = vmatpush.bf16.msrb.mxu3 %v7343_v8 }
 0x455   : > { %10264 = vst [vmem:[#allocation34_spill] sm:$0xff] %v9680_v37  ;;  %v3530_v63 = vpop.f32.mrf.mxu2  ;;  %v3579_v58 = vpop.f32.mrf.mxu3 }
 0x456   : > { %10265 = vst [vmem:[#allocation35_spill] sm:$0xff] %v9682_v59  ;;  %v3531_v55 = vadd.f32 %v3530_v63, %v9529_v38  ;;  %v3580_v41 = vadd.f32 %v3579_v58, %v9534_v56  ;;  %v3435_v50 = vpop.f32.mrf.mxu0  ;;  %v3484_v14 = vpop.f32.mrf.mxu1 }
 0x457   : > { %v3436_v10 = vadd.f32 %v3435_v50, %v9513_v18  ;;  %v3485_v27 = vadd.f32 %v3484_v14, %v9516_v1 }
 0x458   : > { %v3889_v4 = vmax.f32 %v3531_v55, 0.0  ;;  %v3890_v9 = vmax.f32 %v3580_v41, 0.0  ;;  %v7215_v55 = vor.u32 %v7680_v39, %v7214_v54 }
 0x459   : > { %6819 = vmatmul.msk.bf16.gmra.mxu0 %vm3366_vm0, %v9500_v22  ;;  %6827 = vmatmul.msk.bf16.gmra.mxu1 %vm3366_vm0, %v9500_v22  ;;  %v3895_v13 = vmax.f32 %v3436_v10, 0.0  ;;  %v3896_v35 = vmax.f32 %v3485_v27, 0.0  ;;  %v7142_v10 = vld [vmem:[#allocation10 + $0x250] sm:$0xf] }
 0x45a   : > { %6835 = vmatmul.msk.bf16.gmra.mxu2 %vm3366_vm0, %v9500_v22  ;;  %6843 = vmatmul.msk.bf16.gmra.mxu3 %vm3366_vm0, %v9500_v22  ;;  %v9696_v62 = vpack.c.bf16 %v3889_v4, %v3881_v5  ;;  %v9698_v11 = vpack.c.bf16 %v3890_v9, %v3882_v47 }
 0x45b   : > { %4995 = vmatpush.bf16.msrb.mxu1 %v7215_v55 }
 0x45c   : > { %10266 = vst [vmem:[#allocation36_spill] sm:$0xff] %v9696_v62 }
 0x45d   : > { %10267 = vst [vmem:[#allocation37_spill] sm:$0xff] %v9698_v11  ;;  %v3533_v33 = vpop.f32.mrf.mxu2  ;;  %v3582_v29 = vpop.f32.mrf.mxu3 }
 0x45e   : > { %v3437_v22 = vpop.f32.mrf.mxu0  ;;  %v3486_v6 = vpop.f32.mrf.mxu1  ;;  %v3534_v14 = vadd.f32 %v3533_v33, %v9529_v38  ;;  %v3583_v5 = vadd.f32 %v3582_v29, %v9534_v56  ;;  %v7662_v33 = vld [vmem:[#allocation10 + $0x254] sm:$0xf0]  ;;  %v7334_v29 = vld [vmem:[#allocation10 + $0x3d0] sm:$0xf] }
 0x45f   : > { %v3438_v42 = vadd.f32 %v3437_v22, %v9513_v18  ;;  %v3487_v25 = vadd.f32 %v3486_v6, %v9516_v1  ;;  %v7710_v22 = vld [vmem:[#allocation10 + $0x3d4] sm:$0xf0] }
 0x460   : > { %v3897_v48 = vmax.f32 %v3534_v14, 0.0  ;;  %v3898_v49 = vmax.f32 %v3583_v5, 0.0 }
 0x461   : > { %v3903_v63 = vmax.f32 %v3438_v42, 0.0  ;;  %v3904_v58 = vmax.f32 %v3487_v25, 0.0  ;;  %v7143_v42 = vor.u32 %v7662_v33, %v7142_v10  ;;  %v7335_v25 = vor.u32 %v7710_v22, %v7334_v29 }
 0x463   : > { %v9704_v41 = vpack.c.bf16 %v3903_v63, %v3895_v13  ;;  %v9706_v50 = vpack.c.bf16 %v3904_v58, %v3896_v35  ;;  %4947 = vmatpush.bf16.msrb.mxu0 %v7143_v42  ;;  %5094 = vmatpush.bf16.msrb.mxu3 %v7335_v25  ;;  %v9729_v58 = vperm.slane %v9510_v51, 6 }
 0x465   : > { %10268 = vst [vmem:[#allocation38_spill] sm:$0xff] %v9704_v41  ;;  %v3535_v47 = vpop.f32.mrf.mxu2  ;;  %v3584_v18 = vpop.f32.mrf.mxu3 }
 0x466   : > { %10269 = vst [vmem:[#allocation39_spill] sm:$0xff] %v9706_v50  ;;  %v3536_v1 = vadd.f32 %v3535_v47, %v9529_v38  ;;  %v3585_v4 = vadd.f32 %v3584_v18, %v9534_v56  ;;  %v3596_v9 = vpop.f32.mrf.mxu0  ;;  %v3645_v23 = vpop.f32.mrf.mxu1  ;;  %v7270_v38 = vld [vmem:[#allocation10 + $0x350] sm:$0xf]  ;;  %v7694_v56 = vld [vmem:[#allocation10 + $0x354] sm:$0xf0]  ;;  %v9734_v47 = vperm.slane %v9510_v51, 7 }
 0x467   : > { %v7271_v27 = vor.u32 %v7694_v56, %v7270_v38  ;;  %v3597_v6 = vadd.f32 %v3596_v9, %v9713_v40  ;;  %v3646_v13 = vadd.f32 %v3645_v23, %v9716_v16  ;;  %v7206_v18 = vld [vmem:[#allocation10 + $0x2d0] sm:$0xf] }
 0x468   : > { %v3905_v32 = vmax.f32 %v3536_v1, 0.0  ;;  %v3906_v43 = vmax.f32 %v3585_v4, 0.0  ;;  %v7678_v1 = vld [vmem:[#allocation10 + $0x2d4] sm:$0xf0] }
 0x469   : > { %4757 = vmatmul.bf16.vlgmr.msra.gmra.mxu0 %v9536_v19  ;;  %4806 = vmatmul.bf16.vlgmr.msra.gmra.mxu1 %v9538_v34  ;;  %v3787_v5 = vmax.f32 %v3597_v6, 0.0  ;;  %v3788_v4 = vmax.f32 %v3646_v13, 0.0 }
 0x46a   : > { %4855 = vmatmul.bf16.vlgmr.msra.gmra.mxu2 %v9548_v44  ;;  %4904 = vmatmul.bf16.vlgmr.msra.gmra.mxu3 %v9550_v61  ;;  %v9722_v60 = vpack.c.bf16 %v3905_v32, %v3897_v48  ;;  %v9724_v8 = vpack.c.bf16 %v3906_v43, %v3898_v49  ;;  %v7207_v48 = vor.u32 %v7678_v1, %v7206_v18  ;;  %v7708_v18 = vld [vmem:[#allocation10 + $0x3c4] sm:$0xf0] }
 0x46b   : > { %5045 = vmatpush.bf16.msrb.mxu2 %v7271_v27 }
 0x46c   : > { %10270 = vst [vmem:[#allocation40_spill] sm:$0xff] %v9722_v60  ;;  %4996 = vmatpush.bf16.msrb.mxu1 %v7207_v48 }
 0x46d   : > { %10271 = vst [vmem:[#allocation41_spill] sm:$0xff] %v9724_v8  ;;  %v3694_v54 = vpop.f32.mrf.mxu2  ;;  %v3743_v39 = vpop.f32.mrf.mxu3 }
 0x46e   : > { %v3598_v35 = vpop.f32.mrf.mxu0  ;;  %v3647_v63 = vpop.f32.mrf.mxu1  ;;  %v3695_v43 = vadd.f32 %v3694_v54, %v9729_v58  ;;  %v3744_v38 = vadd.f32 %v3743_v39, %v9734_v47  ;;  %v7262_v39 = vld [vmem:[#allocation10 + $0x340] sm:$0xf] }
 0x46f   : > { %v3599_v55 = vadd.f32 %v3598_v35, %v9713_v40  ;;  %v3648_v14 = vadd.f32 %v3647_v63, %v9716_v16  ;;  %v7692_v35 = vld [vmem:[#allocation10 + $0x344] sm:$0xf0]  ;;  %v7134_v63 = vld [vmem:[#allocation10 + $0x240] sm:$0xf] }
 0x470   : > { %v3789_v22 = vmax.f32 %v3695_v43, 0.0  ;;  %v3790_v6 = vmax.f32 %v3744_v38, 0.0 }
 0x471   : > { %v3795_v9 = vmax.f32 %v3599_v55, 0.0  ;;  %v3796_v23 = vmax.f32 %v3648_v14, 0.0  ;;  %v7263_v55 = vor.u32 %v7692_v35, %v7262_v39  ;;  %v7660_v14 = vld [vmem:[#allocation10 + $0x244] sm:$0xf0] }
 0x473   : > { %v9736_v49 = vpack.c.bf16 %v3795_v9, %v3787_v5  ;;  %v9738_v32 = vpack.c.bf16 %v3796_v23, %v3788_v4  ;;  %v7326_v5 = vld [vmem:[#allocation10 + $0x3c0] sm:$0xf]  ;;  %v7135_v4 = vor.u32 %v7660_v14, %v7134_v63  ;;  %5046 = vmatpush.bf16.msrb.mxu2 %v7263_v55 }
 0x474   : > { %v7327_v9 = vor.u32 %v7708_v18, %v7326_v5 }
 0x475   : > { %v3696_v56 = vpop.f32.mrf.mxu2  ;;  %v3745_v10 = vpop.f32.mrf.mxu3  ;;  %4948 = vmatpush.bf16.msrb.mxu0 %v7135_v4 }
 0x476   : > { %v3697_v51 = vadd.f32 %v3696_v56, %v9729_v58  ;;  %v3746_v27 = vadd.f32 %v3745_v10, %v9734_v47  ;;  %v3601_v33 = vpop.f32.mrf.mxu0  ;;  %v3650_v29 = vpop.f32.mrf.mxu1  ;;  %5095 = vmatpush.bf16.msrb.mxu3 %v7327_v9 }
 0x477   : > { %v3602_v1 = vadd.f32 %v3601_v33, %v9713_v40  ;;  %v3651_v23 = vadd.f32 %v3650_v29, %v9716_v16 }
 0x478   : > { %v3797_v42 = vmax.f32 %v3697_v51, 0.0  ;;  %v3798_v25 = vmax.f32 %v3746_v27, 0.0 }
 0x479   : > { %4762 = vmatmul.bf16.gmra.mxu0 %v9560_v17  ;;  %4811 = vmatmul.bf16.gmra.mxu1 %v9562_v12  ;;  %v3803_v27 = vmax.f32 %v3602_v1, 0.0 }
 0x47a   : > { %v9746_v13 = vpack.c.bf16 %v3797_v42, %v3789_v22  ;;  %v9748_v54 = vpack.c.bf16 %v3798_v25, %v3790_v6  ;;  %4860 = vmatmul.bf16.gmra.mxu2 %v9576_v46  ;;  %4909 = vmatmul.bf16.gmra.mxu3 %v9578_v20  ;;  %v7198_v22 = vld [vmem:[#allocation10 + $0x2c0] sm:$0xf]  ;;  %v7676_v6 = vld [vmem:[#allocation10 + $0x2c4] sm:$0xf0]  ;;  %v3804_v42 = vmax.f32 %v3651_v23, 0.0 }
 0x47b   : > { %v7199_v39 = vor.u32 %v7676_v6, %v7198_v22 }
 0x47d   : > { %v3699_v48 = vpop.f32.mrf.mxu2  ;;  %v3748_v43 = vpop.f32.mrf.mxu3  ;;  %4997 = vmatpush.bf16.msrb.mxu1 %v7199_v39 }
 0x47e   : > { %v3603_v38 = vpop.f32.mrf.mxu0  ;;  %v3652_v56 = vpop.f32.mrf.mxu1  ;;  %v3700_v63 = vadd.f32 %v3699_v48, %v9729_v58  ;;  %v3749_v55 = vadd.f32 %v3748_v43, %v9734_v47  ;;  %v7254_v48 = vld [vmem:[#allocation10 + $0x330] sm:$0xf]  ;;  %v7690_v43 = vld [vmem:[#allocation10 + $0x334] sm:$0xf0] }
 0x47f   : > { %v3604_v10 = vadd.f32 %v3603_v38, %v9713_v40  ;;  %v3653_v51 = vadd.f32 %v3652_v56, %v9716_v16  ;;  %v7255_v6 = vor.u32 %v7690_v43, %v7254_v48  ;;  %v7674_v48 = vld [vmem:[#allocation10 + $0x2b4] sm:$0xf0] }
 0x480   : > { %v3805_v23 = vmax.f32 %v3700_v63, 0.0  ;;  %v3806_v38 = vmax.f32 %v3749_v55, 0.0 }
 0x481   : > { %v3811_v33 = vmax.f32 %v3604_v10, 0.0  ;;  %v3812_v25 = vmax.f32 %v3653_v51, 0.0  ;;  %v7126_v51 = vld [vmem:[#allocation10 + $0x230] sm:$0xf]  ;;  %5047 = vmatpush.bf16.msrb.mxu2 %v7255_v6 }
 0x483   : > { %v9756_v29 = vpack.c.bf16 %v3811_v33, %v3803_v27  ;;  %v9758_v35 = vpack.c.bf16 %v3812_v25, %v3804_v42  ;;  %v7658_v42 = vld [vmem:[#allocation10 + $0x234] sm:$0xf0]  ;;  %v7318_v33 = vld [vmem:[#allocation10 + $0x3b0] sm:$0xf] }
 0x484   : > { %v7706_v25 = vld [vmem:[#allocation10 + $0x3b4] sm:$0xf0]  ;;  %v7127_v63 = vor.u32 %v7658_v42, %v7126_v51 }
 0x485   : > { %v3701_v14 = vpop.f32.mrf.mxu2  ;;  %v3750_v5 = vpop.f32.mrf.mxu3  ;;  %v7319_v55 = vor.u32 %v7706_v25, %v7318_v33 }
 0x486   : > { %v3702_v18 = vadd.f32 %v3701_v14, %v9729_v58  ;;  %v3751_v1 = vadd.f32 %v3750_v5, %v9734_v47  ;;  %v3606_v4 = vpop.f32.mrf.mxu0  ;;  %v3655_v9 = vpop.f32.mrf.mxu1  ;;  %4949 = vmatpush.bf16.msrb.mxu0 %v7127_v63 }
 0x487   : > { %v3607_v39 = vadd.f32 %v3606_v4, %v9713_v40  ;;  %v3656_v14 = vadd.f32 %v3655_v9, %v9716_v16  ;;  %5096 = vmatpush.bf16.msrb.mxu3 %v7319_v55 }
 0x488   : > { %v3813_v56 = vmax.f32 %v3702_v18, 0.0  ;;  %v3814_v10 = vmax.f32 %v3751_v1, 0.0 }
 0x489   : > { %4767 = vmatmul.bf16.gmra.mxu0 %v9584_v45  ;;  %4816 = vmatmul.bf16.gmra.mxu1 %v9586_v21  ;;  %v3820_v43 = vmax.f32 %v3656_v14, 0.0 }
 0x48a   : > { %4865 = vmatmul.bf16.gmra.mxu2 %v9600_v15  ;;  %4914 = vmatmul.bf16.gmra.mxu3 %v9602_v26  ;;  %v9768_v27 = vpack.c.bf16 %v3813_v56, %v3805_v23  ;;  %v9770_v22 = vpack.c.bf16 %v3814_v10, %v3806_v38  ;;  %v3819_v56 = vmax.f32 %v3607_v39, 0.0  ;;  %v7190_v10 = vld [vmem:[#allocation10 + $0x2b0] sm:$0xf] }
 0x48b   : > { %v7191_v42 = vor.u32 %v7674_v48, %v7190_v10 }
 0x48c   : > { %10272 = vst [vmem:[#allocation42_spill] sm:$0xff] %v9768_v27 }
 0x48d   : > { %10273 = vst [vmem:[#allocation43_spill] sm:$0xff] %v9770_v22  ;;  %v3704_v5 = vpop.f32.mrf.mxu2  ;;  %v3753_v18 = vpop.f32.mrf.mxu3  ;;  %4998 = vmatpush.bf16.msrb.mxu1 %v7191_v42  ;;  %v7656_v42 = vld [vmem:[#allocation10 + $0x224] sm:$0xf0] }
 0x48e   : > { %v3608_v1 = vpop.f32.mrf.mxu0  ;;  %v3657_v26 = vpop.f32.mrf.mxu1  ;;  %v3705_v6 = vadd.f32 %v3704_v5, %v9729_v58  ;;  %v3754_v25 = vadd.f32 %v3753_v18, %v9734_v47  ;;  %v7246_v5 = vld [vmem:[#allocation10 + $0x320] sm:$0xf]  ;;  %v7688_v18 = vld [vmem:[#allocation10 + $0x324] sm:$0xf0] }
 0x48f   : > { %v3609_v23 = vadd.f32 %v3608_v1, %v9713_v40  ;;  %v3658_v38 = vadd.f32 %v3657_v26, %v9716_v16 }
 0x491   : > { %v3827_v4 = vmax.f32 %v3609_v23, 0.0  ;;  %v3828_v51 = vmax.f32 %v3658_v38, 0.0  ;;  %v3821_v23 = vmax.f32 %v3705_v6, 0.0  ;;  %v3822_v38 = vmax.f32 %v3754_v25, 0.0  ;;  %v7310_v6 = vld [vmem:[#allocation10 + $0x3a0] sm:$0xf] }
 0x492   : > { %v7704_v25 = vld [vmem:[#allocation10 + $0x3a4] sm:$0xf0] }
 0x493   : > { %v9776_v9 = vpack.c.bf16 %v3827_v4, %v3819_v56  ;;  %v9778_v33 = vpack.c.bf16 %v3828_v51, %v3820_v43  ;;  %v7118_v56 = vld [vmem:[#allocation10 + $0x220] sm:$0xf]  ;;  %v7247_v51 = vor.u32 %v7688_v18, %v7246_v5  ;;  %v7672_v5 = vld [vmem:[#allocation10 + $0x2a4] sm:$0xf0] }
 0x495   : > { %v3706_v63 = vpop.f32.mrf.mxu2  ;;  %v3755_v55 = vpop.f32.mrf.mxu3  ;;  %5048 = vmatpush.bf16.msrb.mxu2 %v7247_v51 }
 0x496   : > { %v3707_v26 = vadd.f32 %v3706_v63, %v9729_v58  ;;  %v3756_v39 = vadd.f32 %v3755_v55, %v9734_v47  ;;  %v3611_v1 = vpop.f32.mrf.mxu0  ;;  %v3660_v14 = vpop.f32.mrf.mxu1  ;;  %v7119_v55 = vor.u32 %v7656_v42, %v7118_v56 }
 0x497   : > { %v3612_v63 = vadd.f32 %v3611_v1, %v9713_v40 }
 0x498   : > { %v3829_v10 = vmax.f32 %v3707_v26, 0.0  ;;  %v3830_v48 = vmax.f32 %v3756_v39, 0.0  ;;  %v7311_v26 = vor.u32 %v7704_v25, %v7310_v6  ;;  %v3661_v39 = vadd.f32 %v3660_v14, %v9716_v16  ;;  %4950 = vmatpush.bf16.msrb.mxu0 %v7119_v55 }
 0x499   : > { %4772 = vmatmul.bf16.gmra.mxu0 %v9608_v31  ;;  %4821 = vmatmul.bf16.gmra.mxu1 %v9610_v24 }
 0x49a   : > { %4870 = vmatmul.bf16.gmra.mxu2 %v9624_v7  ;;  %4919 = vmatmul.bf16.gmra.mxu3 %v9626_v36  ;;  %v9788_v43 = vpack.c.bf16 %v3829_v10, %v3821_v23  ;;  %v9790_v4 = vpack.c.bf16 %v3830_v48, %v3822_v38  ;;  %v3835_v10 = vmax.f32 %v3612_v63, 0.0  ;;  %v7182_v48 = vld [vmem:[#allocation10 + $0x2a0] sm:$0xf]  ;;  %v3836_v18 = vmax.f32 %v3661_v39, 0.0 }
 0x49b   : > { %5097 = vmatpush.bf16.msrb.mxu3 %v7311_v26  ;;  %v7183_v42 = vor.u32 %v7672_v5, %v7182_v48 }
 0x49c   : > { %10274 = vst [vmem:[#allocation44_spill] sm:$0xff] %v9788_v43 }
 0x49d   : > { %10275 = vst [vmem:[#allocation45_spill] sm:$0xff] %v9790_v4  ;;  %v3709_v7 = vpop.f32.mrf.mxu2  ;;  %v3758_v24 = vpop.f32.mrf.mxu3  ;;  %4999 = vmatpush.bf16.msrb.mxu1 %v7183_v42  ;;  %v7654_v42 = vld [vmem:[#allocation10 + $0x214] sm:$0xf0] }
 0x49e   : > { %v3613_v36 = vpop.f32.mrf.mxu0  ;;  %v3662_v31 = vpop.f32.mrf.mxu1  ;;  %v3710_v51 = vadd.f32 %v3709_v7, %v9729_v58  ;;  %v3759_v25 = vadd.f32 %v3758_v24, %v9734_v47  ;;  %v7238_v24 = vld [vmem:[#allocation10 + $0x310] sm:$0xf]  ;;  %v7686_v7 = vld [vmem:[#allocation10 + $0x314] sm:$0xf0] }
 0x49f   : > { %v3614_v23 = vadd.f32 %v3613_v36, %v9713_v40  ;;  %v3663_v38 = vadd.f32 %v3662_v31, %v9716_v16 }
 0x4a1   : > { %v3843_v1 = vmax.f32 %v3614_v23, 0.0  ;;  %v3844_v56 = vmax.f32 %v3663_v38, 0.0  ;;  %v3837_v23 = vmax.f32 %v3710_v51, 0.0  ;;  %v3838_v38 = vmax.f32 %v3759_v25, 0.0  ;;  %v7302_v51 = vld [vmem:[#allocation10 + $0x390] sm:$0xf] }
 0x4a2   : > { %v7702_v25 = vld [vmem:[#allocation10 + $0x394] sm:$0xf0] }
 0x4a3   : > { %v9796_v14 = vpack.c.bf16 %v3843_v1, %v3835_v10  ;;  %v9798_v6 = vpack.c.bf16 %v3844_v56, %v3836_v18  ;;  %v7110_v10 = vld [vmem:[#allocation10 + $0x210] sm:$0xf]  ;;  %v7239_v56 = vor.u32 %v7686_v7, %v7238_v24  ;;  %v7670_v24 = vld [vmem:[#allocation10 + $0x294] sm:$0xf0] }
 0x4a5   : > { %v3711_v55 = vpop.f32.mrf.mxu2  ;;  %v3760_v36 = vpop.f32.mrf.mxu3  ;;  %5049 = vmatpush.bf16.msrb.mxu2 %v7239_v56 }
 0x4a6   : > { %v3712_v31 = vadd.f32 %v3711_v55, %v9729_v58  ;;  %v3761_v63 = vadd.f32 %v3760_v36, %v9734_v47  ;;  %v3616_v26 = vpop.f32.mrf.mxu0  ;;  %v3665_v39 = vpop.f32.mrf.mxu1  ;;  %v7111_v36 = vor.u32 %v7654_v42, %v7110_v10 }
 0x4a7   : > { %v3617_v55 = vadd.f32 %v3616_v26, %v9713_v40 }
 0x4a8   : > { %v3845_v48 = vmax.f32 %v3712_v31, 0.0  ;;  %v3846_v5 = vmax.f32 %v3761_v63, 0.0  ;;  %v7303_v31 = vor.u32 %v7702_v25, %v7302_v51  ;;  %v3666_v63 = vadd.f32 %v3665_v39, %v9716_v16  ;;  %4951 = vmatpush.bf16.msrb.mxu0 %v7111_v36 }
 0x4a9   : > { %4777 = vmatmul.bf16.gmra.mxu0 %v9632_v3  ;;  %4826 = vmatmul.bf16.gmra.mxu1 %v9634_v30 }
 0x4aa   : > { %4875 = vmatmul.bf16.gmra.mxu2 %v9648_v2  ;;  %4924 = vmatmul.bf16.gmra.mxu3 %v9650_v53  ;;  %v9808_v18 = vpack.c.bf16 %v3845_v48, %v3837_v23  ;;  %v9810_v1 = vpack.c.bf16 %v3846_v5, %v3838_v38  ;;  %v3851_v48 = vmax.f32 %v3617_v55, 0.0  ;;  %v7174_v5 = vld [vmem:[#allocation10 + $0x290] sm:$0xf]  ;;  %v3852_v7 = vmax.f32 %v3666_v63, 0.0 }
 0x4ab   : > { %5098 = vmatpush.bf16.msrb.mxu3 %v7303_v31  ;;  %v7175_v42 = vor.u32 %v7670_v24, %v7174_v5 }
 0x4ac   : > { %10276 = vst [vmem:[#allocation46_spill] sm:$0xff] %v9808_v18 }
 0x4ad   : > { %10277 = vst [vmem:[#allocation47_spill] sm:$0xff] %v9810_v1  ;;  %v3714_v2 = vpop.f32.mrf.mxu2  ;;  %v3763_v30 = vpop.f32.mrf.mxu3  ;;  %5000 = vmatpush.bf16.msrb.mxu1 %v7175_v42  ;;  %v7652_v42 = vld [vmem:[#allocation10 + $0x204] sm:$0xf0] }
 0x4ae   : > { %v3618_v53 = vpop.f32.mrf.mxu0  ;;  %v3667_v3 = vpop.f32.mrf.mxu1  ;;  %v3715_v56 = vadd.f32 %v3714_v2, %v9729_v58  ;;  %v3764_v25 = vadd.f32 %v3763_v30, %v9734_v47  ;;  %v7230_v30 = vld [vmem:[#allocation10 + $0x300] sm:$0xf]  ;;  %v7684_v2 = vld [vmem:[#allocation10 + $0x304] sm:$0xf0] }
 0x4af   : > { %v3619_v23 = vadd.f32 %v3618_v53, %v9713_v40  ;;  %v3668_v38 = vadd.f32 %v3667_v3, %v9716_v16 }
 0x4b1   : > { %v3859_v26 = vmax.f32 %v3619_v23, 0.0  ;;  %v3860_v10 = vmax.f32 %v3668_v38, 0.0  ;;  %v3853_v23 = vmax.f32 %v3715_v56, 0.0  ;;  %v3854_v38 = vmax.f32 %v3764_v25, 0.0  ;;  %v7294_v56 = vld [vmem:[#allocation10 + $0x380] sm:$0xf] }
 0x4b2   : > { %v7700_v25 = vld [vmem:[#allocation10 + $0x384] sm:$0xf0] }
 0x4b3   : > { %v9816_v39 = vpack.c.bf16 %v3859_v26, %v3851_v48  ;;  %v9818_v51 = vpack.c.bf16 %v3860_v10, %v3852_v7  ;;  %v7102_v48 = vld [vmem:[#allocation10 + $0x200] sm:$0xf]  ;;  %v7231_v10 = vor.u32 %v7684_v2, %v7230_v30  ;;  %v7668_v30 = vld [vmem:[#allocation10 + $0x284] sm:$0xf0] }
 0x4b5   : > { %v3716_v36 = vpop.f32.mrf.mxu2  ;;  %v3765_v53 = vpop.f32.mrf.mxu3  ;;  %5050 = vmatpush.bf16.msrb.mxu2 %v7231_v10 }
 0x4b6   : > { %v3717_v3 = vadd.f32 %v3716_v36, %v9729_v58  ;;  %v3766_v55 = vadd.f32 %v3765_v53, %v9734_v47  ;;  %v3621_v31 = vpop.f32.mrf.mxu0  ;;  %v3670_v63 = vpop.f32.mrf.mxu1  ;;  %v7103_v53 = vor.u32 %v7652_v42, %v7102_v48 }
 0x4b7   : > { %v3622_v36 = vadd.f32 %v3621_v31, %v9713_v40 }
 0x4b8   : > { %v3861_v5 = vmax.f32 %v3717_v3, 0.0  ;;  %v3862_v24 = vmax.f32 %v3766_v55, 0.0  ;;  %v7295_v3 = vor.u32 %v7700_v25, %v7294_v56  ;;  %v3671_v55 = vadd.f32 %v3670_v63, %v9716_v16  ;;  %4952 = vmatpush.bf16.msrb.mxu0 %v7103_v53 }
 0x4b9   : > { %4782 = vmatmul.bf16.gmra.mxu0 %v9656_v52  ;;  %4831 = vmatmul.bf16.gmra.mxu1 %v9658_v57 }
 0x4ba   : > { %4880 = vmatmul.bf16.gmra.mxu2 %v9672_v0  ;;  %4929 = vmatmul.bf16.gmra.mxu3 %v9674_v28  ;;  %v9828_v7 = vpack.c.bf16 %v3861_v5, %v3853_v23  ;;  %v9830_v26 = vpack.c.bf16 %v3862_v24, %v3854_v38  ;;  %v3867_v5 = vmax.f32 %v3622_v36, 0.0  ;;  %v7166_v24 = vld [vmem:[#allocation10 + $0x280] sm:$0xf]  ;;  %v3868_v2 = vmax.f32 %v3671_v55, 0.0 }
 0x4bb   : > { %5099 = vmatpush.bf16.msrb.mxu3 %v7295_v3  ;;  %v7167_v42 = vor.u32 %v7668_v30, %v7166_v24 }
 0x4bc   : > { %10278 = vst [vmem:[#allocation48_spill] sm:$0xff] %v9828_v7 }
 0x4bd   : > { %10279 = vst [vmem:[#allocation49_spill] sm:$0xff] %v9830_v26  ;;  %v3719_v0 = vpop.f32.mrf.mxu2  ;;  %v3768_v57 = vpop.f32.mrf.mxu3  ;;  %5001 = vmatpush.bf16.msrb.mxu1 %v7167_v42  ;;  %v6904_v42 = vld [vmem:[#allocation10 + $0x78] sm:$0xf0] }
 0x4be   : > { %v3623_v28 = vpop.f32.mrf.mxu0  ;;  %v3672_v52 = vpop.f32.mrf.mxu1  ;;  %v3720_v10 = vadd.f32 %v3719_v0, %v9729_v58  ;;  %v3769_v25 = vadd.f32 %v3768_v57, %v9734_v47  ;;  %v7633_v57 = vld [vmem:[#allocation10 + $0x174] sm:$0xf]  ;;  %v7032_v0 = vld [vmem:[#allocation10 + $0x178] sm:$0xf0] }
 0x4bf   : > { %v3624_v23 = vadd.f32 %v3623_v28, %v9713_v40  ;;  %v3673_v38 = vadd.f32 %v3672_v52, %v9716_v16 }
 0x4c1   : > { %v3875_v31 = vmax.f32 %v3624_v23, 0.0  ;;  %v3876_v48 = vmax.f32 %v3673_v38, 0.0  ;;  %v3869_v23 = vmax.f32 %v3720_v10, 0.0  ;;  %v3870_v38 = vmax.f32 %v3769_v25, 0.0  ;;  %v7649_v10 = vld [vmem:[#allocation10 + $0x1f4] sm:$0xf] }
 0x4c2   : > { %v7096_v25 = vld [vmem:[#allocation10 + $0x1f8] sm:$0xf0] }
 0x4c3   : > { %v9836_v63 = vpack.c.bf16 %v3875_v31, %v3867_v5  ;;  %v9838_v56 = vpack.c.bf16 %v3876_v48, %v3868_v2  ;;  %v7601_v5 = vld [vmem:[#allocation10 + $0x74] sm:$0xf]  ;;  %v7035_v48 = vor.u32 %v7633_v57, %v7032_v0  ;;  %v6968_v57 = vld [vmem:[#allocation10 + $0xf8] sm:$0xf0] }
 0x4c5   : > { %v3721_v53 = vpop.f32.mrf.mxu2  ;;  %v3770_v28 = vpop.f32.mrf.mxu3  ;;  %5239 = vmatpush.bf16.msra.mxu2 %v7035_v48 }
 0x4c6   : > { %v3722_v52 = vadd.f32 %v3721_v53, %v9729_v58  ;;  %v3771_v36 = vadd.f32 %v3770_v28, %v9734_v47  ;;  %v3626_v3 = vpop.f32.mrf.mxu0  ;;  %v3675_v55 = vpop.f32.mrf.mxu1  ;;  %v6907_v28 = vor.u32 %v7601_v5, %v6904_v42 }
 0x4c7   : > { %v3627_v53 = vadd.f32 %v3626_v3, %v9713_v40 }
 0x4c8   : > { %v3877_v24 = vmax.f32 %v3722_v52, 0.0  ;;  %v3878_v30 = vmax.f32 %v3771_v36, 0.0  ;;  %v7099_v52 = vor.u32 %v7649_v10, %v7096_v25  ;;  %v3676_v36 = vadd.f32 %v3675_v55, %v9716_v16  ;;  %5141 = vmatpush.bf16.msra.mxu0 %v6907_v28 }
 0x4c9   : > { %4787 = vmatmul.bf16.gmra.mxu0 %v9680_v37  ;;  %4836 = vmatmul.bf16.gmra.mxu1 %v9682_v59 }
 0x4ca   : > { %4885 = vmatmul.bf16.gmra.mxu2 %v9696_v62  ;;  %4934 = vmatmul.bf16.gmra.mxu3 %v9698_v11  ;;  %v9848_v2 = vpack.c.bf16 %v3877_v24, %v3869_v23  ;;  %v9850_v31 = vpack.c.bf16 %v3878_v30, %v3870_v38  ;;  %v3883_v24 = vmax.f32 %v3627_v53, 0.0  ;;  %v7617_v30 = vld [vmem:[#allocation10 + $0xf4] sm:$0xf]  ;;  %v3884_v0 = vmax.f32 %v3676_v36, 0.0 }
 0x4cb   : > { %5288 = vmatpush.bf16.msra.mxu3 %v7099_v52  ;;  %v6971_v42 = vor.u32 %v7617_v30, %v6968_v57 }
 0x4cc   : > { %10280 = vst [vmem:[#allocation50_spill] sm:$0xff] %v9848_v2 }
 0x4cd   : > { %10281 = vst [vmem:[#allocation51_spill] sm:$0xff] %v9850_v31  ;;  %v3724_v62 = vpop.f32.mrf.mxu2  ;;  %v3773_v59 = vpop.f32.mrf.mxu3  ;;  %5190 = vmatpush.bf16.msra.mxu1 %v6971_v42  ;;  %v6896_v42 = vld [vmem:[#allocation10 + $0x68] sm:$0xf0] }
 0x4ce   : > { %v3628_v11 = vpop.f32.mrf.mxu0  ;;  %v3677_v37 = vpop.f32.mrf.mxu1  ;;  %v3725_v48 = vadd.f32 %v3724_v62, %v9729_v58  ;;  %v3774_v25 = vadd.f32 %v3773_v59, %v9734_v47  ;;  %v7631_v59 = vld [vmem:[#allocation10 + $0x164] sm:$0xf]  ;;  %v7024_v62 = vld [vmem:[#allocation10 + $0x168] sm:$0xf0] }
 0x4cf   : > { %v3629_v23 = vadd.f32 %v3628_v11, %v9713_v40  ;;  %v3678_v38 = vadd.f32 %v3677_v37, %v9716_v16 }
 0x4d1   : > { %v3891_v3 = vmax.f32 %v3629_v23, 0.0  ;;  %v3892_v5 = vmax.f32 %v3678_v38, 0.0  ;;  %v3885_v23 = vmax.f32 %v3725_v48, 0.0  ;;  %v3886_v38 = vmax.f32 %v3774_v25, 0.0  ;;  %v7647_v48 = vld [vmem:[#allocation10 + $0x1e4] sm:$0xf] }
 0x4d2   : > { %v7088_v25 = vld [vmem:[#allocation10 + $0x1e8] sm:$0xf0] }
 0x4d3   : > { %v9856_v55 = vpack.c.bf16 %v3891_v3, %v3883_v24  ;;  %v9858_v10 = vpack.c.bf16 %v3892_v5, %v3884_v0  ;;  %v7599_v24 = vld [vmem:[#allocation10 + $0x64] sm:$0xf]  ;;  %v7027_v5 = vor.u32 %v7631_v59, %v7024_v62  ;;  %v6960_v62 = vld [vmem:[#allocation10 + $0xe8] sm:$0xf0] }
 0x4d4   : > { %v7615_v59 = vld [vmem:[#allocation10 + $0xe4] sm:$0xf] }
 0x4d5   : > { %10282 = vst [vmem:[#allocation52_spill] sm:$0xff] %v9858_v10  ;;  %v3726_v28 = vpop.f32.mrf.mxu2  ;;  %v3775_v11 = vpop.f32.mrf.mxu3  ;;  %5240 = vmatpush.bf16.msra.mxu2 %v7027_v5 }
 0x4d6   : > { %v3727_v37 = vadd.f32 %v3726_v28, %v9729_v58  ;;  %v3776_v53 = vadd.f32 %v3775_v11, %v9734_v47  ;;  %v3631_v52 = vpop.f32.mrf.mxu0  ;;  %v3680_v36 = vpop.f32.mrf.mxu1  ;;  %v6899_v11 = vor.u32 %v7599_v24, %v6896_v42 }
 0x4d7   : > { %v3632_v28 = vadd.f32 %v3631_v52, %v9713_v40 }
 0x4d8   : > { %v3893_v30 = vmax.f32 %v3727_v37, 0.0  ;;  %v3894_v57 = vmax.f32 %v3776_v53, 0.0  ;;  %v7091_v37 = vor.u32 %v7647_v48, %v7088_v25  ;;  %v3681_v53 = vadd.f32 %v3680_v36, %v9716_v16  ;;  %5142 = vmatpush.bf16.msra.mxu0 %v6899_v11 }
 0x4d9   : > { %4792 = vmatmul.bf16.gmra.mxu0 %v9704_v41  ;;  %4841 = vmatmul.bf16.gmra.mxu1 %v9706_v50  ;;  %v6963_v48 = vor.u32 %v7615_v59, %v6960_v62 }
 0x4da   : > { %4890 = vmatmul.bf16.gmra.mxu2 %v9722_v60  ;;  %4939 = vmatmul.bf16.gmra.mxu3 %v9724_v8  ;;  %v9868_v0 = vpack.c.bf16 %v3893_v30, %v3885_v23  ;;  %v9870_v3 = vpack.c.bf16 %v3894_v57, %v3886_v38  ;;  %v4103_v30 = vld [vmem:[#allocation11] sm:$0x3]  ;;  %v3899_v57 = vmax.f32 %v3632_v28, 0.0  ;;  %v3900_v52 = vmax.f32 %v3681_v53, 0.0 }
 0x4db   : > { %5289 = vmatpush.bf16.msra.mxu3 %v7091_v37  ;;  %v9876_v36 = vperm.slane %v4103_v30, 0  ;;  %5191 = vmatpush.bf16.msra.mxu1 %v6963_v48  ;;  %v7645_v48 = vld [vmem:[#allocation10 + $0x1d4] sm:$0xf] }
 0x4dc   : > { %10283 = vst [vmem:[#allocation53_spill] sm:$0xff] %v9868_v0 }
 0x4dd   : > { %10284 = vst [vmem:[#allocation54_spill] sm:$0xff] %v9870_v3  ;;  %v3729_v60 = vpop.f32.mrf.mxu2  ;;  %v3778_v50 = vpop.f32.mrf.mxu3 }
 0x4de   : > { %v3633_v8 = vpop.f32.mrf.mxu0  ;;  %v3682_v41 = vpop.f32.mrf.mxu1  ;;  %v3730_v11 = vadd.f32 %v3729_v60, %v9729_v58  ;;  %v7016_v60 = vld [vmem:[#allocation10 + $0x158] sm:$0xf0] }
 0x4df   : > { %v3634_v23 = vadd.f32 %v3633_v8, %v9713_v40  ;;  %v3683_v38 = vadd.f32 %v3682_v41, %v9716_v16  ;;  %v3779_v40 = vadd.f32 %v3778_v50, %v9734_v47  ;;  %v7629_v50 = vld [vmem:[#allocation10 + $0x154] sm:$0xf] }
 0x4e1   : > { %v3907_v24 = vmax.f32 %v3634_v23, 0.0  ;;  %v3908_v42 = vmax.f32 %v3683_v38, 0.0  ;;  %v3901_v38 = vmax.f32 %v3730_v11, 0.0  ;;  %v3902_v30 = vmax.f32 %v3779_v40, 0.0  ;;  %v7080_v11 = vld [vmem:[#allocation10 + $0x1d8] sm:$0xf0] }
 0x4e3   : > { %v9878_v5 = vpack.c.bf16 %v3907_v24, %v3899_v57  ;;  %v9880_v25 = vpack.c.bf16 %v3908_v42, %v3900_v52  ;;  %v7019_v24 = vor.u32 %v7629_v50, %v7016_v60  ;;  %v6888_v42 = vld [vmem:[#allocation10 + $0x58] sm:$0xf0] }
 0x4e5   : > { %v3731_v41 = vpop.f32.mrf.mxu2  ;;  %v3780_v16 = vpop.f32.mrf.mxu3  ;;  %5241 = vmatpush.bf16.msra.mxu2 %v7019_v24 }
 0x4e6   : > { %v3732_v8 = vadd.f32 %v3731_v41, %v9729_v58  ;;  %v3781_v28 = vadd.f32 %v3780_v16, %v9734_v47  ;;  %v4758_v37 = vpop.f32.mrf.mxu0  ;;  %v4807_v53 = vpop.f32.mrf.mxu1  ;;  %v7597_v58 = vld [vmem:[#allocation10 + $0x54] sm:$0xf]  ;;  %v7083_v41 = vor.u32 %v7645_v48, %v7080_v11 }
 0x4e7   : > { %v4759_v23 = vadd.f32 %v4758_v37, %v9876_v36  ;;  %v6891_v40 = vor.u32 %v7597_v58, %v6888_v42 }
 0x4e8   : > { %v3909_v57 = vmax.f32 %v3732_v8, 0.0  ;;  %v3910_v59 = vmax.f32 %v3781_v28, 0.0  ;;  %5290 = vmatpush.bf16.msra.mxu3 %v7083_v41  ;;  %v7627_v41 = vld [vmem:[#allocation10 + $0x144] sm:$0xf] }
 0x4e9   : > { %v4808_v62 = vadd.f32 %v4807_v53, %v4759_v23  ;;  %4953 = vmatmul.bf16.vlgmr.msrb.gmra.mxu0 %v9736_v49  ;;  %5002 = vmatmul.bf16.vlgmr.msrb.gmra.mxu1 %v9738_v32 }
 0x4ea   : > { %5051 = vmatmul.bf16.vlgmr.msrb.gmra.mxu2 %v9746_v13  ;;  %5100 = vmatmul.bf16.vlgmr.msrb.gmra.mxu3 %v9748_v54  ;;  %v9891_v47 = vpack.c.bf16 %v3909_v57, %v3901_v38  ;;  %v9893_v52 = vpack.c.bf16 %v3910_v59, %v3902_v30  ;;  %v7613_v30 = vld [vmem:[#allocation10 + $0xd4] sm:$0xf]  ;;  %v6952_v57 = vld [vmem:[#allocation10 + $0xd8] sm:$0xf0] }
 0x4eb   : > { %5143 = vmatpush.bf16.msra.mxu0 %v6891_v40  ;;  %v6955_v50 = vor.u32 %v7613_v30, %v6952_v57 }
 0x4ed   : > { %v4856_v16 = vpop.f32.mrf.mxu2  ;;  %v4905_v8 = vpop.f32.mrf.mxu3  ;;  %5192 = vmatpush.bf16.msra.mxu1 %v6955_v50 }
 0x4ee   : > { %v4857_v28 = vadd.f32 %v4856_v16, %v4808_v62  ;;  %v4760_v37 = vpop.f32.mrf.mxu0  ;;  %v4809_v53 = vpop.f32.mrf.mxu1  ;;  %v7008_v16 = vld [vmem:[#allocation10 + $0x148] sm:$0xf0] }
 0x4ef   : > { %v4761_v23 = vadd.f32 %v4760_v37, %v9876_v36  ;;  %v6880_v37 = vld [vmem:[#allocation10 + $0x48] sm:$0xf0] }
 0x4f0   : > { %v9896_v38 = vadd.f32 %v4905_v8, %v4857_v28  ;;  %v7595_v8 = vld [vmem:[#allocation10 + $0x44] sm:$0xf]  ;;  %v7011_v28 = vor.u32 %v7627_v41, %v7008_v16 }
 0x4f1   : > { %v4810_v59 = vadd.f32 %v4809_v53, %v4761_v23  ;;  %v7643_v53 = vld [vmem:[#allocation10 + $0x1c4] sm:$0xf]  ;;  %v7072_v23 = vld [vmem:[#allocation10 + $0x1c8] sm:$0xf0]  ;;  %v6883_v30 = vor.u32 %v7595_v8, %v6880_v37 }
 0x4f2   : > { %v7075_v57 = vor.u32 %v7643_v53, %v7072_v23  ;;  %5242 = vmatpush.bf16.msra.mxu2 %v7011_v28 }
 0x4f3   : > { %5144 = vmatpush.bf16.msra.mxu0 %v6883_v30 }
 0x4f4   : > { %5291 = vmatpush.bf16.msra.mxu3 %v7075_v57  ;;  %v7000_v57 = vld [vmem:[#allocation10 + $0x138] sm:$0xf0] }
 0x4f5   : > { %v4858_v60 = vpop.f32.mrf.mxu2  ;;  %v4907_v58 = vpop.f32.mrf.mxu3 }
 0x4f6   : > { %v4859_v42 = vadd.f32 %v4858_v60, %v4810_v59  ;;  %v4763_v48 = vpop.f32.mrf.mxu0  ;;  %v4812_v11 = vpop.f32.mrf.mxu1 }
 0x4f7   : > { %v4764_v62 = vadd.f32 %v4763_v48, %v9876_v36 }
 0x4f8   : > { %v9899_v24 = vadd.f32 %v4907_v58, %v4859_v42 }
 0x4f9   : > { %v4813_v40 = vadd.f32 %v4812_v11, %v4764_v62  ;;  %4958 = vmatmul.bf16.gmra.mxu0 %v9756_v29  ;;  %5007 = vmatmul.bf16.gmra.mxu1 %v9758_v35  ;;  %v7611_v62 = vld [vmem:[#allocation10 + $0xc4] sm:$0xf] }
 0x4fa   : > { %5056 = vmatmul.bf16.gmra.mxu2 %v9768_v27  ;;  %5105 = vmatmul.bf16.gmra.mxu3 %v9770_v22  ;;  %v6944_v22 = vld [vmem:[#allocation10 + $0xc8] sm:$0xf0] }
 0x4fb   : > { %v6947_v16 = vor.u32 %v7611_v62, %v6944_v22  ;;  %v7625_v22 = vld [vmem:[#allocation10 + $0x134] sm:$0xf] }
 0x4fd   : > { %v4861_v59 = vpop.f32.mrf.mxu2  ;;  %v4910_v50 = vpop.f32.mrf.mxu3  ;;  %5193 = vmatpush.bf16.msra.mxu1 %v6947_v16 }
 0x4fe   : > { %v4862_v60 = vadd.f32 %v4861_v59, %v4813_v40  ;;  %v4765_v58 = vpop.f32.mrf.mxu0  ;;  %v4814_v42 = vpop.f32.mrf.mxu1  ;;  %v7593_v59 = vld [vmem:[#allocation10 + $0x34] sm:$0xf] }
 0x4ff   : > { %v4766_v48 = vadd.f32 %v4765_v58, %v9876_v36  ;;  %v7064_v58 = vld [vmem:[#allocation10 + $0x1b8] sm:$0xf0] }
 0x500   : > { %v9906_v11 = vadd.f32 %v4910_v50, %v4862_v60  ;;  %v7003_v50 = vor.u32 %v7625_v22, %v7000_v57  ;;  %v7641_v60 = vld [vmem:[#allocation10 + $0x1b4] sm:$0xf] }
 0x501   : > { %v4815_v41 = vadd.f32 %v4814_v42, %v4766_v48  ;;  %v7067_v48 = vor.u32 %v7641_v60, %v7064_v58 }
 0x502   : > { %5243 = vmatpush.bf16.msra.mxu2 %v7003_v50 }
 0x503   : > { %5292 = vmatpush.bf16.msra.mxu3 %v7067_v48  ;;  %v6992_v48 = vld [vmem:[#allocation10 + $0x128] sm:$0xf0] }
 0x505   : > { %v4863_v27 = vpop.f32.mrf.mxu2  ;;  %v4912_v8 = vpop.f32.mrf.mxu3 }
 0x506   : > { %v4864_v37 = vadd.f32 %v4863_v27, %v4815_v41  ;;  %v4768_v53 = vpop.f32.mrf.mxu0  ;;  %v4817_v23 = vpop.f32.mrf.mxu1  ;;  %v6872_v27 = vld [vmem:[#allocation10 + $0x38] sm:$0xf0] }
 0x507   : > { %v4769_v40 = vadd.f32 %v4768_v53, %v9876_v36  ;;  %v6875_v42 = vor.u32 %v7593_v59, %v6872_v27 }
 0x508   : > { %v9909_v28 = vadd.f32 %v4912_v8, %v4864_v37 }
 0x509   : > { %v4818_v30 = vadd.f32 %v4817_v23, %v4769_v40  ;;  %4963 = vmatmul.bf16.gmra.mxu0 %v9776_v9  ;;  %5012 = vmatmul.bf16.gmra.mxu1 %v9778_v33  ;;  %v7609_v40 = vld [vmem:[#allocation10 + $0xb4] sm:$0xf] }
 0x50a   : > { %5061 = vmatmul.bf16.gmra.mxu2 %v9788_v43  ;;  %5110 = vmatmul.bf16.gmra.mxu3 %v9790_v4  ;;  %v6936_v4 = vld [vmem:[#allocation10 + $0xb8] sm:$0xf0] }
 0x50b   : > { %5145 = vmatpush.bf16.msra.mxu0 %v6875_v42  ;;  %v6939_v57 = vor.u32 %v7609_v40, %v6936_v4  ;;  %v7623_v4 = vld [vmem:[#allocation10 + $0x124] sm:$0xf] }
 0x50d   : > { %v4866_v62 = vpop.f32.mrf.mxu2  ;;  %v4915_v41 = vpop.f32.mrf.mxu3  ;;  %5194 = vmatpush.bf16.msra.mxu1 %v6939_v57 }
 0x50e   : > { %v4867_v16 = vadd.f32 %v4866_v62, %v4818_v30  ;;  %v4770_v8 = vpop.f32.mrf.mxu0  ;;  %v4819_v37 = vpop.f32.mrf.mxu1  ;;  %v7591_v62 = vld [vmem:[#allocation10 + $0x24] sm:$0xf] }
 0x50f   : > { %v4771_v53 = vadd.f32 %v4770_v8, %v9876_v36  ;;  %v7056_v8 = vld [vmem:[#allocation10 + $0x1a8] sm:$0xf0] }
 0x510   : > { %v9916_v23 = vadd.f32 %v4915_v41, %v4867_v16  ;;  %v6995_v41 = vor.u32 %v7623_v4, %v6992_v48  ;;  %v7639_v16 = vld [vmem:[#allocation10 + $0x1a4] sm:$0xf] }
 0x511   : > { %v4820_v22 = vadd.f32 %v4819_v37, %v4771_v53  ;;  %v7059_v53 = vor.u32 %v7639_v16, %v7056_v8 }
 0x512   : > { %5244 = vmatpush.bf16.msra.mxu2 %v6995_v41 }
 0x513   : > { %5293 = vmatpush.bf16.msra.mxu3 %v7059_v53  ;;  %v6984_v53 = vld [vmem:[#allocation10 + $0x118] sm:$0xf0] }
 0x515   : > { %v4868_v43 = vpop.f32.mrf.mxu2  ;;  %v4917_v59 = vpop.f32.mrf.mxu3 }
 0x516   : > { %v4869_v27 = vadd.f32 %v4868_v43, %v4820_v22  ;;  %v4773_v60 = vpop.f32.mrf.mxu0  ;;  %v4822_v58 = vpop.f32.mrf.mxu1  ;;  %v6864_v43 = vld [vmem:[#allocation10 + $0x28] sm:$0xf0] }
 0x517   : > { %v4774_v30 = vadd.f32 %v4773_v60, %v9876_v36  ;;  %v6867_v37 = vor.u32 %v7591_v62, %v6864_v43 }
 0x518   : > { %v9919_v50 = vadd.f32 %v4917_v59, %v4869_v27 }
 0x519   : > { %v4823_v42 = vadd.f32 %v4822_v58, %v4774_v30  ;;  %4968 = vmatmul.bf16.gmra.mxu0 %v9796_v14  ;;  %5017 = vmatmul.bf16.gmra.mxu1 %v9798_v6  ;;  %v7607_v30 = vld [vmem:[#allocation10 + $0xa4] sm:$0xf] }
 0x51a   : > { %5066 = vmatmul.bf16.gmra.mxu2 %v9808_v18  ;;  %5115 = vmatmul.bf16.gmra.mxu3 %v9810_v1  ;;  %v6928_v1 = vld [vmem:[#allocation10 + $0xa8] sm:$0xf0] }
 0x51b   : > { %5146 = vmatpush.bf16.msra.mxu0 %v6867_v37  ;;  %v6931_v48 = vor.u32 %v7607_v30, %v6928_v1  ;;  %v7621_v1 = vld [vmem:[#allocation10 + $0x114] sm:$0xf] }
 0x51d   : > { %v4871_v40 = vpop.f32.mrf.mxu2  ;;  %v4920_v22 = vpop.f32.mrf.mxu3  ;;  %5195 = vmatpush.bf16.msra.mxu1 %v6931_v48 }
 0x51e   : > { %v4872_v57 = vadd.f32 %v4871_v40, %v4823_v42  ;;  %v4775_v59 = vpop.f32.mrf.mxu0  ;;  %v4824_v27 = vpop.f32.mrf.mxu1  ;;  %v7589_v40 = vld [vmem:[#allocation10 + $0x14] sm:$0xf] }
 0x51f   : > { %v4776_v60 = vadd.f32 %v4775_v59, %v9876_v36  ;;  %v7048_v59 = vld [vmem:[#allocation10 + $0x198] sm:$0xf0] }
 0x520   : > { %v9926_v58 = vadd.f32 %v4920_v22, %v4872_v57  ;;  %v6987_v22 = vor.u32 %v7621_v1, %v6984_v53  ;;  %v7637_v57 = vld [vmem:[#allocation10 + $0x194] sm:$0xf] }
 0x521   : > { %v4825_v4 = vadd.f32 %v4824_v27, %v4776_v60  ;;  %v7051_v60 = vor.u32 %v7637_v57, %v7048_v59 }
 0x522   : > { %5245 = vmatpush.bf16.msra.mxu2 %v6987_v22 }
 0x523   : > { %5294 = vmatpush.bf16.msra.mxu3 %v7051_v60  ;;  %v6976_v60 = vld [vmem:[#allocation10 + $0x108] sm:$0xf0] }
 0x525   : > { %v4873_v18 = vpop.f32.mrf.mxu2  ;;  %v4922_v62 = vpop.f32.mrf.mxu3 }
 0x526   : > { %v4874_v43 = vadd.f32 %v4873_v18, %v4825_v4  ;;  %v4778_v16 = vpop.f32.mrf.mxu0  ;;  %v4827_v8 = vpop.f32.mrf.mxu1  ;;  %v6856_v18 = vld [vmem:[#allocation10 + $0x18] sm:$0xf0] }
 0x527   : > { %v4779_v42 = vadd.f32 %v4778_v16, %v9876_v36  ;;  %v6859_v27 = vor.u32 %v7589_v40, %v6856_v18 }
 0x528   : > { %v9929_v41 = vadd.f32 %v4922_v62, %v4874_v43 }
 0x529   : > { %v4828_v37 = vadd.f32 %v4827_v8, %v4779_v42  ;;  %4973 = vmatmul.bf16.gmra.mxu0 %v9816_v39  ;;  %5022 = vmatmul.bf16.gmra.mxu1 %v9818_v51  ;;  %v7605_v42 = vld [vmem:[#allocation10 + $0x94] sm:$0xf] }
 0x52a   : > { %5071 = vmatmul.bf16.gmra.mxu2 %v9828_v7  ;;  %5120 = vmatmul.bf16.gmra.mxu3 %v9830_v26  ;;  %v6920_v26 = vld [vmem:[#allocation10 + $0x98] sm:$0xf0] }
 0x52b   : > { %5147 = vmatpush.bf16.msra.mxu0 %v6859_v27  ;;  %v6923_v53 = vor.u32 %v7605_v42, %v6920_v26  ;;  %v7619_v26 = vld [vmem:[#allocation10 + $0x104] sm:$0xf] }
 0x52d   : > { %v4876_v30 = vpop.f32.mrf.mxu2  ;;  %v4925_v4 = vpop.f32.mrf.mxu3  ;;  %5196 = vmatpush.bf16.msra.mxu1 %v6923_v53 }
 0x52e   : > { %v4877_v48 = vadd.f32 %v4876_v30, %v4828_v37  ;;  %v4780_v62 = vpop.f32.mrf.mxu0  ;;  %v4829_v43 = vpop.f32.mrf.mxu1  ;;  %v7587_v30 = vld [vmem:[#allocation10 + $0x4] sm:$0xf] }
 0x52f   : > { %v4781_v16 = vadd.f32 %v4780_v62, %v9876_v36  ;;  %v7040_v62 = vld [vmem:[#allocation10 + $0x188] sm:$0xf0] }
 0x530   : > { %v9936_v8 = vadd.f32 %v4925_v4, %v4877_v48  ;;  %v6979_v4 = vor.u32 %v7619_v26, %v6976_v60  ;;  %v7635_v48 = vld [vmem:[#allocation10 + $0x184] sm:$0xf] }
 0x531   : > { %v4830_v1 = vadd.f32 %v4829_v43, %v4781_v16  ;;  %v7043_v16 = vor.u32 %v7635_v48, %v7040_v62 }
 0x532   : > { %5246 = vmatpush.bf16.msra.mxu2 %v6979_v4 }
 0x533   : > { %5295 = vmatpush.bf16.msra.mxu3 %v7043_v16  ;;  %v7288_v16 = vld [vmem:[#allocation10 + $0x378] sm:$0xf0] }
 0x535   : > { %v4878_v7 = vpop.f32.mrf.mxu2  ;;  %v4927_v40 = vpop.f32.mrf.mxu3 }
 0x536   : > { %v4879_v18 = vadd.f32 %v4878_v7, %v4830_v1  ;;  %v4783_v57 = vpop.f32.mrf.mxu0  ;;  %v4832_v59 = vpop.f32.mrf.mxu1  ;;  %v6848_v7 = vld [vmem:[#allocation10 + $0x8] sm:$0xf0] }
 0x537   : > { %v4784_v37 = vadd.f32 %v4783_v57, %v9876_v36  ;;  %v6851_v43 = vor.u32 %v7587_v30, %v6848_v7 }
 0x538   : > { %v9939_v22 = vadd.f32 %v4927_v40, %v4879_v18 }
 0x539   : > { %v4833_v27 = vadd.f32 %v4832_v59, %v4784_v37  ;;  %4978 = vmatmul.bf16.gmra.mxu0 %v9836_v63  ;;  %5027 = vmatmul.bf16.gmra.mxu1 %v9838_v56  ;;  %v7603_v37 = vld [vmem:[#allocation10 + $0x84] sm:$0xf] }
 0x53a   : > { %5076 = vmatmul.bf16.gmra.mxu2 %v9848_v2  ;;  %5125 = vmatmul.bf16.gmra.mxu3 %v9850_v31  ;;  %v6912_v31 = vld [vmem:[#allocation10 + $0x88] sm:$0xf0] }
 0x53b   : > { %5148 = vmatpush.bf16.msra.mxu0 %v6851_v43  ;;  %v6915_v60 = vor.u32 %v7603_v37, %v6912_v31  ;;  %v7697_v31 = vld [vmem:[#allocation10 + $0x374] sm:$0xf] }
 0x53d   : > { %v4881_v42 = vpop.f32.mrf.mxu2  ;;  %v4930_v1 = vpop.f32.mrf.mxu3  ;;  %5197 = vmatpush.bf16.msra.mxu1 %v6915_v60 }
 0x53e   : > { %v4882_v53 = vadd.f32 %v4881_v42, %v4833_v27  ;;  %v4785_v40 = vpop.f32.mrf.mxu0  ;;  %v4834_v18 = vpop.f32.mrf.mxu1  ;;  %v7665_v42 = vld [vmem:[#allocation10 + $0x274] sm:$0xf] }
 0x53f   : > { %v4786_v57 = vadd.f32 %v4785_v40, %v9876_v36  ;;  %v7352_v40 = vld [vmem:[#allocation10 + $0x3f8] sm:$0xf0] }
 0x540   : > { %v9946_v59 = vadd.f32 %v4930_v1, %v4882_v53  ;;  %v7291_v1 = vor.u32 %v7697_v31, %v7288_v16  ;;  %v7713_v53 = vld [vmem:[#allocation10 + $0x3f4] sm:$0xf] }
 0x541   : > { %v4835_v26 = vadd.f32 %v4834_v18, %v4786_v57  ;;  %v7355_v57 = vor.u32 %v7713_v53, %v7352_v40 }
 0x542   : > { %5435 = vmatpush.bf16.msrb.mxu2 %v7291_v1 }
 0x543   : > { %5484 = vmatpush.bf16.msrb.mxu3 %v7355_v57 }
 0x545   : > { %v4883_v2 = vpop.f32.mrf.mxu2  ;;  %v4932_v30 = vpop.f32.mrf.mxu3 }
 0x546   : > { %v4884_v7 = vadd.f32 %v4883_v2, %v4835_v26  ;;  %v4788_v48 = vpop.f32.mrf.mxu0  ;;  %v4837_v62 = vpop.f32.mrf.mxu1  ;;  %v7160_v2 = vld [vmem:[#allocation10 + $0x278] sm:$0xf0] }
 0x547   : > { %v4789_v27 = vadd.f32 %v4788_v48, %v9876_v36  ;;  %v7163_v18 = vor.u32 %v7665_v42, %v7160_v2 }
 0x548   : > { %v9949_v4 = vadd.f32 %v4932_v30, %v4884_v7 }
 0x549   : > { %v4838_v43 = vadd.f32 %v4837_v62, %v4789_v27  ;;  %4983 = vmatmul.bf16.gmra.mxu0 %v9856_v55  ;;  %5032 = vmatmul.bf16.gmra.mxu1 %v9858_v10 }
 0x54a   : > { %5081 = vmatmul.bf16.gmra.mxu2 %v9868_v0  ;;  %5130 = vmatmul.bf16.gmra.mxu3 %v9870_v3 }
 0x54b   : > { %5337 = vmatpush.bf16.msrb.mxu0 %v7163_v18 }
 0x54d   : > { %v4886_v37 = vpop.f32.mrf.mxu2  ;;  %v4935_v26 = vpop.f32.mrf.mxu3 }
 0x54e   : > { %v4887_v60 = vadd.f32 %v4886_v37, %v4838_v43  ;;  %v4790_v30 = vpop.f32.mrf.mxu0  ;;  %v4839_v7 = vpop.f32.mrf.mxu1 }
 0x54f   : > { %v4791_v48 = vadd.f32 %v4790_v30, %v9876_v36 }
 0x550   : > { %v9956_v62 = vadd.f32 %v4935_v26, %v4887_v60 }
 0x551   : > { %v4840_v27 = vadd.f32 %v4839_v7, %v4791_v48  ;;  %v7681_v48 = vld [vmem:[#allocation10 + $0x2f4] sm:$0xf] }
 0x555   : > { %v4888_v3 = vpop.f32.mrf.mxu2  ;;  %v4937_v31 = vpop.f32.mrf.mxu3 }
 0x556   : > { %v4889_v16 = vadd.f32 %v4888_v3, %v4840_v27  ;;  %v4793_v0 = vpop.f32.mrf.mxu0  ;;  %v4842_v10 = vpop.f32.mrf.mxu1  ;;  %v7224_v27 = vld [vmem:[#allocation10 + $0x2f8] sm:$0xf0] }
 0x557   : > { %v4794_v42 = vadd.f32 %v4793_v0, %v9876_v36 }
 0x558   : > { %v9959_v2 = vadd.f32 %v4937_v31, %v4889_v16  ;;  %v7227_v31 = vor.u32 %v7681_v48, %v7224_v27 }
 0x559   : > { %v4843_v1 = vadd.f32 %v4842_v10, %v4794_v42  ;;  %4988 = vmatmul.bf16.gmra.mxu0 %v9878_v5  ;;  %5037 = vmatmul.bf16.gmra.mxu1 %v9880_v25 }
 0x55a   : > { %5086 = vmatmul.bf16.gmra.mxu2 %v9891_v47  ;;  %5135 = vmatmul.bf16.gmra.mxu3 %v9893_v52 }
 0x55b   : > { %5386 = vmatpush.bf16.msrb.mxu1 %v7227_v31 }
 0x55d   : > { %v4891_v43 = vpop.f32.mrf.mxu2  ;;  %v4940_v53 = vpop.f32.mrf.mxu3 }
 0x55e   : > { %v4892_v40 = vadd.f32 %v4891_v43, %v4843_v1  ;;  %v4795_v18 = vpop.f32.mrf.mxu0  ;;  %v4844_v3 = vpop.f32.mrf.mxu1 }
 0x55f   : > { %v4796_v57 = vadd.f32 %v4795_v18, %v9876_v36 }
 0x560   : > { %v9966_v37 = vadd.f32 %v4940_v53, %v4892_v40 }
 0x561   : > { %v4845_v0 = vadd.f32 %v4844_v3, %v4796_v57  ;;  %v7695_v3 = vld [vmem:[#allocation10 + $0x364] sm:$0xf]  ;;  %v7280_v57 = vld [vmem:[#allocation10 + $0x368] sm:$0xf0] }
 0x565   : > { %v4893_v26 = vpop.f32.mrf.mxu2  ;;  %v4942_v10 = vpop.f32.mrf.mxu3 }
 0x566   : > { %v4894_v60 = vadd.f32 %v4893_v26, %v4845_v0  ;;  %v4954_v30 = vpop.f32.mrf.mxu0  ;;  %v5003_v7 = vpop.f32.mrf.mxu1  ;;  %v7663_v0 = vld [vmem:[#allocation10 + $0x264] sm:$0xf]  ;;  %v7283_v26 = vor.u32 %v7695_v3, %v7280_v57  ;;  %v7216_v57 = vld [vmem:[#allocation10 + $0x2e8] sm:$0xf0] }
 0x567   : > { %v4955_v42 = vadd.f32 %v4954_v30, %v9896_v38  ;;  %v7152_v38 = vld [vmem:[#allocation10 + $0x268] sm:$0xf0]  ;;  %v7679_v3 = vld [vmem:[#allocation10 + $0x2e4] sm:$0xf] }
 0x568   : > { %v9968_v16 = vadd.f32 %v4942_v10, %v4894_v60  ;;  %v7711_v10 = vld [vmem:[#allocation10 + $0x3e4] sm:$0xf]  ;;  %5436 = vmatpush.bf16.msrb.mxu2 %v7283_v26 }
 0x569   : > { %5149 = vmatmul.bf16.vlgmr.msra.gmra.mxu0 %v9536_v19  ;;  %5198 = vmatmul.bf16.vlgmr.msra.gmra.mxu1 %v9538_v34  ;;  %v5004_v36 = vadd.f32 %v5003_v7, %v4955_v42  ;;  %v7344_v19 = vld [vmem:[#allocation10 + $0x3e8] sm:$0xf0] }
 0x56a   : > { %5247 = vmatmul.bf16.vlgmr.msra.gmra.mxu2 %v9548_v44  ;;  %5296 = vmatmul.bf16.vlgmr.msra.gmra.mxu3 %v9550_v61  ;;  %v7155_v44 = vor.u32 %v7663_v0, %v7152_v38  ;;  %v7347_v30 = vor.u32 %v7711_v10, %v7344_v19 }
 0x56c   : > { %5338 = vmatpush.bf16.msrb.mxu0 %v7155_v44  ;;  %5485 = vmatpush.bf16.msrb.mxu3 %v7347_v30  ;;  %v7661_v44 = vld [vmem:[#allocation10 + $0x254] sm:$0xf]  ;;  %v7144_v30 = vld [vmem:[#allocation10 + $0x258] sm:$0xf0] }
 0x56d   : > { %v5052_v1 = vpop.f32.mrf.mxu2  ;;  %v5101_v43 = vpop.f32.mrf.mxu3 }
 0x56e   : > { %v5053_v53 = vadd.f32 %v5052_v1, %v5004_v36  ;;  %v4956_v40 = vpop.f32.mrf.mxu0  ;;  %v5005_v18 = vpop.f32.mrf.mxu1 }
 0x56f   : > { %v4957_v34 = vadd.f32 %v4956_v40, %v9899_v24 }
 0x570   : > { %v5102_v60 = vadd.f32 %v5101_v43, %v5053_v53  ;;  %v7219_v43 = vor.u32 %v7679_v3, %v7216_v57 }
 0x571   : > { %v5006_v48 = vadd.f32 %v5005_v18, %v4957_v34  ;;  %v7693_v34 = vld [vmem:[#allocation10 + $0x354] sm:$0xf] }
 0x572   : > { %v5533_v61 = vsub.f32 0.0, %v5102_v60  ;;  %5387 = vmatpush.bf16.msrb.mxu1 %v7219_v43 }
 0x574   : > { %v5565_v7 = vmul.f32 1.442695, %v5533_v61  ;;  %v7336_v61 = vld [vmem:[#allocation10 + $0x3d8] sm:$0xf0] }
 0x575   : > { %v5054_v27 = vpop.f32.mrf.mxu2  ;;  %v5103_v31 = vpop.f32.mrf.mxu3 }
 0x576   : > { %7824 = vpow2.f32 %v5565_v7  ;;  %v5055_v42 = vadd.f32 %v5054_v27, %v5006_v48  ;;  %v4959_v36 = vpop.f32.mrf.mxu0  ;;  %v5008_v1 = vpop.f32.mrf.mxu1  ;;  %v7147_v27 = vor.u32 %v7661_v44, %v7144_v30 }
 0x577   : > { %v4960_v24 = vadd.f32 %v4959_v36, %v9906_v11 }
 0x578   : > { %v5104_v53 = vadd.f32 %v5103_v31, %v5055_v42  ;;  %5339 = vmatpush.bf16.msrb.mxu0 %v7147_v27  ;;  %v7136_v27 = vld [vmem:[#allocation10 + $0x248] sm:$0xf0] }
 0x579   : > { %5154 = vmatmul.bf16.gmra.mxu0 %v9560_v17  ;;  %5203 = vmatmul.bf16.gmra.mxu1 %v9562_v12  ;;  %v5009_v26 = vadd.f32 %v5008_v1, %v4960_v24  ;;  %v7272_v12 = vld [vmem:[#allocation10 + $0x358] sm:$0xf0] }
 0x57a   : > { %v5535_v40 = vsub.f32 0.0, %v5104_v53  ;;  %5252 = vmatmul.bf16.gmra.mxu2 %v9576_v46  ;;  %5301 = vmatmul.bf16.gmra.mxu3 %v9578_v20  ;;  %v7275_v46 = vor.u32 %v7693_v34, %v7272_v12  ;;  %v7709_v20 = vld [vmem:[#allocation10 + $0x3d4] sm:$0xf] }
 0x57b   : > { %v7339_v31 = vor.u32 %v7709_v20, %v7336_v61 }
 0x57c   : > { %v7825_v18 = vpop.eup %7824  ;;  %v5569_v0 = vmul.f32 1.442695, %v5535_v40  ;;  %5437 = vmatpush.bf16.msrb.mxu2 %v7275_v46 }
 0x57d   : > { %v5629_v38 = vadd.f32 1.0, %v7825_v18  ;;  %v5057_v10 = vpop.f32.mrf.mxu2  ;;  %v5106_v19 = vpop.f32.mrf.mxu3  ;;  %5486 = vmatpush.bf16.msrb.mxu3 %v7339_v31  ;;  %v7707_v31 = vld [vmem:[#allocation10 + $0x3c4] sm:$0xf] }
 0x57e   : > { %7826 = vpow2.f32 %v5569_v0  ;;  %v5058_v11 = vadd.f32 %v5057_v10, %v5009_v26  ;;  %v4961_v60 = vpop.f32.mrf.mxu0  ;;  %v5010_v17 = vpop.f32.mrf.mxu1  ;;  %v7677_v0 = vld [vmem:[#allocation10 + $0x2d4] sm:$0xf]  ;;  %v7208_v26 = vld [vmem:[#allocation10 + $0x2d8] sm:$0xf0] }
 0x57f   : > { %7828 = vrcp.f32 %v5629_v38  ;;  %v4962_v48 = vadd.f32 %v4961_v60, %v9909_v28  ;;  %v7211_v38 = vor.u32 %v7677_v0, %v7208_v26  ;;  %v10285_v60 = vld [vmem:[#allocation21_spill] sm:$0xff] }
 0x580   : > { %v5107_v7 = vadd.f32 %v5106_v19, %v5058_v11 }
 0x581   : > { %v5011_v3 = vadd.f32 %v5010_v17, %v4962_v48  ;;  %5388 = vmatpush.bf16.msrb.mxu1 %v7211_v38 }
 0x582   : > { %v5537_v42 = vsub.f32 0.0, %v5107_v7  ;;  %v7691_v7 = vld [vmem:[#allocation10 + $0x344] sm:$0xf] }
 0x584   : > { %v7827_v36 = vpop.eup %7826  ;;  %v5573_v1 = vmul.f32 1.442695, %v5537_v42 }
 0x585   : > { %v7829_v57 = vpop.eup %7828  ;;  %v5631_v43 = vadd.f32 1.0, %v7827_v36  ;;  %v5059_v53 = vpop.f32.mrf.mxu2 }
 0x586   : > { %v5108_v24 = vpop.f32.mrf.mxu3  ;;  %5693 = vst [vmem:[%s9985_s25] sm:$0xff] %v7829_v57  ;;  %7830 = vpow2.f32 %v5573_v1  ;;  %v5060_v40 = vadd.f32 %v5059_v53, %v5011_v3  ;;  %v4964_v28 = vpop.f32.mrf.mxu0  ;;  %v7328_v3 = vld [vmem:[#allocation10 + $0x3c8] sm:$0xf0] }
 0x587   : > { %v5013_v18 = vpop.f32.mrf.mxu1  ;;  %7832 = vrcp.f32 %v5631_v43  ;;  %v4965_v19 = vadd.f32 %v4964_v28, %v9916_v23  ;;  %v7331_v57 = vor.u32 %v7707_v31, %v7328_v3  ;;  %v7657_v3 = vld [vmem:[#allocation10 + $0x234] sm:$0xf] }
 0x588   : > { %v5109_v10 = vadd.f32 %v5108_v24, %v5060_v40 }
 0x589   : > { %5159 = vmatmul.bf16.gmra.mxu0 %v9584_v45  ;;  %5208 = vmatmul.bf16.gmra.mxu1 %v9586_v21  ;;  %v5014_v12 = vadd.f32 %v5013_v18, %v4965_v19  ;;  %v7264_v21 = vld [vmem:[#allocation10 + $0x348] sm:$0xf0] }
 0x58a   : > { %v5539_v11 = vsub.f32 0.0, %v5109_v10  ;;  %5257 = vmatmul.bf16.gmra.mxu2 %v9600_v15  ;;  %5306 = vmatmul.bf16.gmra.mxu3 %v10285_v60  ;;  %v7267_v48 = vor.u32 %v7691_v7, %v7264_v21  ;;  %v7659_v15 = vld [vmem:[#allocation10 + $0x244] sm:$0xf] }
 0x58b   : > { %v7139_v1 = vor.u32 %v7659_v15, %v7136_v27  ;;  %5487 = vmatpush.bf16.msrb.mxu3 %v7331_v57  ;;  %v7128_v57 = vld [vmem:[#allocation10 + $0x238] sm:$0xf0] }
 0x58c   : > { %v7831_v17 = vpop.eup %7830  ;;  %v5577_v34 = vmul.f32 1.442695, %v5539_v11  ;;  %5438 = vmatpush.bf16.msrb.mxu2 %v7267_v48  ;;  %v7200_v11 = vld [vmem:[#allocation10 + $0x2c8] sm:$0xf0] }
 0x58d   : > { %v7833_v44 = vpop.eup %7832  ;;  %v5633_v46 = vadd.f32 1.0, %v7831_v17  ;;  %v5062_v30 = vpop.f32.mrf.mxu2  ;;  %5340 = vmatpush.bf16.msrb.mxu0 %v7139_v1 }
 0x58e   : > { %v5111_v20 = vpop.f32.mrf.mxu3  ;;  %5695 = vst [vmem:[%s9985_s25 + $0x10] sm:$0xff] %v7833_v44  ;;  %7834 = vpow2.f32 %v5577_v34  ;;  %v5063_v23 = vadd.f32 %v5062_v30, %v5014_v12  ;;  %v4966_v61 = vpop.f32.mrf.mxu0  ;;  %v10286_v12 = vld [vmem:[#allocation22_spill] sm:$0xff]  ;;  %v10287_v44 = vld [vmem:[#allocation23_spill] sm:$0xff]  ;;  %v10288_v30 = vld [vmem:[#allocation24_spill] sm:$0xff] }
 0x58f   : > { %v5015_v45 = vpop.f32.mrf.mxu1  ;;  %7836 = vrcp.f32 %v5633_v46  ;;  %v4967_v36 = vadd.f32 %v4966_v61, %v9919_v50  ;;  %v7675_v50 = vld [vmem:[#allocation10 + $0x2c4] sm:$0xf] }
 0x590   : > { %v5112_v42 = vadd.f32 %v5111_v20, %v5063_v23  ;;  %v7203_v60 = vor.u32 %v7675_v50, %v7200_v11  ;;  %v10289_v20 = vld [vmem:[#allocation25_spill] sm:$0xff] }
 0x591   : > { %v5016_v40 = vadd.f32 %v5015_v45, %v4967_v36  ;;  %v7256_v36 = vld [vmem:[#allocation10 + $0x338] sm:$0xf0] }
 0x592   : > { %v5541_v43 = vsub.f32 0.0, %v5112_v42  ;;  %5389 = vmatpush.bf16.msrb.mxu1 %v7203_v60  ;;  %v7689_v42 = vld [vmem:[#allocation10 + $0x334] sm:$0xf] }
 0x593   : > { %v7259_v1 = vor.u32 %v7689_v42, %v7256_v36 }
 0x594   : > { %v7835_v53 = vpop.eup %7834  ;;  %v5581_v24 = vmul.f32 1.442695, %v5541_v43  ;;  %v7705_v43 = vld [vmem:[#allocation10 + $0x3b4] sm:$0xf] }
 0x595   : > { %v7837_v28 = vpop.eup %7836  ;;  %v5635_v18 = vadd.f32 1.0, %v7835_v53  ;;  %v5064_v0 = vpop.f32.mrf.mxu2  ;;  %5439 = vmatpush.bf16.msrb.mxu2 %v7259_v1 }
 0x596   : > { %v5113_v26 = vpop.f32.mrf.mxu3  ;;  %5697 = vst [vmem:[%s9985_s25 + $0x20] sm:$0xff] %v7837_v28  ;;  %7838 = vpow2.f32 %v5581_v24  ;;  %v5065_v38 = vadd.f32 %v5064_v0, %v5016_v40  ;;  %v4969_v10 = vpop.f32.mrf.mxu0  ;;  %v7131_v40 = vor.u32 %v7657_v3, %v7128_v57  ;;  %v7320_v28 = vld [vmem:[#allocation10 + $0x3b8] sm:$0xf0]  ;;  %v7687_v57 = vld [vmem:[#allocation10 + $0x324] sm:$0xf] }
 0x597   : > { %v5018_v19 = vpop.f32.mrf.mxu1  ;;  %7840 = vrcp.f32 %v5635_v18  ;;  %v4970_v34 = vadd.f32 %v4969_v10, %v9926_v58  ;;  %v7323_v18 = vor.u32 %v7705_v43, %v7320_v28  ;;  %v7248_v43 = vld [vmem:[#allocation10 + $0x328] sm:$0xf0]  ;;  %v7703_v28 = vld [vmem:[#allocation10 + $0x3a4] sm:$0xf] }
 0x598   : > { %v5114_v17 = vadd.f32 %v5113_v26, %v5065_v38  ;;  %5341 = vmatpush.bf16.msrb.mxu0 %v7131_v40  ;;  %v7120_v40 = vld [vmem:[#allocation10 + $0x228] sm:$0xf0] }
 0x599   : > { %5164 = vmatmul.bf16.gmra.mxu0 %v10286_v12  ;;  %5213 = vmatmul.bf16.gmra.mxu1 %v10287_v44  ;;  %v5019_v45 = vadd.f32 %v5018_v19, %v4970_v34  ;;  %v7192_v44 = vld [vmem:[#allocation10 + $0x2b8] sm:$0xf0] }
 0x59a   : > { %v5543_v46 = vsub.f32 0.0, %v5114_v17  ;;  %5262 = vmatmul.bf16.gmra.mxu2 %v10288_v30  ;;  %5311 = vmatmul.bf16.gmra.mxu3 %v10289_v20 }
 0x59b   : > { %5488 = vmatpush.bf16.msrb.mxu3 %v7323_v18 }
 0x59c   : > { %v7839_v23 = vpop.eup %7838  ;;  %v5585_v61 = vmul.f32 1.442695, %v5543_v46 }
 0x59d   : > { %v7841_v7 = vpop.eup %7840  ;;  %v5637_v21 = vadd.f32 1.0, %v7839_v23  ;;  %v5067_v48 = vpop.f32.mrf.mxu2  ;;  %v10290_v23 = vld [vmem:[#allocation26_spill] sm:$0xff] }
 0x59e   : > { %v5116_v15 = vpop.f32.mrf.mxu3  ;;  %5699 = vst [vmem:[%s9985_s25 + $0x30] sm:$0xff] %v7841_v7  ;;  %7842 = vpow2.f32 %v5585_v61  ;;  %v5068_v58 = vadd.f32 %v5067_v48, %v5019_v45  ;;  %v4971_v27 = vpop.f32.mrf.mxu0  ;;  %v10291_v61 = vld [vmem:[#allocation27_spill] sm:$0xff]  ;;  %v10292_v7 = vld [vmem:[#allocation28_spill] sm:$0xff] }
 0x59f   : > { %v5020_v31 = vpop.f32.mrf.mxu1  ;;  %7844 = vrcp.f32 %v5637_v21  ;;  %v4972_v24 = vadd.f32 %v4971_v27, %v9929_v41  ;;  %v7673_v41 = vld [vmem:[#allocation10 + $0x2b4] sm:$0xf]  ;;  %v10293_v21 = vld [vmem:[#allocation29_spill] sm:$0xff] }
 0x5a0   : > { %v5117_v53 = vadd.f32 %v5116_v15, %v5068_v58  ;;  %v7195_v46 = vor.u32 %v7673_v41, %v7192_v44 }
 0x5a1   : > { %v5021_v10 = vadd.f32 %v5020_v31, %v4972_v24  ;;  %v7655_v24 = vld [vmem:[#allocation10 + $0x224] sm:$0xf] }
 0x5a2   : > { %v5545_v0 = vsub.f32 0.0, %v5117_v53  ;;  %5390 = vmatpush.bf16.msrb.mxu1 %v7195_v46  ;;  %v7251_v53 = vor.u32 %v7687_v57, %v7248_v43 }
 0x5a4   : > { %v7843_v26 = vpop.eup %7842  ;;  %v5589_v38 = vmul.f32 1.442695, %v5545_v0  ;;  %5440 = vmatpush.bf16.msrb.mxu2 %v7251_v53  ;;  %v7685_v53 = vld [vmem:[#allocation10 + $0x314] sm:$0xf] }
 0x5a5   : > { %v7845_v19 = vpop.eup %7844  ;;  %v5639_v50 = vadd.f32 1.0, %v7843_v26  ;;  %v5069_v11 = vpop.f32.mrf.mxu2  ;;  %v7123_v26 = vor.u32 %v7655_v24, %v7120_v40  ;;  %v7240_v24 = vld [vmem:[#allocation10 + $0x318] sm:$0xf0] }
 0x5a6   : > { %v5118_v60 = vpop.f32.mrf.mxu3  ;;  %5701 = vst [vmem:[%s9985_s25 + $0x40] sm:$0xff] %v7845_v19  ;;  %7846 = vpow2.f32 %v5589_v38  ;;  %v5070_v17 = vadd.f32 %v5069_v11, %v5021_v10  ;;  %v4974_v34 = vpop.f32.mrf.mxu0  ;;  %v7312_v38 = vld [vmem:[#allocation10 + $0x3a8] sm:$0xf0]  ;;  %v7243_v40 = vor.u32 %v7685_v53, %v7240_v24  ;;  %v10300_v24 = vld [vmem:[#allocation36_spill] sm:$0xff] }
 0x5a7   : > { %v5023_v12 = vpop.f32.mrf.mxu1  ;;  %7848 = vrcp.f32 %v5639_v50  ;;  %v4975_v20 = vadd.f32 %v4974_v34, %v9936_v8  ;;  %v7315_v10 = vor.u32 %v7703_v28, %v7312_v38  ;;  %5342 = vmatpush.bf16.msrb.mxu0 %v7123_v26  ;;  %v7653_v28 = vld [vmem:[#allocation10 + $0x214] sm:$0xf] }
 0x5a8   : > { %v5119_v30 = vadd.f32 %v5118_v60, %v5070_v17  ;;  %5441 = vmatpush.bf16.msrb.mxu2 %v7243_v40  ;;  %v10301_v40 = vld [vmem:[#allocation37_spill] sm:$0xff] }
 0x5a9   : > { %5169 = vmatmul.bf16.gmra.mxu0 %v10290_v23  ;;  %5218 = vmatmul.bf16.gmra.mxu1 %v10291_v61  ;;  %v5024_v58 = vadd.f32 %v5023_v12, %v4975_v20  ;;  %v7184_v20 = vld [vmem:[#allocation10 + $0x2a8] sm:$0xf0] }
 0x5aa   : > { %v5547_v45 = vsub.f32 0.0, %v5119_v30  ;;  %5267 = vmatmul.bf16.gmra.mxu2 %v10292_v7  ;;  %5316 = vmatmul.bf16.gmra.mxu3 %v10293_v21  ;;  %v10294_v7 = vld [vmem:[#allocation30_spill] sm:$0xff]  ;;  %v10295_v21 = vld [vmem:[#allocation31_spill] sm:$0xff] }
 0x5ab   : > { %5489 = vmatpush.bf16.msrb.mxu3 %v7315_v10 }
 0x5ac   : > { %v7847_v48 = vpop.eup %7846  ;;  %v5593_v15 = vmul.f32 1.442695, %v5547_v45 }
 0x5ad   : > { %v7849_v27 = vpop.eup %7848  ;;  %v5641_v31 = vadd.f32 1.0, %v7847_v48  ;;  %v5072_v42 = vpop.f32.mrf.mxu2 }
 0x5ae   : > { %v5121_v36 = vpop.f32.mrf.mxu3  ;;  %5703 = vst [vmem:[%s9985_s25 + $0x50] sm:$0xff] %v7849_v27  ;;  %7850 = vpow2.f32 %v5593_v15  ;;  %v5073_v8 = vadd.f32 %v5072_v42, %v5024_v58  ;;  %v4976_v1 = vpop.f32.mrf.mxu0  ;;  %v10296_v15 = vld [vmem:[#allocation32_spill] sm:$0xff]  ;;  %v10297_v58 = vld [vmem:[#allocation33_spill] sm:$0xff] }
 0x5af   : > { %v5025_v3 = vpop.f32.mrf.mxu1  ;;  %7852 = vrcp.f32 %v5641_v31  ;;  %v4977_v0 = vadd.f32 %v4976_v1, %v9939_v22  ;;  %v7671_v22 = vld [vmem:[#allocation10 + $0x2a4] sm:$0xf] }
 0x5b0   : > { %v5122_v18 = vadd.f32 %v5121_v36, %v5073_v8  ;;  %v7187_v23 = vor.u32 %v7671_v22, %v7184_v20 }
 0x5b1   : > { %v5026_v60 = vadd.f32 %v5025_v3, %v4977_v0  ;;  %v7701_v0 = vld [vmem:[#allocation10 + $0x394] sm:$0xf] }
 0x5b2   : > { %v5549_v19 = vsub.f32 0.0, %v5122_v18  ;;  %5391 = vmatpush.bf16.msrb.mxu1 %v7187_v23  ;;  %v7112_v18 = vld [vmem:[#allocation10 + $0x218] sm:$0xf0] }
 0x5b3   : > { %v7115_v10 = vor.u32 %v7653_v28, %v7112_v18 }
 0x5b4   : > { %v7851_v50 = vpop.eup %7850  ;;  %v5597_v11 = vmul.f32 1.442695, %v5549_v19  ;;  %v7304_v19 = vld [vmem:[#allocation10 + $0x398] sm:$0xf0] }
 0x5b5   : > { %v7853_v17 = vpop.eup %7852  ;;  %v5643_v34 = vadd.f32 1.0, %v7851_v50  ;;  %v5074_v12 = vpop.f32.mrf.mxu2  ;;  %v7669_v50 = vld [vmem:[#allocation10 + $0x294] sm:$0xf]  ;;  %5343 = vmatpush.bf16.msrb.mxu0 %v7115_v10 }
 0x5b6   : > { %v5123_v41 = vpop.f32.mrf.mxu3  ;;  %5705 = vst [vmem:[%s9985_s25 + $0x60] sm:$0xff] %v7853_v17  ;;  %7854 = vpow2.f32 %v5597_v11  ;;  %v5075_v44 = vadd.f32 %v5074_v12, %v5026_v60  ;;  %v4979_v46 = vpop.f32.mrf.mxu0  ;;  %v7176_v11 = vld [vmem:[#allocation10 + $0x298] sm:$0xf0]  ;;  %v7307_v60 = vor.u32 %v7701_v0, %v7304_v19 }
 0x5b7   : > { %v5028_v30 = vpop.f32.mrf.mxu1  ;;  %7856 = vrcp.f32 %v5643_v34  ;;  %v4980_v45 = vadd.f32 %v4979_v46, %v9946_v59  ;;  %v7179_v17 = vor.u32 %v7669_v50, %v7176_v11  ;;  %v7683_v46 = vld [vmem:[#allocation10 + $0x304] sm:$0xf] }
 0x5b8   : > { %v5124_v61 = vadd.f32 %v5123_v41, %v5075_v44  ;;  %5490 = vmatpush.bf16.msrb.mxu3 %v7307_v60 }
 0x5b9   : > { %5174 = vmatmul.bf16.gmra.mxu0 %v10294_v7  ;;  %5223 = vmatmul.bf16.gmra.mxu1 %v10295_v21  ;;  %v5029_v42 = vadd.f32 %v5028_v30, %v4980_v45  ;;  %v7232_v30 = vld [vmem:[#allocation10 + $0x308] sm:$0xf0]  ;;  %v7651_v45 = vld [vmem:[#allocation10 + $0x204] sm:$0xf] }
 0x5ba   : > { %v5551_v48 = vsub.f32 0.0, %v5124_v61  ;;  %5272 = vmatmul.bf16.gmra.mxu2 %v10296_v15  ;;  %5321 = vmatmul.bf16.gmra.mxu3 %v10297_v58  ;;  %v7235_v61 = vor.u32 %v7683_v46, %v7232_v30  ;;  %v7104_v7 = vld [vmem:[#allocation10 + $0x208] sm:$0xf0] }
 0x5bb   : > { %5392 = vmatpush.bf16.msrb.mxu1 %v7179_v17  ;;  %v7107_v58 = vor.u32 %v7651_v45, %v7104_v7 }
 0x5bc   : > { %v7855_v27 = vpop.eup %7854  ;;  %v5601_v31 = vmul.f32 1.442695, %v5551_v48  ;;  %5442 = vmatpush.bf16.msrb.mxu2 %v7235_v61 }
 0x5bd   : > { %v7857_v36 = vpop.eup %7856  ;;  %v5645_v8 = vadd.f32 1.0, %v7855_v27  ;;  %v5077_v1 = vpop.f32.mrf.mxu2  ;;  %v7699_v27 = vld [vmem:[#allocation10 + $0x384] sm:$0xf]  ;;  %5344 = vmatpush.bf16.msrb.mxu0 %v7107_v58 }
 0x5be   : > { %v5126_v3 = vpop.f32.mrf.mxu3  ;;  %5707 = vst [vmem:[%s9985_s25 + $0x70] sm:$0xff] %v7857_v36  ;;  %7858 = vpow2.f32 %v5601_v31  ;;  %v5078_v59 = vadd.f32 %v5077_v1, %v5029_v42  ;;  %v4981_v57 = vpop.f32.mrf.mxu0  ;;  %v7296_v31 = vld [vmem:[#allocation10 + $0x388] sm:$0xf0]  ;;  %v7667_v36 = vld [vmem:[#allocation10 + $0x284] sm:$0xf] }
 0x5bf   : > { %v5030_v43 = vpop.f32.mrf.mxu1  ;;  %7860 = vrcp.f32 %v5645_v8  ;;  %v4982_v38 = vadd.f32 %v4981_v57, %v9949_v4  ;;  %v7299_v42 = vor.u32 %v7699_v27, %v7296_v31  ;;  %v7168_v8 = vld [vmem:[#allocation10 + $0x288] sm:$0xf0]  ;;  %v10305_v58 = vld [vmem:[#allocation41_spill] sm:$0xff] }
 0x5c0   : > { %v5127_v26 = vadd.f32 %v5126_v3, %v5078_v59  ;;  %v7171_v59 = vor.u32 %v7667_v36, %v7168_v8  ;;  %v10298_v57 = vld [vmem:[#allocation34_spill] sm:$0xff] }
 0x5c1   : > { %v5031_v44 = vadd.f32 %v5030_v43, %v4982_v38  ;;  %v10299_v43 = vld [vmem:[#allocation35_spill] sm:$0xff]  ;;  %5491 = vmatpush.bf16.msrb.mxu3 %v7299_v42 }
 0x5c2   : > { %v5553_v34 = vsub.f32 0.0, %v5127_v26  ;;  %5393 = vmatpush.bf16.msrb.mxu1 %v7171_v59 }
 0x5c4   : > { %v7859_v12 = vpop.eup %7858  ;;  %v5605_v41 = vmul.f32 1.442695, %v5553_v34 }
 0x5c5   : > { %v7861_v22 = vpop.eup %7860  ;;  %v5647_v20 = vadd.f32 1.0, %v7859_v12  ;;  %v5079_v4 = vpop.f32.mrf.mxu2 }
 0x5c6   : > { %v5128_v23 = vpop.f32.mrf.mxu3  ;;  %5709 = vst [vmem:[%s9985_s25 + $0x80] sm:$0xff] %v7861_v22  ;;  %7862 = vpow2.f32 %v5605_v41  ;;  %v5080_v21 = vadd.f32 %v5079_v4, %v5031_v44  ;;  %v4984_v48 = vpop.f32.mrf.mxu0 }
 0x5c7   : > { %v5033_v15 = vpop.f32.mrf.mxu1  ;;  %7864 = vrcp.f32 %v5647_v20  ;;  %v4985_v3 = vadd.f32 %v4984_v48, %v9956_v62 }
 0x5c8   : > { %v5129_v1 = vadd.f32 %v5128_v23, %v5080_v21  ;;  %v10302_v21 = vld [vmem:[#allocation38_spill] sm:$0xff] }
 0x5c9   : > { %5179 = vmatmul.bf16.gmra.mxu0 %v10298_v57  ;;  %5228 = vmatmul.bf16.gmra.mxu1 %v10299_v43  ;;  %v5034_v0 = vadd.f32 %v5033_v15, %v4985_v3  ;;  %v10304_v15 = vld [vmem:[#allocation40_spill] sm:$0xff] }
 0x5ca   : > { %v5555_v53 = vsub.f32 0.0, %v5129_v1  ;;  %5277 = vmatmul.bf16.gmra.mxu2 %v10300_v24  ;;  %5326 = vmatmul.bf16.gmra.mxu3 %v10301_v40  ;;  %v7953_v40 = vld [vmem:[#allocation11] sm:$0x3] }
 0x5cc   : > { %v7863_v28 = vpop.eup %7862  ;;  %v5609_v18 = vmul.f32 1.442695, %v5555_v53 }
 0x5cd   : > { %v7865_v26 = vpop.eup %7864  ;;  %v5649_v38 = vadd.f32 1.0, %v7863_v28  ;;  %v5082_v62 = vpop.f32.mrf.mxu2  ;;  %v10035_v28 = vperm.slane %v7953_v40, 1 }
 0x5ce   : > { %v5131_v10 = vpop.f32.mrf.mxu3  ;;  %5711 = vst [vmem:[%s9985_s25 + $0x90] sm:$0xff] %v7865_v26  ;;  %7866 = vpow2.f32 %v5609_v18  ;;  %v5083_v19 = vadd.f32 %v5082_v62, %v5034_v0  ;;  %v4986_v50 = vpop.f32.mrf.mxu0 }
 0x5cf   : > { %v5035_v11 = vpop.f32.mrf.mxu1  ;;  %7868 = vrcp.f32 %v5649_v38  ;;  %v4987_v17 = vadd.f32 %v4986_v50, %v9959_v2  ;;  %v10303_v2 = vld [vmem:[#allocation39_spill] sm:$0xff] }
 0x5d0   : > { %v5132_v60 = vadd.f32 %v5131_v10, %v5083_v19 }
 0x5d1   : > { %v5036_v44 = vadd.f32 %v5035_v11, %v4987_v17 }
 0x5d2   : > { %v5557_v34 = vsub.f32 0.0, %v5132_v60 }
 0x5d4   : > { %v7867_v12 = vpop.eup %7866  ;;  %v5613_v41 = vmul.f32 1.442695, %v5557_v34 }
 0x5d5   : > { %v7869_v46 = vpop.eup %7868  ;;  %v5651_v30 = vadd.f32 1.0, %v7867_v12  ;;  %v5084_v22 = vpop.f32.mrf.mxu2 }
 0x5d6   : > { %v5133_v20 = vpop.f32.mrf.mxu3  ;;  %5713 = vst [vmem:[%s9985_s25 + $0xa0] sm:$0xff] %v7869_v46  ;;  %7870 = vpow2.f32 %v5613_v41  ;;  %v5085_v4 = vadd.f32 %v5084_v22, %v5036_v44  ;;  %v4989_v23 = vpop.f32.mrf.mxu0 }
 0x5d7   : > { %v5038_v61 = vpop.f32.mrf.mxu1  ;;  %7872 = vrcp.f32 %v5651_v30  ;;  %v4990_v7 = vadd.f32 %v4989_v23, %v9966_v37 }
 0x5d8   : > { %v5134_v45 = vadd.f32 %v5133_v20, %v5085_v4 }
 0x5d9   : > { %5184 = vmatmul.bf16.gmra.mxu0 %v10302_v21  ;;  %5233 = vmatmul.bf16.gmra.mxu1 %v10303_v2  ;;  %v5039_v42 = vadd.f32 %v5038_v61, %v4990_v7 }
 0x5da   : > { %v5559_v48 = vsub.f32 0.0, %v5134_v45  ;;  %5282 = vmatmul.bf16.gmra.mxu2 %v10304_v15  ;;  %5331 = vmatmul.bf16.gmra.mxu3 %v10305_v58 }
 0x5dc   : > { %v7871_v27 = vpop.eup %7870  ;;  %v5617_v31 = vmul.f32 1.442695, %v5559_v48 }
 0x5dd   : > { %v7873_v36 = vpop.eup %7872  ;;  %v5653_v8 = vadd.f32 1.0, %v7871_v27  ;;  %v5087_v1 = vpop.f32.mrf.mxu2 }
 0x5de   : > { %v5136_v3 = vpop.f32.mrf.mxu3  ;;  %5715 = vst [vmem:[%s9985_s25 + $0xb0] sm:$0xff] %v7873_v36  ;;  %7874 = vpow2.f32 %v5617_v31  ;;  %v5088_v59 = vadd.f32 %v5087_v1, %v5039_v42  ;;  %v4991_v37 = vpop.f32.mrf.mxu0  ;;  %v10306_v36 = vld [vmem:[#allocation42_spill] sm:$0xff] }
 0x5df   : > { %v5040_v57 = vpop.f32.mrf.mxu1  ;;  %7876 = vrcp.f32 %v5653_v8  ;;  %v4992_v53 = vadd.f32 %v4991_v37, %v9968_v16  ;;  %v10307_v8 = vld [vmem:[#allocation43_spill] sm:$0xff] }
 0x5e0   : > { %v5137_v43 = vadd.f32 %v5136_v3, %v5088_v59 }
 0x5e1   : > { %v5041_v26 = vadd.f32 %v5040_v57, %v4992_v53 }
 0x5e2   : > { %v5561_v24 = vsub.f32 0.0, %v5137_v43 }
 0x5e4   : > { %v7875_v18 = vpop.eup %7874  ;;  %v5621_v0 = vmul.f32 1.442695, %v5561_v24 }
 0x5e5   : > { %v7877_v38 = vpop.eup %7876  ;;  %v5655_v62 = vadd.f32 1.0, %v7875_v18  ;;  %v5089_v10 = vpop.f32.mrf.mxu2 }
 0x5e6   : > { %v5138_v19 = vpop.f32.mrf.mxu3  ;;  %5717 = vst [vmem:[%s9985_s25 + $0xc0] sm:$0xff] %v7877_v38  ;;  %7878 = vpow2.f32 %v5621_v0  ;;  %v5090_v50 = vadd.f32 %v5089_v10, %v5041_v26  ;;  %v5150_v11 = vpop.f32.mrf.mxu0 }
 0x5e7   : > { %v5199_v60 = vpop.f32.mrf.mxu1  ;;  %7880 = vrcp.f32 %v5655_v62  ;;  %v5151_v16 = vadd.f32 %v5150_v11, %v10035_v28 }
 0x5e8   : > { %v5139_v17 = vadd.f32 %v5138_v19, %v5090_v50  ;;  %v10308_v19 = vld [vmem:[#allocation44_spill] sm:$0xff]  ;;  %v10309_v50 = vld [vmem:[#allocation45_spill] sm:$0xff] }
 0x5e9   : > { %v5200_v34 = vadd.f32 %v5199_v60, %v5151_v16  ;;  %5345 = vmatmul.bf16.vlgmr.msrb.gmra.mxu0 %v9736_v49  ;;  %5394 = vmatmul.bf16.vlgmr.msrb.gmra.mxu1 %v9738_v32 }
 0x5ea   : > { %v5563_v12 = vsub.f32 0.0, %v5139_v17  ;;  %5443 = vmatmul.bf16.vlgmr.msrb.gmra.mxu2 %v9746_v13  ;;  %5492 = vmatmul.bf16.vlgmr.msrb.gmra.mxu3 %v9748_v54 }
 0x5ec   : > { %v7879_v41 = vpop.eup %7878  ;;  %v5625_v44 = vmul.f32 1.442695, %v5563_v12 }
 0x5ed   : > { %v7881_v46 = vpop.eup %7880  ;;  %v5657_v30 = vadd.f32 1.0, %v7879_v41  ;;  %v5248_v22 = vpop.f32.mrf.mxu2 }
 0x5ee   : > { %v5297_v20 = vpop.f32.mrf.mxu3  ;;  %5719 = vst [vmem:[%s9985_s25 + $0xd0] sm:$0xff] %v7881_v46  ;;  %7882 = vpow2.f32 %v5625_v44  ;;  %v5249_v4 = vadd.f32 %v5248_v22, %v5200_v34  ;;  %v5152_v23 = vpop.f32.mrf.mxu0 }
 0x5ef   : > { %v5201_v61 = vpop.f32.mrf.mxu1  ;;  %7884 = vrcp.f32 %v5657_v30  ;;  %v5153_v49 = vadd.f32 %v5152_v23, %v10035_v28 }
 0x5f0   : > { %v10045_v32 = vadd.f32 %v5297_v20, %v5249_v4 }
 0x5f1   : > { %v5202_v13 = vadd.f32 %v5201_v61, %v5153_v49  ;;  %v10310_v61 = vld [vmem:[#allocation46_spill] sm:$0xff]  ;;  %v10311_v49 = vld [vmem:[#allocation47_spill] sm:$0xff] }
 0x5f4   : > { %v7883_v45 = vpop.eup %7882 }
 0x5f5   : > { %v7885_v54 = vpop.eup %7884  ;;  %v5659_v7 = vadd.f32 1.0, %v7883_v45  ;;  %v5250_v21 = vpop.f32.mrf.mxu2 }
 0x5f6   : > { %v5299_v2 = vpop.f32.mrf.mxu3  ;;  %5721 = vst [vmem:[%s9985_s25 + $0xe0] sm:$0xff] %v7885_v54  ;;  %v5251_v48 = vadd.f32 %v5250_v21, %v5202_v13  ;;  %v5155_v15 = vpop.f32.mrf.mxu0 }
 0x5f7   : > { %v5204_v58 = vpop.f32.mrf.mxu1  ;;  %7886 = vrcp.f32 %v5659_v7  ;;  %v5156_v27 = vadd.f32 %v5155_v15, %v10035_v28 }
 0x5f8   : > { %v10049_v31 = vadd.f32 %v5299_v2, %v5251_v48 }
 0x5f9   : > { %v5205_v42 = vadd.f32 %v5204_v58, %v5156_v27  ;;  %5350 = vmatmul.bf16.gmra.mxu0 %v9756_v29  ;;  %5399 = vmatmul.bf16.gmra.mxu1 %v9758_v35 }
 0x5fa   : > { %5448 = vmatmul.bf16.gmra.mxu2 %v10306_v36  ;;  %5497 = vmatmul.bf16.gmra.mxu3 %v10307_v8 }
 0x5fd   : > { %v7887_v1 = vpop.eup %7886  ;;  %v5253_v3 = vpop.f32.mrf.mxu2 }
 0x5fe   : > { %v5302_v59 = vpop.f32.mrf.mxu3  ;;  %5723 = vst [vmem:[%s9985_s25 + $0xf0] sm:$0xff] %v7887_v1  ;;  %v5254_v37 = vadd.f32 %v5253_v3, %v5205_v42  ;;  %v5157_v57 = vpop.f32.mrf.mxu0  ;;  %v10312_v3 = vld [vmem:[#allocation48_spill] sm:$0xff] }
 0x5ff   : > { %v5206_v43 = vpop.f32.mrf.mxu1  ;;  %v5158_v53 = vadd.f32 %v5157_v57, %v10035_v28 }
 0x600   : > { %v10057_v24 = vadd.f32 %v5302_v59, %v5254_v37  ;;  %v10313_v59 = vld [vmem:[#allocation49_spill] sm:$0xff] }
 0x601   : > { %v5207_v40 = vadd.f32 %v5206_v43, %v5158_v53 }
 0x605   : > { %v5255_v18 = vpop.f32.mrf.mxu2 }
 0x606   : > { %v5304_v29 = vpop.f32.mrf.mxu3  ;;  %v5256_v0 = vadd.f32 %v5255_v18, %v5207_v40  ;;  %v5160_v35 = vpop.f32.mrf.mxu0 }
 0x607   : > { %v5209_v26 = vpop.f32.mrf.mxu1  ;;  %v5161_v38 = vadd.f32 %v5160_v35, %v10035_v28 }
 0x608   : > { %v10060_v62 = vadd.f32 %v5304_v29, %v5256_v0 }
 0x609   : > { %v5210_v10 = vadd.f32 %v5209_v26, %v5161_v38  ;;  %5355 = vmatmul.bf16.gmra.mxu0 %v9776_v9  ;;  %5404 = vmatmul.bf16.gmra.mxu1 %v9778_v33 }
 0x60a   : > { %5453 = vmatmul.bf16.gmra.mxu2 %v10308_v19  ;;  %5502 = vmatmul.bf16.gmra.mxu3 %v10309_v50 }
 0x60d   : > { %v5258_v11 = vpop.f32.mrf.mxu2 }
 0x60e   : > { %v5307_v60 = vpop.f32.mrf.mxu3  ;;  %v5259_v16 = vadd.f32 %v5258_v11, %v5210_v10  ;;  %v5162_v17 = vpop.f32.mrf.mxu0  ;;  %v10314_v11 = vld [vmem:[#allocation50_spill] sm:$0xff] }
 0x60f   : > { %v5211_v34 = vpop.f32.mrf.mxu1  ;;  %v5163_v12 = vadd.f32 %v5162_v17, %v10035_v28 }
 0x610   : > { %v10067_v41 = vadd.f32 %v5307_v60, %v5259_v16  ;;  %v10315_v60 = vld [vmem:[#allocation51_spill] sm:$0xff] }
 0x611   : > { %v5212_v44 = vadd.f32 %v5211_v34, %v5163_v12 }
 0x615   : > { %v5260_v46 = vpop.f32.mrf.mxu2 }
 0x616   : > { %v5309_v30 = vpop.f32.mrf.mxu3  ;;  %v5261_v22 = vadd.f32 %v5260_v46, %v5212_v44  ;;  %v5165_v9 = vpop.f32.mrf.mxu0 }
 0x617   : > { %v5214_v20 = vpop.f32.mrf.mxu1  ;;  %v5166_v33 = vadd.f32 %v5165_v9, %v10035_v28 }
 0x618   : > { %v10070_v4 = vadd.f32 %v5309_v30, %v5261_v22 }
 0x619   : > { %v5215_v23 = vadd.f32 %v5214_v20, %v5166_v33  ;;  %5360 = vmatmul.bf16.gmra.mxu0 %v9796_v14  ;;  %5409 = vmatmul.bf16.gmra.mxu1 %v9798_v6 }
 0x61a   : > { %5458 = vmatmul.bf16.gmra.mxu2 %v10310_v61  ;;  %5507 = vmatmul.bf16.gmra.mxu3 %v10311_v49 }
 0x61d   : > { %v5263_v13 = vpop.f32.mrf.mxu2 }
 0x61e   : > { %v5312_v45 = vpop.f32.mrf.mxu3  ;;  %v5264_v54 = vadd.f32 %v5263_v13, %v5215_v23  ;;  %v5167_v7 = vpop.f32.mrf.mxu0  ;;  %v10316_v13 = vld [vmem:[#allocation52_spill] sm:$0xff] }
 0x61f   : > { %v5216_v21 = vpop.f32.mrf.mxu1  ;;  %v5168_v2 = vadd.f32 %v5167_v7, %v10035_v28 }
 0x620   : > { %v10077_v48 = vadd.f32 %v5312_v45, %v5264_v54  ;;  %v10317_v45 = vld [vmem:[#allocation53_spill] sm:$0xff]  ;;  %v10318_v54 = vld [vmem:[#allocation54_spill] sm:$0xff] }
 0x621   : > { %v5217_v15 = vadd.f32 %v5216_v21, %v5168_v2 }
 0x625   : > { %v5265_v58 = vpop.f32.mrf.mxu2 }
 0x626   : > { %v5314_v27 = vpop.f32.mrf.mxu3  ;;  %v5266_v42 = vadd.f32 %v5265_v58, %v5217_v15  ;;  %v5170_v14 = vpop.f32.mrf.mxu0 }
 0x627   : > { %v5219_v36 = vpop.f32.mrf.mxu1  ;;  %v5171_v6 = vadd.f32 %v5170_v14, %v10035_v28 }
 0x628   : > { %v10080_v8 = vadd.f32 %v5314_v27, %v5266_v42 }
 0x629   : > { %v5220_v1 = vadd.f32 %v5219_v36, %v5171_v6  ;;  %5365 = vmatmul.bf16.gmra.mxu0 %v9816_v39  ;;  %5414 = vmatmul.bf16.gmra.mxu1 %v9818_v51 }
 0x62a   : > { %5463 = vmatmul.bf16.gmra.mxu2 %v10312_v3  ;;  %5512 = vmatmul.bf16.gmra.mxu3 %v10313_v59 }
 0x62d   : > { %v5268_v37 = vpop.f32.mrf.mxu2 }
 0x62e   : > { %v5317_v57 = vpop.f32.mrf.mxu3  ;;  %v5269_v43 = vadd.f32 %v5268_v37, %v5220_v1  ;;  %v5172_v53 = vpop.f32.mrf.mxu0 }
 0x62f   : > { %v5221_v40 = vpop.f32.mrf.mxu1  ;;  %v5173_v18 = vadd.f32 %v5172_v53, %v10035_v28 }
 0x630   : > { %v10087_v29 = vadd.f32 %v5317_v57, %v5269_v43 }
 0x631   : > { %v5222_v0 = vadd.f32 %v5221_v40, %v5173_v18 }
 0x635   : > { %v5270_v35 = vpop.f32.mrf.mxu2 }
 0x636   : > { %v5319_v26 = vpop.f32.mrf.mxu3  ;;  %v5271_v38 = vadd.f32 %v5270_v35, %v5222_v0  ;;  %v5175_v39 = vpop.f32.mrf.mxu0 }
 0x637   : > { %v5224_v10 = vpop.f32.mrf.mxu1  ;;  %v5176_v51 = vadd.f32 %v5175_v39, %v10035_v28 }
 0x638   : > { %v10090_v19 = vadd.f32 %v5319_v26, %v5271_v38 }
 0x639   : > { %v5225_v50 = vadd.f32 %v5224_v10, %v5176_v51  ;;  %5370 = vmatmul.bf16.gmra.mxu0 %v9836_v63  ;;  %5419 = vmatmul.bf16.gmra.mxu1 %v9838_v56 }
 0x63a   : > { %5468 = vmatmul.bf16.gmra.mxu2 %v10314_v11  ;;  %5517 = vmatmul.bf16.gmra.mxu3 %v10315_v60 }
 0x63d   : > { %v5273_v16 = vpop.f32.mrf.mxu2 }
 0x63e   : > { %v5322_v17 = vpop.f32.mrf.mxu3  ;;  %v5274_v34 = vadd.f32 %v5273_v16, %v5225_v50  ;;  %v5177_v12 = vpop.f32.mrf.mxu0 }
 0x63f   : > { %v5226_v44 = vpop.f32.mrf.mxu1  ;;  %v5178_v46 = vadd.f32 %v5177_v12, %v10035_v28 }
 0x640   : > { %v10097_v30 = vadd.f32 %v5322_v17, %v5274_v34 }
 0x641   : > { %v5227_v22 = vadd.f32 %v5226_v44, %v5178_v46 }
 0x645   : > { %v5275_v9 = vpop.f32.mrf.mxu2 }
 0x646   : > { %v5324_v20 = vpop.f32.mrf.mxu3  ;;  %v5276_v33 = vadd.f32 %v5275_v9, %v5227_v22  ;;  %v5180_v63 = vpop.f32.mrf.mxu0 }
 0x647   : > { %v5229_v23 = vpop.f32.mrf.mxu1  ;;  %v5181_v56 = vadd.f32 %v5180_v63, %v10035_v28 }
 0x648   : > { %v10100_v61 = vadd.f32 %v5324_v20, %v5276_v33 }
 0x649   : > { %v5230_v49 = vadd.f32 %v5229_v23, %v5181_v56  ;;  %5375 = vmatmul.bf16.gmra.mxu0 %v9856_v55  ;;  %5424 = vmatmul.bf16.gmra.mxu1 %v10316_v13 }
 0x64a   : > { %5473 = vmatmul.bf16.gmra.mxu2 %v10317_v45  ;;  %5522 = vmatmul.bf16.gmra.mxu3 %v10318_v54 }
 0x64d   : > { %v5278_v7 = vpop.f32.mrf.mxu2 }
 0x64e   : > { %v5327_v21 = vpop.f32.mrf.mxu3  ;;  %v5279_v2 = vadd.f32 %v5278_v7, %v5230_v49  ;;  %v5182_v15 = vpop.f32.mrf.mxu0 }
 0x64f   : > { %v5231_v58 = vpop.f32.mrf.mxu1  ;;  %v5183_v27 = vadd.f32 %v5182_v15, %v10035_v28 }
 0x650   : > { %v10107_v42 = vadd.f32 %v5327_v21, %v5279_v2 }
 0x651   : > { %v5232_v14 = vadd.f32 %v5231_v58, %v5183_v27 }
 0x655   : > { %v5280_v36 = vpop.f32.mrf.mxu2 }
 0x656   : > { %v5329_v6 = vpop.f32.mrf.mxu3  ;;  %v5281_v1 = vadd.f32 %v5280_v36, %v5232_v14  ;;  %v5185_v55 = vpop.f32.mrf.mxu0 }
 0x657   : > { %v5234_v3 = vpop.f32.mrf.mxu1  ;;  %v5186_v59 = vadd.f32 %v5185_v55, %v10035_v28 }
 0x658   : > { %v10110_v37 = vadd.f32 %v5329_v6, %v5281_v1 }
 0x659   : > { %v5235_v57 = vadd.f32 %v5234_v3, %v5186_v59  ;;  %5380 = vmatmul.bf16.gmra.mxu0 %v9878_v5  ;;  %5429 = vmatmul.bf16.gmra.mxu1 %v9880_v25 }
 0x65a   : > { %5478 = vmatmul.bf16.gmra.mxu2 %v9891_v47  ;;  %5527 = vmatmul.bf16.gmra.mxu3 %v9893_v52 }
 0x65d   : > { %v5283_v43 = vpop.f32.mrf.mxu2 }
 0x65e   : > { %v5332_v53 = vpop.f32.mrf.mxu3  ;;  %v5284_v40 = vadd.f32 %v5283_v43, %v5235_v57  ;;  %v5187_v18 = vpop.f32.mrf.mxu0 }
 0x65f   : > { %v5236_v0 = vpop.f32.mrf.mxu1  ;;  %v5188_v35 = vadd.f32 %v5187_v18, %v10035_v28 }
 0x660   : > { %v10117_v26 = vadd.f32 %v5332_v53, %v5284_v40 }
 0x661   : > { %v5237_v38 = vadd.f32 %v5236_v0, %v5188_v35 }
 0x665   : > { %v5285_v39 = vpop.f32.mrf.mxu2 }
 0x666   : > { %v5334_v10 = vpop.f32.mrf.mxu3  ;;  %v5286_v51 = vadd.f32 %v5285_v39, %v5237_v38  ;;  %v5346_v5 = vpop.f32.mrf.mxu0 }
 0x667   : > { %v5395_v50 = vpop.f32.mrf.mxu1  ;;  %v5347_v47 = vadd.f32 %v5346_v5, %v10045_v32 }
 0x668   : > { %v10119_v25 = vadd.f32 %v5334_v10, %v5286_v51 }
 0x669   : > { %v5396_v52 = vadd.f32 %v5395_v50, %v5347_v47 }
 0x66d   : > { %v5444_v11 = vpop.f32.mrf.mxu2 }
 0x66e   : > { %v5493_v60 = vpop.f32.mrf.mxu3  ;;  %v5445_v16 = vadd.f32 %v5444_v11, %v5396_v52  ;;  %v5348_v17 = vpop.f32.mrf.mxu0 }
 0x66f   : > { %v5397_v34 = vpop.f32.mrf.mxu1  ;;  %v5349_v28 = vadd.f32 %v5348_v17, %v10049_v31 }
 0x670   : > { %v5494_v12 = vadd.f32 %v5493_v60, %v5445_v16 }
 0x671   : > { %v5398_v22 = vadd.f32 %v5397_v34, %v5349_v28 }
 0x672   : > { %v5534_v44 = vsub.f32 0.0, %v5494_v12 }
 0x674   : > { %v5567_v46 = vmul.f32 1.442695, %v5534_v44 }
 0x675   : > { %v5446_v9 = vpop.f32.mrf.mxu2 }
 0x676   : > { %v5495_v20 = vpop.f32.mrf.mxu3  ;;  %7888 = vpow2.f32 %v5567_v46  ;;  %v5447_v33 = vadd.f32 %v5446_v9, %v5398_v22  ;;  %v5351_v63 = vpop.f32.mrf.mxu0 }
 0x677   : > { %v5400_v23 = vpop.f32.mrf.mxu1  ;;  %v5352_v32 = vadd.f32 %v5351_v63, %v10057_v24 }
 0x678   : > { %v5496_v56 = vadd.f32 %v5495_v20, %v5447_v33 }
 0x679   : > { %v5401_v54 = vadd.f32 %v5400_v23, %v5352_v32 }
 0x67a   : > { %v5536_v49 = vsub.f32 0.0, %v5496_v56 }
 0x67c   : > { %v7889_v13 = vpop.eup %7888  ;;  %v5571_v45 = vmul.f32 1.442695, %v5536_v49 }
 0x67d   : > { %v5630_v7 = vadd.f32 1.0, %v7889_v13  ;;  %v5449_v21 = vpop.f32.mrf.mxu2 }
 0x67e   : > { %v5498_v2 = vpop.f32.mrf.mxu3  ;;  %7890 = vpow2.f32 %v5571_v45  ;;  %v5450_v31 = vadd.f32 %v5449_v21, %v5401_v54  ;;  %v5353_v15 = vpop.f32.mrf.mxu0 }
 0x67f   : > { %v5402_v58 = vpop.f32.mrf.mxu1  ;;  %7892 = vrcp.f32 %v5630_v7  ;;  %v5354_v14 = vadd.f32 %v5353_v15, %v10060_v62 }
 0x680   : > { %v5499_v27 = vadd.f32 %v5498_v2, %v5450_v31 }
 0x681   : > { %v5403_v24 = vadd.f32 %v5402_v58, %v5354_v14 }
 0x682   : > { %v5538_v36 = vsub.f32 0.0, %v5499_v27 }
 0x684   : > { %v7891_v6 = vpop.eup %7890  ;;  %v5575_v1 = vmul.f32 1.442695, %v5538_v36 }
 0x685   : > { %v7893_v55 = vpop.eup %7892  ;;  %v5632_v3 = vadd.f32 1.0, %v7891_v6  ;;  %v5451_v59 = vpop.f32.mrf.mxu2 }
 0x686   : > { %v5500_v57 = vpop.f32.mrf.mxu3  ;;  %5694 = vst [vmem:[%s9985_s25 + $0x8] sm:$0xff] %v7893_v55  ;;  %7894 = vpow2.f32 %v5575_v1  ;;  %v5452_v43 = vadd.f32 %v5451_v59, %v5403_v24  ;;  %v5356_v53 = vpop.f32.mrf.mxu0 }
 0x687   : > { %v5405_v40 = vpop.f32.mrf.mxu1  ;;  %7896 = vrcp.f32 %v5632_v3  ;;  %v5357_v0 = vadd.f32 %v5356_v53, %v10067_v41 }
 0x688   : > { %v5501_v18 = vadd.f32 %v5500_v57, %v5452_v43 }
 0x689   : > { %v5406_v39 = vadd.f32 %v5405_v40, %v5357_v0 }
 0x68a   : > { %v5540_v35 = vsub.f32 0.0, %v5501_v18 }
 0x68c   : > { %v7895_v62 = vpop.eup %7894  ;;  %v5579_v38 = vmul.f32 1.442695, %v5540_v35 }
 0x68d   : > { %v7897_v10 = vpop.eup %7896  ;;  %v5634_v51 = vadd.f32 1.0, %v7895_v62  ;;  %v5454_v5 = vpop.f32.mrf.mxu2 }
 0x68e   : > { %v5503_v50 = vpop.f32.mrf.mxu3  ;;  %5696 = vst [vmem:[%s9985_s25 + $0x18] sm:$0xff] %v7897_v10  ;;  %7898 = vpow2.f32 %v5579_v38  ;;  %v5455_v47 = vadd.f32 %v5454_v5, %v5406_v39  ;;  %v5358_v52 = vpop.f32.mrf.mxu0 }
 0x68f   : > { %v5407_v11 = vpop.f32.mrf.mxu1  ;;  %7900 = vrcp.f32 %v5634_v51  ;;  %v5359_v16 = vadd.f32 %v5358_v52, %v10070_v4 }
 0x690   : > { %v5504_v60 = vadd.f32 %v5503_v50, %v5455_v47 }
 0x691   : > { %v5408_v12 = vadd.f32 %v5407_v11, %v5359_v16 }
 0x692   : > { %v5542_v17 = vsub.f32 0.0, %v5504_v60 }
 0x694   : > { %v7899_v41 = vpop.eup %7898  ;;  %v5583_v34 = vmul.f32 1.442695, %v5542_v17 }
 0x695   : > { %v7901_v28 = vpop.eup %7900  ;;  %v5636_v44 = vadd.f32 1.0, %v7899_v41  ;;  %v5456_v46 = vpop.f32.mrf.mxu2 }
 0x696   : > { %v5505_v22 = vpop.f32.mrf.mxu3  ;;  %5698 = vst [vmem:[%s9985_s25 + $0x28] sm:$0xff] %v7901_v28  ;;  %7902 = vpow2.f32 %v5583_v34  ;;  %v5457_v9 = vadd.f32 %v5456_v46, %v5408_v12  ;;  %v5361_v20 = vpop.f32.mrf.mxu0 }
 0x697   : > { %v5410_v33 = vpop.f32.mrf.mxu1  ;;  %7904 = vrcp.f32 %v5636_v44  ;;  %v5362_v23 = vadd.f32 %v5361_v20, %v10077_v48 }
 0x698   : > { %v5506_v63 = vadd.f32 %v5505_v22, %v5457_v9 }
 0x699   : > { %v5411_v49 = vadd.f32 %v5410_v33, %v5362_v23 }
 0x69a   : > { %v5544_v56 = vsub.f32 0.0, %v5506_v63 }
 0x69c   : > { %v7903_v4 = vpop.eup %7902  ;;  %v5587_v32 = vmul.f32 1.442695, %v5544_v56 }
 0x69d   : > { %v7905_v13 = vpop.eup %7904  ;;  %v5638_v45 = vadd.f32 1.0, %v7903_v4  ;;  %v5459_v54 = vpop.f32.mrf.mxu2 }
 0x69e   : > { %v5508_v7 = vpop.f32.mrf.mxu3  ;;  %5700 = vst [vmem:[%s9985_s25 + $0x38] sm:$0xff] %v7905_v13  ;;  %7906 = vpow2.f32 %v5587_v32  ;;  %v5460_v21 = vadd.f32 %v5459_v54, %v5411_v49  ;;  %v5363_v2 = vpop.f32.mrf.mxu0 }
 0x69f   : > { %v5412_v31 = vpop.f32.mrf.mxu1  ;;  %7908 = vrcp.f32 %v5638_v45  ;;  %v5364_v58 = vadd.f32 %v5363_v2, %v10080_v8 }
 0x6a0   : > { %v5509_v15 = vadd.f32 %v5508_v7, %v5460_v21 }
 0x6a1   : > { %v5413_v36 = vadd.f32 %v5412_v31, %v5364_v58 }
 0x6a2   : > { %v5546_v27 = vsub.f32 0.0, %v5509_v15 }
 0x6a4   : > { %v7907_v48 = vpop.eup %7906  ;;  %v5591_v14 = vmul.f32 1.442695, %v5546_v27 }
 0x6a5   : > { %v7909_v6 = vpop.eup %7908  ;;  %v5640_v1 = vadd.f32 1.0, %v7907_v48  ;;  %v5461_v24 = vpop.f32.mrf.mxu2 }
 0x6a6   : > { %v5510_v55 = vpop.f32.mrf.mxu3  ;;  %5702 = vst [vmem:[%s9985_s25 + $0x48] sm:$0xff] %v7909_v6  ;;  %7910 = vpow2.f32 %v5591_v14  ;;  %v5462_v3 = vadd.f32 %v5461_v24, %v5413_v36  ;;  %v5366_v59 = vpop.f32.mrf.mxu0 }
 0x6a7   : > { %v5415_v57 = vpop.f32.mrf.mxu1  ;;  %7912 = vrcp.f32 %v5640_v1  ;;  %v5367_v53 = vadd.f32 %v5366_v59, %v10087_v29 }
 0x6a8   : > { %v5511_v43 = vadd.f32 %v5510_v55, %v5462_v3 }
 0x6a9   : > { %v5416_v0 = vadd.f32 %v5415_v57, %v5367_v53 }
 0x6aa   : > { %v5548_v40 = vsub.f32 0.0, %v5511_v43 }
 0x6ac   : > { %v7911_v8 = vpop.eup %7910  ;;  %v5595_v18 = vmul.f32 1.442695, %v5548_v40 }
 0x6ad   : > { %v7913_v35 = vpop.eup %7912  ;;  %v5642_v62 = vadd.f32 1.0, %v7911_v8  ;;  %v5464_v38 = vpop.f32.mrf.mxu2 }
 0x6ae   : > { %v5513_v39 = vpop.f32.mrf.mxu3  ;;  %5704 = vst [vmem:[%s9985_s25 + $0x58] sm:$0xff] %v7913_v35  ;;  %7914 = vpow2.f32 %v5595_v18  ;;  %v5465_v10 = vadd.f32 %v5464_v38, %v5416_v0  ;;  %v5368_v51 = vpop.f32.mrf.mxu0 }
 0x6af   : > { %v5417_v5 = vpop.f32.mrf.mxu1  ;;  %7916 = vrcp.f32 %v5642_v62  ;;  %v5369_v47 = vadd.f32 %v5368_v51, %v10090_v19 }
 0x6b0   : > { %v5514_v50 = vadd.f32 %v5513_v39, %v5465_v10 }
 0x6b1   : > { %v5418_v60 = vadd.f32 %v5417_v5, %v5369_v47 }
 0x6b2   : > { %v5550_v52 = vsub.f32 0.0, %v5514_v50 }
 0x6b4   : > { %v7915_v29 = vpop.eup %7914  ;;  %v5599_v11 = vmul.f32 1.442695, %v5550_v52 }
 0x6b5   : > { %v7917_v16 = vpop.eup %7916  ;;  %v5644_v17 = vadd.f32 1.0, %v7915_v29  ;;  %v5466_v41 = vpop.f32.mrf.mxu2 }
 0x6b6   : > { %v5515_v34 = vpop.f32.mrf.mxu3  ;;  %5706 = vst [vmem:[%s9985_s25 + $0x68] sm:$0xff] %v7917_v16  ;;  %7918 = vpow2.f32 %v5599_v11  ;;  %v5467_v12 = vadd.f32 %v5466_v41, %v5418_v60  ;;  %v5371_v28 = vpop.f32.mrf.mxu0 }
 0x6b7   : > { %v5420_v44 = vpop.f32.mrf.mxu1  ;;  %7920 = vrcp.f32 %v5644_v17  ;;  %v5372_v22 = vadd.f32 %v5371_v28, %v10097_v30 }
 0x6b8   : > { %v5516_v46 = vadd.f32 %v5515_v34, %v5467_v12 }
 0x6b9   : > { %v5421_v33 = vadd.f32 %v5420_v44, %v5372_v22 }
 0x6ba   : > { %v5552_v9 = vsub.f32 0.0, %v5516_v46 }
 0x6bc   : > { %v7919_v19 = vpop.eup %7918  ;;  %v5603_v20 = vmul.f32 1.442695, %v5552_v9 }
 0x6bd   : > { %v7921_v63 = vpop.eup %7920  ;;  %v5646_v23 = vadd.f32 1.0, %v7919_v19  ;;  %v5469_v56 = vpop.f32.mrf.mxu2 }
 0x6be   : > { %v5518_v4 = vpop.f32.mrf.mxu3  ;;  %5708 = vst [vmem:[%s9985_s25 + $0x78] sm:$0xff] %v7921_v63  ;;  %7922 = vpow2.f32 %v5603_v20  ;;  %v5470_v32 = vadd.f32 %v5469_v56, %v5421_v33  ;;  %v5373_v49 = vpop.f32.mrf.mxu0 }
 0x6bf   : > { %v5422_v13 = vpop.f32.mrf.mxu1  ;;  %7924 = vrcp.f32 %v5646_v23  ;;  %v5374_v54 = vadd.f32 %v5373_v49, %v10100_v61 }
 0x6c0   : > { %v5519_v45 = vadd.f32 %v5518_v4, %v5470_v32 }
 0x6c1   : > { %v5423_v2 = vadd.f32 %v5422_v13, %v5374_v54 }
 0x6c2   : > { %v5554_v7 = vsub.f32 0.0, %v5519_v45 }
 0x6c4   : > { %v7923_v30 = vpop.eup %7922  ;;  %v5607_v21 = vmul.f32 1.442695, %v5554_v7 }
 0x6c5   : > { %v7925_v31 = vpop.eup %7924  ;;  %v5648_v15 = vadd.f32 1.0, %v7923_v30  ;;  %v5471_v58 = vpop.f32.mrf.mxu2 }
 0x6c6   : > { %v5520_v27 = vpop.f32.mrf.mxu3  ;;  %5710 = vst [vmem:[%s9985_s25 + $0x88] sm:$0xff] %v7925_v31  ;;  %7926 = vpow2.f32 %v5607_v21  ;;  %v5472_v48 = vadd.f32 %v5471_v58, %v5423_v2  ;;  %v5376_v14 = vpop.f32.mrf.mxu0 }
 0x6c7   : > { %v5425_v36 = vpop.f32.mrf.mxu1  ;;  %7928 = vrcp.f32 %v5648_v15  ;;  %v5377_v1 = vadd.f32 %v5376_v14, %v10107_v42 }
 0x6c8   : > { %v5521_v6 = vadd.f32 %v5520_v27, %v5472_v48 }
 0x6c9   : > { %v5426_v3 = vadd.f32 %v5425_v36, %v5377_v1 }
 0x6ca   : > { %v5556_v24 = vsub.f32 0.0, %v5521_v6 }
 0x6cc   : > { %v7927_v61 = vpop.eup %7926  ;;  %v5611_v55 = vmul.f32 1.442695, %v5556_v24 }
 0x6cd   : > { %v7929_v59 = vpop.eup %7928  ;;  %v5650_v57 = vadd.f32 1.0, %v7927_v61  ;;  %v5474_v43 = vpop.f32.mrf.mxu2 }
 0x6ce   : > { %v5523_v53 = vpop.f32.mrf.mxu3  ;;  %5712 = vst [vmem:[%s9985_s25 + $0x98] sm:$0xff] %v7929_v59  ;;  %7930 = vpow2.f32 %v5611_v55  ;;  %v5475_v40 = vadd.f32 %v5474_v43, %v5426_v3  ;;  %v5378_v8 = vpop.f32.mrf.mxu0 }
 0x6cf   : > { %7932 = vrcp.f32 %v5650_v57  ;;  %v5427_v18 = vpop.f32.mrf.mxu1  ;;  %v5379_v35 = vadd.f32 %v5378_v8, %v10110_v37 }
 0x6d0   : > { %v5524_v0 = vadd.f32 %v5523_v53, %v5475_v40 }
 0x6d1   : > { %v5428_v39 = vadd.f32 %v5427_v18, %v5379_v35 }
 0x6d2   : > { %v5558_v62 = vsub.f32 0.0, %v5524_v0 }
 0x6d4   : > { %v7931_v42 = vpop.eup %7930  ;;  %v5615_v38 = vmul.f32 1.442695, %v5558_v62 }
 0x6d5   : > { %v7933_v10 = vpop.eup %7932  ;;  %v5652_v51 = vadd.f32 1.0, %v7931_v42  ;;  %v5476_v5 = vpop.f32.mrf.mxu2 }
 0x6d6   : > { %v5525_v50 = vpop.f32.mrf.mxu3  ;;  %5714 = vst [vmem:[%s9985_s25 + $0xa8] sm:$0xff] %v7933_v10  ;;  %7934 = vpow2.f32 %v5615_v38  ;;  %v5477_v47 = vadd.f32 %v5476_v5, %v5428_v39  ;;  %v5381_v52 = vpop.f32.mrf.mxu0 }
 0x6d7   : > { %7936 = vrcp.f32 %v5652_v51  ;;  %v5382_v11 = vadd.f32 %v5381_v52, %v10117_v26  ;;  %v5430_v60 = vpop.f32.mrf.mxu1 }
 0x6d8   : > { %v5526_v29 = vadd.f32 %v5525_v50, %v5477_v47 }
 0x6d9   : > { %v5431_v41 = vadd.f32 %v5430_v60, %v5382_v11 }
 0x6da   : > { %v5560_v16 = vsub.f32 0.0, %v5526_v29 }
 0x6dc   : > { %v7935_v37 = vpop.eup %7934  ;;  %v5619_v17 = vmul.f32 1.442695, %v5560_v16 }
 0x6dd   : > { %v7937_v34 = vpop.eup %7936  ;;  %v5654_v12 = vadd.f32 1.0, %v7935_v37  ;;  %v5479_v28 = vpop.f32.mrf.mxu2 }
 0x6de   : > { %v5528_v44 = vpop.f32.mrf.mxu3  ;;  %5716 = vst [vmem:[%s9985_s25 + $0xb8] sm:$0xff] %v7937_v34  ;;  %7938 = vpow2.f32 %v5619_v17  ;;  %v5480_v46 = vadd.f32 %v5479_v28, %v5431_v41  ;;  %v5383_v22 = vpop.f32.mrf.mxu0 }
 0x6df   : > { %7940 = vrcp.f32 %v5654_v12  ;;  %v5384_v19 = vadd.f32 %v5383_v22, %v10119_v25  ;;  %v5432_v26 = vpop.f32.mrf.mxu1 }
 0x6e0   : > { %v5529_v9 = vadd.f32 %v5528_v44, %v5480_v46 }
 0x6e1   : > { %v5433_v23 = vadd.f32 %v5432_v26, %v5384_v19 }
 0x6e2   : > { %v5562_v20 = vsub.f32 0.0, %v5529_v9 }
 0x6e4   : > { %v7939_v33 = vpop.eup %7938  ;;  %v5623_v63 = vmul.f32 1.442695, %v5562_v20 }
 0x6e5   : > { %v7941_v56 = vpop.eup %7940  ;;  %v5656_v4 = vadd.f32 1.0, %v7939_v33  ;;  %v5481_v32 = vpop.f32.mrf.mxu2 }
 0x6e6   : > { %5718 = vst [vmem:[%s9985_s25 + $0xc8] sm:$0xff] %v7941_v56  ;;  %7942 = vpow2.f32 %v5623_v63  ;;  %v5482_v49 = vadd.f32 %v5481_v32, %v5433_v23  ;;  %v5530_v13 = vpop.f32.mrf.mxu3 }
 0x6e7   : > { %7944 = vrcp.f32 %v5656_v4 }
 0x6e8   : > { %v5531_v45 = vadd.f32 %v5530_v13, %v5482_v49 }
 0x6ea   : > { %v5564_v54 = vsub.f32 0.0, %v5531_v45 }
 0x6ec   : > { %v7943_v25 = vpop.eup %7942  ;;  %v5627_v7 = vmul.f32 1.442695, %v5564_v54 }
 0x6ed   : > { %v7945_v30 = vpop.eup %7944  ;;  %v5658_v21 = vadd.f32 1.0, %v7943_v25 }
 0x6ee   : > { %5720 = vst [vmem:[%s9985_s25 + $0xd8] sm:$0xff] %v7945_v30  ;;  %7946 = vpow2.f32 %v5627_v7 }
 0x6ef   : > { %7948 = vrcp.f32 %v5658_v21 }
 0x6f4   : > { %v7947_v2 = vpop.eup %7946 }
 0x6f5   : > { %v7949_v31 = vpop.eup %7948  ;;  %v5660_v15 = vadd.f32 1.0, %v7947_v2 }
 0x6f6   : > { %5722 = vst [vmem:[%s9985_s25 + $0xe8] sm:$0xff] %v7949_v31 }
 0x6f7   : > { %7950 = vrcp.f32 %v5660_v15 }
 0x6fd   : > { %v7951_v58 = vpop.eup %7950 }
 0x6fe   : > { %5724 = vst [vmem:[%s9985_s25 + $0xf8] sm:$0xff] %v7951_v58 }
 0x6ff   : > { %8161 = shalt.err (!%p8158_p8)
}
 0x700   : > { %s8224_s26 = smov 256   ;;  %s8225_s23 = smov 16  }
 0x701   : > { %7741 = dma.vmem_to_hbm [thread:$0]  (%p8314_p5), %s5740_s22, 4096, %s5742_s28, %s5726_s16, %s8224_s26, %s8224_s26, %s8225_s23  }
 0x702 PF: > { %p7778_p9 = scmp.ge.s32.totalorder %s8212_s12, 2  ;;  %s5756_s29 = sand.u32 1, %s8200_s30  }
 0x703   : > { %s5757_s25 = scalar_lea.sflag [#allocation4], %s5756_s29 }
 0x704   : > { %p7763_p10 = pnand %p7778_p9, %p8318_p6 }
 0x706   : > { %p7764_p11 = pneg %p7763_p10 }
 0x708   : > { %8195 = dma.done.wait (%p7764_p11), %s5757_s25, 4096  }
 0x709   : > { %8197 = vsyncadd (%p7764_p11), %s5757_s25, 4294963200  ;;  %s10319_s2 = sld [smem:[#allocation19_spill]]  ;;  %p23_p12 = scmp.ge.s32.totalorder %s8301_s15, 4  }
 0x70a   : > { %s10320_s11 = sld [smem:[#allocation20_spill]]  ;;  %s10321_s30 = smov %s8204_s10 }
 0x70b   : > { %s10323_s12 = smov %s8301_s15  ;;  %25 = sbr.rel (!%p23_p12) target bundleno = 11 (0xb), region = 116 }
 0x70f   : > { %s10322_s10 = smov %s10319_s2 }
 0x710   :  { %5763 = vsyncpa [#allocation3], 1 }
 0x711   :  { %5765 = vsyncpa [#allocation3 + $0x1], 1 }
 0x712   :  { %5766 = vsyncpa [#allocation6], 1 }
 0x713   :  { %5767 = vsyncpa [#allocation9], 1 }
 0x714   :  { %5768 = vsyncpa [#allocation12], 1 }
 0x715   :  { %5769 = vsyncpa [#allocation4], 1 }
 0x716   :  { %5771 = vsyncpa [#allocation4 + $0x1], 1 }

</bundles_post_ra>
